<compile_context>
chip_gen: v7x
topology: tpu7x:2x2x1
jax: 0.10.0
libtpu: 0.0.40
codegen_flags: <defaults>
</compile_context>

<pallas_src>
import functools

import jax
import jax.numpy as jnp
from jax.experimental import pallas as pl
from jax.experimental.pallas import tpu as pltpu


def _round_up(x, m):
    return (x + m - 1) // m * m


# ------------------------------ Pallas kernel -------------------------------

def _bottleneck_kernel(x_ref, w1_ref, b1_ref, w2_ref, b2_ref, o_ref,
                       yp_ref, col_ref, *, H, W, add):
    """Fused cv1(1x1)->BN->hswish -> cv2(3x3,pad1)->BN->hswish [+ residual].

    x_ref  : (1, H, W, c1p)        act dtype  input image (channel-padded)
    w1_ref : (c1p, c_p)            bf16       cv1 weight (BN1 scale folded)
    b1_ref : (1, c_p)              f32        cv1 folded BN bias
    w2_ref : (9*c_p, c2p)          bf16       cv2 weight, row block = tap kh*3+kw
    b2_ref : (1, c2p)              f32        cv2 folded BN bias
    o_ref  : (1, H, W, c2p)        act dtype  output image
    yp_ref : (H+2, Wp, c_p)        bf16 VMEM  zero-ringed cv1 activation (halo)
    col_ref: (H*W, 9*c_p)          bf16 VMEM  im2col buffer
    """
    c1p = x_ref.shape[-1]
    c_p = w1_ref.shape[-1]
    c2p = w2_ref.shape[-1]
    Wp = yp_ref.shape[1]
    PAD_L = 8                                   # sublane-aligned interior offset

    x = x_ref[0]                                # (H, W, c1p)
    x2d = x.reshape(H * W, c1p)

    # ---- cv1: 1x1 conv == channel matmul (bf16 MXU, f32 acc) + bias + hswish
    y1 = jnp.dot(x2d.astype(jnp.bfloat16), w1_ref[...],
                 preferred_element_type=jnp.float32)         # (H*W, c_p) f32
    y1 = y1 + b1_ref[...]
    y1 = y1 * jnp.clip(y1 + 3.0, 0.0, 6.0) * (1.0 / 6.0)     # Hardswish

    # ---- zero only the halo ring (cheap; per-step so it is also correct when
    #      the batch axis is split across megacore TensorCores)
    yp_ref[0] = jnp.zeros((Wp, c_p), jnp.bfloat16)
    yp_ref[H + 1] = jnp.zeros((Wp, c_p), jnp.bfloat16)
    yp_ref[:, 0:PAD_L, :] = jnp.zeros((H + 2, PAD_L, c_p), jnp.bfloat16)
    yp_ref[:, PAD_L + W:Wp, :] = jnp.zeros((H + 2, Wp - PAD_L - W, c_p),
                                           jnp.bfloat16)

    # ---- interior write: single bf16 cast, sublane-aligned store offset
    yp_ref[1:H + 1, PAD_L:PAD_L + W, :] = (
        y1.astype(jnp.bfloat16).reshape(H, W, c_p))

    # ---- im2col: 9 shifted windows packed into (H*W, 9*c_p) bf16 scratch
    for kh in range(3):
        for kw in range(3):
            t = kh * 3 + kw
            c0 = PAD_L - 1 + kw
            win = yp_ref[kh:kh + H, c0:c0 + W, :]             # (H, W, c_p) bf16
            col_ref[:, t * c_p:(t + 1) * c_p] = win.reshape(H * W, c_p)

    # ---- cv2: ONE MXU dot with K = 9*c_p, f32 accumulation
    y2 = jnp.dot(col_ref[...], w2_ref[...],
                 preferred_element_type=jnp.float32)          # (H*W, c2p) f32
    y2 = y2 + b2_ref[...]
    y2 = y2 * jnp.clip(y2 + 3.0, 0.0, 6.0) * (1.0 / 6.0)      # Hardswish
    if add:                                                   # shortcut (c1==c2)
        y2 = y2 + x2d.astype(jnp.float32)

    o_ref[0] = y2.reshape(H, W, c2p).astype(o_ref.dtype)


# ------------------------------ Module glue ---------------------------------

def _fold_bn(gamma, beta, mean, var, eps=1e-5):
    scale = gamma / jnp.sqrt(var + eps)
    bias = beta - mean * scale
    return scale, bias


def init_bottleneck_params(key, c1, c2, e=0.5):
    c_ = int(c2 * e)
    k1, k2 = jax.random.split(key)
    # PyTorch conv weight layout (cout, cin, kh, kw); deterministic init.
    w1 = jax.random.normal(k1, (c_, c1, 1, 1), jnp.float32) * 0.1
    w2 = jax.random.normal(k2, (c2, c_, 3, 3), jnp.float32) * 0.1
    bn1 = dict(gamma=jnp.ones((c_,)), beta=jnp.zeros((c_,)),
               mean=jnp.zeros((c_,)), var=jnp.ones((c_,)))
    bn2 = dict(gamma=jnp.ones((c2,)), beta=jnp.zeros((c2,)),
               mean=jnp.zeros((c2,)), var=jnp.ones((c2,)))
    return dict(w1=w1, bn1=bn1, w2=w2, bn2=bn2, c_=c_, c1=c1, c2=c2)


def bottleneck_forward_nhwc(params, x_nhwc, shortcut=True):
    """x_nhwc: (N, H, W, c1), f32 or bf16. Returns (N, H, W, c2) same dtype.

    For inference chains, pass bf16 activations here (kernel I/O follows the
    input dtype, halving HBM traffic) and keep NHWC between blocks.
    """
    c1, c2, c_ = params["c1"], params["c2"], params["c_"]
    N, H, W, C = x_nhwc.shape
    assert C == c1
    add = bool(shortcut and c1 == c2)
    act_dtype = x_nhwc.dtype

    LANE = 128
    c1p = _round_up(c1, LANE)
    c_p = _round_up(c_, LANE)
    c2p = _round_up(c2, LANE)
    Wp = 8 + _round_up(W + 1, 8)          # 8-col left halo (aligned interior),
                                          # >=1 zero col on the right

    s1, b1 = _fold_bn(**params["bn1"])
    s2, b2 = _fold_bn(**params["bn2"])

    # Fold BN scale into the weights (constants in eval mode), pad channel
    # dims to 128 for lane-dense matmuls/stores, cast to bf16 for the MXU.
    w1 = params["w1"].reshape(c_, c1).T * s1[None, :]               # (c1, c_)
    w1p = jnp.zeros((c1p, c_p), jnp.float32).at[:c1, :c_].set(w1)
    w1p = w1p.astype(jnp.bfloat16)

    w2 = jnp.transpose(params["w2"], (2, 3, 1, 0)) * s2[None, None, None, :]
    w2p = jnp.zeros((3, 3, c_p, c2p), jnp.float32).at[:, :, :c_, :c2].set(w2)
    w2p = w2p.reshape(9 * c_p, c2p).astype(jnp.bfloat16)            # tap-major

    b1p = jnp.zeros((1, c_p), jnp.float32).at[0, :c_].set(b1)
    b2p = jnp.zeros((1, c2p), jnp.float32).at[0, :c2].set(b2)

    if c1p != c1:
        xp = jnp.pad(x_nhwc, ((0, 0), (0, 0), (0, 0), (0, c1p - c1)))
    else:
        xp = x_nhwc

    # VMEM budget: double-buffered in/out blocks + weights + scratch + f32
    # intermediates, with 2x margin; capped so it is valid on v7x (64 MiB).
    act_bytes = jnp.dtype(act_dtype).itemsize
    est = (2 * H * W * (c1p + c2p) * act_bytes
           + 2 * (c1p * c_p + 9 * c_p * c2p) * 2 + 2 * (c_p + c2p) * 4
           + (H + 2) * Wp * c_p * 2
           + H * W * 9 * c_p * 2
           + 4 * H * W * (c_p + c2p) * 4)
    vmem_limit = int(min(max(2 * est, 32 * 1024 * 1024), 64 * 1024 * 1024))

    kernel = functools.partial(_bottleneck_kernel, H=H, W=W, add=add)

    out = pl.pallas_call(
        kernel,
        out_shape=jax.ShapeDtypeStruct((N, H, W, c2p), act_dtype),
        grid=(N,),
        in_specs=[
            pl.BlockSpec((1, H, W, c1p), lambda n: (n, 0, 0, 0)),
            pl.BlockSpec((c1p, c_p), lambda n: (0, 0)),
            pl.BlockSpec((1, c_p), lambda n: (0, 0)),
            pl.BlockSpec((9 * c_p, c2p), lambda n: (0, 0)),
            pl.BlockSpec((1, c2p), lambda n: (0, 0)),
        ],
        out_specs=pl.BlockSpec((1, H, W, c2p), lambda n: (n, 0, 0, 0)),
        scratch_shapes=[
            pltpu.VMEM((H + 2, Wp, c_p), jnp.bfloat16),   # halo (cv1 act)
            pltpu.VMEM((H * W, 9 * c_p), jnp.bfloat16),   # im2col buffer
        ],
        compiler_params=pltpu.CompilerParams(
            dimension_semantics=("parallel",),
            vmem_limit_bytes=vmem_limit),
    )(xp, w1p, b1p, w2p, b2p)

    return out[..., :c2] if c2p != c2 else out


def bottleneck_forward(params, x_nchw, shortcut=True):
    """PyTorch-facing entry point: x_nchw (N, c1, H, W) -> (N, c2, H, W)."""
    x_nhwc = jnp.transpose(x_nchw, (0, 2, 3, 1))
    out = bottleneck_forward_nhwc(params, x_nhwc, shortcut=shortcut)
    return jnp.transpose(out, (0, 3, 1, 2))


# -------------------------------- Reference ---------------------------------

def _hardswish_ref(x):
    return x * jnp.clip(x + 3.0, 0.0, 6.0) / 6.0


def bottleneck_ref(params, x_nchw, shortcut=True):
    c1, c2 = params["c1"], params["c2"]
    add = shortcut and (c1 == c2)
    s1, b1 = _fold_bn(**params["bn1"])
    s2, b2 = _fold_bn(**params["bn2"])
    y = jax.lax.conv_general_dilated(
        x_nchw, params["w1"], (1, 1), "VALID",
        dimension_numbers=("NCHW", "OIHW", "NCHW"))
    y = _hardswish_ref(y * s1[None, :, None, None] + b1[None, :, None, None])
    y = jax.lax.conv_general_dilated(
        y, params["w2"], (1, 1), ((1, 1), (1, 1)),
        dimension_numbers=("NCHW", "OIHW", "NCHW"))
    y = _hardswish_ref(y * s2[None, :, None, None] + b2[None, :, None, None])
    return x_nchw + y if add else y


# ---------------------------------- Main -------------------------------------

if __name__ == "__main__":
    key = jax.random.PRNGKey(0)
    kx, kp = jax.random.split(key)

    N, C1, H, W = 2, 4, 16, 16
    C2 = 4  # shortcut active since c1 == c2
    x = jax.random.normal(kx, (N, C1, H, W), jnp.float32)

    params = init_bottleneck_params(kp, C1, C2, e=0.5)

    # --- f32 NCHW path (PyTorch-facing) -------------------------------------
    out = bottleneck_forward(params, x, shortcut=True)
    out = jax.block_until_ready(out)

    ref = bottleneck_ref(params, x, shortcut=True)
    assert out.shape == (N, C2, H, W)
    # Matmuls run in bf16 (f32 accumulate/epilogue) -> bf16-level tolerance.
    max_err = float(jnp.max(jnp.abs(out - ref)))
    assert jnp.allclose(out, ref, atol=1e-2, rtol=1e-2), max_err

    # --- bf16 NHWC path (inference-chain boundary) ---------------------------
    x_nhwc_bf16 = jnp.transpose(x, (0, 2, 3, 1)).astype(jnp.bfloat16)
    out_bf16 = bottleneck_forward_nhwc(params, x_nhwc_bf16, shortcut=True)
    out_bf16 = jax.block_until_ready(out_bf16)
    ref_nhwc = jnp.transpose(ref, (0, 2, 3, 1))
    assert out_bf16.shape == (N, H, W, C2)
    assert jnp.allclose(out_bf16.astype(jnp.float32), ref_nhwc,
                        atol=6e-2, rtol=6e-2)

    print("KERNEL_OK")
</pallas_src>

<mosaic_0001>
module attributes {stable_mosaic.version = 11 : i64} {
  func.func @_bottleneck_kernel(%arg0: i32, %arg1: memref<1x16x16x128xf32, #tpu.memory_space<vmem>>, %arg2: memref<128x128xbf16, #tpu.memory_space<vmem>>, %arg3: memref<1x128xf32, #tpu.memory_space<vmem>>, %arg4: memref<1152x128xbf16, #tpu.memory_space<vmem>>, %arg5: memref<1x128xf32, #tpu.memory_space<vmem>>, %arg6: memref<1x16x16x128xf32, #tpu.memory_space<vmem>>, %arg7: memref<18x32x128xbf16, #tpu.memory_space<vmem>>, %arg8: memref<256x1152xbf16, #tpu.memory_space<vmem>>) attributes {dimension_semantics = [#tpu.dimension_semantics<parallel>], iteration_bounds = array<i64: 2>, scalar_prefetch = 0 : i64, scratch_operands = 2 : i64, tpu.core_type = #tpu.core_type<tc>, window_params = [{transform_indices = @transform_0, window_bounds = array<i64: 1, 16, 16, 128>}, {pipeline_mode = #tpu.pipeline_mode<synchronous>, transform_indices = @transform_1, window_bounds = array<i64: 128, 128>}, {pipeline_mode = #tpu.pipeline_mode<synchronous>, transform_indices = @transform_2, window_bounds = array<i64: 1, 128>}, {pipeline_mode = #tpu.pipeline_mode<synchronous>, transform_indices = @transform_3, window_bounds = array<i64: 1152, 128>}, {pipeline_mode = #tpu.pipeline_mode<synchronous>, transform_indices = @transform_4, window_bounds = array<i64: 1, 128>}, {transform_indices = @transform_5, window_bounds = array<i64: 1, 16, 16, 128>}]} {
    %c0 = arith.constant 0 : index
    %c0_0 = arith.constant 0 : index
    %c0_1 = arith.constant 0 : index
    %c0_2 = arith.constant 0 : index
    %0 = vector.load %arg1[%c0, %c0_0, %c0_1, %c0_2] : memref<1x16x16x128xf32, #tpu.memory_space<vmem>>, vector<1x16x16x128xf32>
    %1 = vector.shape_cast %0 : vector<1x16x16x128xf32> to vector<16x16x128xf32>
    %2 = vector.shape_cast %1 : vector<16x16x128xf32> to vector<256x128xf32>
    %3 = arith.truncf %2 : vector<256x128xf32> to vector<256x128xbf16>
    %c0_3 = arith.constant 0 : index
    %c0_4 = arith.constant 0 : index
    %4 = vector.load %arg2[%c0_3, %c0_4] : memref<128x128xbf16, #tpu.memory_space<vmem>>, vector<128x128xbf16>
    %cst = arith.constant dense<0.000000e+00> : vector<256x128xf32>
    %5 = tpu.matmul %3, %4, %cst {dimension_numbers = #tpu.dot_dimension_numbers<[1], [0], [0], [1], [0, 0, 1, 1], [], []>} : vector<256x128xbf16>, vector<128x128xbf16>, vector<256x128xf32> -> vector<256x128xf32>
    %c0_5 = arith.constant 0 : index
    %c0_6 = arith.constant 0 : index
    %6 = vector.load %arg3[%c0_5, %c0_6] : memref<1x128xf32, #tpu.memory_space<vmem>>, vector<1x128xf32>
    %7 = vector.broadcast %6 : vector<1x128xf32> to vector<256x128xf32>
    %8 = arith.addf %5, %7 : vector<256x128xf32>
    %cst_7 = arith.constant 3.000000e+00 : f32
    %9 = vector.broadcast %cst_7 : f32 to vector<256x128xf32>
    %10 = arith.addf %8, %9 : vector<256x128xf32>
    %cst_8 = arith.constant 0.000000e+00 : f32
    %cst_9 = arith.constant 6.000000e+00 : f32
    %11 = vector.broadcast %cst_8 : f32 to vector<256x128xf32>
    %12 = arith.maximumf %11, %10 : vector<256x128xf32>
    %13 = vector.broadcast %cst_9 : f32 to vector<256x128xf32>
    %14 = arith.minimumf %13, %12 : vector<256x128xf32>
    %15 = arith.mulf %8, %14 : vector<256x128xf32>
    %cst_10 = arith.constant 0.166666672 : f32
    %16 = vector.broadcast %cst_10 : f32 to vector<256x128xf32>
    %17 = arith.mulf %15, %16 : vector<256x128xf32>
    %cst_11 = arith.constant 0.000000e+00 : bf16
    %18 = vector.broadcast %cst_11 : bf16 to vector<32x128xbf16>
    %c0_12 = arith.constant 0 : index
    %c0_13 = arith.constant 0 : index
    %c0_14 = arith.constant 0 : index
    %19 = vector.load %arg7[%c0_12, %c0_13, %c0_14] : memref<18x32x128xbf16, #tpu.memory_space<vmem>>, vector<1x32x128xbf16>
    %20 = vector.shape_cast %19 : vector<1x32x128xbf16> to vector<32x128xbf16>
    %21 = vector.shape_cast %18 : vector<32x128xbf16> to vector<1x32x128xbf16>
    tpu.vector_store %arg7[%c0_12, %c0_13, %c0_14], %21 {strides = array<i32>} : memref<18x32x128xbf16, #tpu.memory_space<vmem>>, vector<1x32x128xbf16>,
    %cst_15 = arith.constant 0.000000e+00 : bf16
    %22 = vector.broadcast %cst_15 : bf16 to vector<32x128xbf16>
    %c17 = arith.constant 17 : index
    %c0_16 = arith.constant 0 : index
    %c0_17 = arith.constant 0 : index
    %23 = vector.load %arg7[%c17, %c0_16, %c0_17] : memref<18x32x128xbf16, #tpu.memory_space<vmem>>, vector<1x32x128xbf16>
    %24 = vector.shape_cast %23 : vector<1x32x128xbf16> to vector<32x128xbf16>
    %25 = vector.shape_cast %22 : vector<32x128xbf16> to vector<1x32x128xbf16>
    tpu.vector_store %arg7[%c17, %c0_16, %c0_17], %25 {strides = array<i32>} : memref<18x32x128xbf16, #tpu.memory_space<vmem>>, vector<1x32x128xbf16>,
    %cst_18 = arith.constant 0.000000e+00 : bf16
    %26 = vector.broadcast %cst_18 : bf16 to vector<18x8x128xbf16>
    %c0_19 = arith.constant 0 : index
    %c0_20 = arith.constant 0 : index
    %c0_21 = arith.constant 0 : index
    %27 = vector.load %arg7[%c0_19, %c0_20, %c0_21] : memref<18x32x128xbf16, #tpu.memory_space<vmem>>, vector<18x8x128xbf16>
    tpu.vector_store %arg7[%c0_19, %c0_20, %c0_21], %26 {strides = array<i32>} : memref<18x32x128xbf16, #tpu.memory_space<vmem>>, vector<18x8x128xbf16>,
    %cst_22 = arith.constant 0.000000e+00 : bf16
    %28 = vector.broadcast %cst_22 : bf16 to vector<18x8x128xbf16>
    %c0_23 = arith.constant 0 : index
    %c24 = arith.constant 24 : index
    %c0_24 = arith.constant 0 : index
    %29 = vector.load %arg7[%c0_23, %c24, %c0_24] : memref<18x32x128xbf16, #tpu.memory_space<vmem>>, vector<18x8x128xbf16>
    tpu.vector_store %arg7[%c0_23, %c24, %c0_24], %28 {strides = array<i32>} : memref<18x32x128xbf16, #tpu.memory_space<vmem>>, vector<18x8x128xbf16>,
    %30 = arith.truncf %17 : vector<256x128xf32> to vector<256x128xbf16>
    %31 = vector.shape_cast %30 : vector<256x128xbf16> to vector<16x16x128xbf16>
    %c1 = arith.constant 1 : index
    %c8 = arith.constant 8 : index
    %c0_25 = arith.constant 0 : index
    %32 = vector.load %arg7[%c1, %c8, %c0_25] : memref<18x32x128xbf16, #tpu.memory_space<vmem>>, vector<16x16x128xbf16>
    tpu.vector_store %arg7[%c1, %c8, %c0_25], %31 {strides = array<i32>} : memref<18x32x128xbf16, #tpu.memory_space<vmem>>, vector<16x16x128xbf16>,
    %c0_26 = arith.constant 0 : index
    %c7 = arith.constant 7 : index
    %c0_27 = arith.constant 0 : index
    %33 = vector.load %arg7[%c0_26, %c7, %c0_27] : memref<18x32x128xbf16, #tpu.memory_space<vmem>>, vector<16x16x128xbf16>
    %34 = vector.shape_cast %33 : vector<16x16x128xbf16> to vector<256x128xbf16>
    %c0_28 = arith.constant 0 : index
    %c0_29 = arith.constant 0 : index
    %35 = vector.load %arg8[%c0_28, %c0_29] : memref<256x1152xbf16, #tpu.memory_space<vmem>>, vector<256x128xbf16>
    tpu.vector_store %arg8[%c0_28, %c0_29], %34 {strides = array<i32>} : memref<256x1152xbf16, #tpu.memory_space<vmem>>, vector<256x128xbf16>,
    %c0_30 = arith.constant 0 : index
    %c8_31 = arith.constant 8 : index
    %c0_32 = arith.constant 0 : index
    %36 = vector.load %arg7[%c0_30, %c8_31, %c0_32] : memref<18x32x128xbf16, #tpu.memory_space<vmem>>, vector<16x16x128xbf16>
    %37 = vector.shape_cast %36 : vector<16x16x128xbf16> to vector<256x128xbf16>
    %c0_33 = arith.constant 0 : index
    %c128 = arith.constant 128 : index
    %38 = vector.load %arg8[%c0_33, %c128] : memref<256x1152xbf16, #tpu.memory_space<vmem>>, vector<256x128xbf16>
    tpu.vector_store %arg8[%c0_33, %c128], %37 {strides = array<i32>} : memref<256x1152xbf16, #tpu.memory_space<vmem>>, vector<256x128xbf16>,
    %c0_34 = arith.constant 0 : index
    %c9 = arith.constant 9 : index
    %c0_35 = arith.constant 0 : index
    %39 = vector.load %arg7[%c0_34, %c9, %c0_35] : memref<18x32x128xbf16, #tpu.memory_space<vmem>>, vector<16x16x128xbf16>
    %40 = vector.shape_cast %39 : vector<16x16x128xbf16> to vector<256x128xbf16>
    %c0_36 = arith.constant 0 : index
    %c256 = arith.constant 256 : index
    %41 = vector.load %arg8[%c0_36, %c256] : memref<256x1152xbf16, #tpu.memory_space<vmem>>, vector<256x128xbf16>
    tpu.vector_store %arg8[%c0_36, %c256], %40 {strides = array<i32>} : memref<256x1152xbf16, #tpu.memory_space<vmem>>, vector<256x128xbf16>,
    %c1_37 = arith.constant 1 : index
    %c7_38 = arith.constant 7 : index
    %c0_39 = arith.constant 0 : index
    %42 = vector.load %arg7[%c1_37, %c7_38, %c0_39] : memref<18x32x128xbf16, #tpu.memory_space<vmem>>, vector<16x16x128xbf16>
    %43 = vector.shape_cast %42 : vector<16x16x128xbf16> to vector<256x128xbf16>
    %c0_40 = arith.constant 0 : index
    %c384 = arith.constant 384 : index
    %44 = vector.load %arg8[%c0_40, %c384] : memref<256x1152xbf16, #tpu.memory_space<vmem>>, vector<256x128xbf16>
    tpu.vector_store %arg8[%c0_40, %c384], %43 {strides = array<i32>} : memref<256x1152xbf16, #tpu.memory_space<vmem>>, vector<256x128xbf16>,
    %c1_41 = arith.constant 1 : index
    %c8_42 = arith.constant 8 : index
    %c0_43 = arith.constant 0 : index
    %45 = vector.load %arg7[%c1_41, %c8_42, %c0_43] : memref<18x32x128xbf16, #tpu.memory_space<vmem>>, vector<16x16x128xbf16>
    %46 = vector.shape_cast %45 : vector<16x16x128xbf16> to vector<256x128xbf16>
    %c0_44 = arith.constant 0 : index
    %c512 = arith.constant 512 : index
    %47 = vector.load %arg8[%c0_44, %c512] : memref<256x1152xbf16, #tpu.memory_space<vmem>>, vector<256x128xbf16>
    tpu.vector_store %arg8[%c0_44, %c512], %46 {strides = array<i32>} : memref<256x1152xbf16, #tpu.memory_space<vmem>>, vector<256x128xbf16>,
    %c1_45 = arith.constant 1 : index
    %c9_46 = arith.constant 9 : index
    %c0_47 = arith.constant 0 : index
    %48 = vector.load %arg7[%c1_45, %c9_46, %c0_47] : memref<18x32x128xbf16, #tpu.memory_space<vmem>>, vector<16x16x128xbf16>
    %49 = vector.shape_cast %48 : vector<16x16x128xbf16> to vector<256x128xbf16>
    %c0_48 = arith.constant 0 : index
    %c640 = arith.constant 640 : index
    %50 = vector.load %arg8[%c0_48, %c640] : memref<256x1152xbf16, #tpu.memory_space<vmem>>, vector<256x128xbf16>
    tpu.vector_store %arg8[%c0_48, %c640], %49 {strides = array<i32>} : memref<256x1152xbf16, #tpu.memory_space<vmem>>, vector<256x128xbf16>,
    %c2 = arith.constant 2 : index
    %c7_49 = arith.constant 7 : index
    %c0_50 = arith.constant 0 : index
    %51 = vector.load %arg7[%c2, %c7_49, %c0_50] : memref<18x32x128xbf16, #tpu.memory_space<vmem>>, vector<16x16x128xbf16>
    %52 = vector.shape_cast %51 : vector<16x16x128xbf16> to vector<256x128xbf16>
    %c0_51 = arith.constant 0 : index
    %c768 = arith.constant 768 : index
    %53 = vector.load %arg8[%c0_51, %c768] : memref<256x1152xbf16, #tpu.memory_space<vmem>>, vector<256x128xbf16>
    tpu.vector_store %arg8[%c0_51, %c768], %52 {strides = array<i32>} : memref<256x1152xbf16, #tpu.memory_space<vmem>>, vector<256x128xbf16>,
    %c2_52 = arith.constant 2 : index
    %c8_53 = arith.constant 8 : index
    %c0_54 = arith.constant 0 : index
    %54 = vector.load %arg7[%c2_52, %c8_53, %c0_54] : memref<18x32x128xbf16, #tpu.memory_space<vmem>>, vector<16x16x128xbf16>
    %55 = vector.shape_cast %54 : vector<16x16x128xbf16> to vector<256x128xbf16>
    %c0_55 = arith.constant 0 : index
    %c896 = arith.constant 896 : index
    %56 = vector.load %arg8[%c0_55, %c896] : memref<256x1152xbf16, #tpu.memory_space<vmem>>, vector<256x128xbf16>
    tpu.vector_store %arg8[%c0_55, %c896], %55 {strides = array<i32>} : memref<256x1152xbf16, #tpu.memory_space<vmem>>, vector<256x128xbf16>,
    %c2_56 = arith.constant 2 : index
    %c9_57 = arith.constant 9 : index
    %c0_58 = arith.constant 0 : index
    %57 = vector.load %arg7[%c2_56, %c9_57, %c0_58] : memref<18x32x128xbf16, #tpu.memory_space<vmem>>, vector<16x16x128xbf16>
    %58 = vector.shape_cast %57 : vector<16x16x128xbf16> to vector<256x128xbf16>
    %c0_59 = arith.constant 0 : index
    %c1024 = arith.constant 1024 : index
    %59 = vector.load %arg8[%c0_59, %c1024] : memref<256x1152xbf16, #tpu.memory_space<vmem>>, vector<256x128xbf16>
    tpu.vector_store %arg8[%c0_59, %c1024], %58 {strides = array<i32>} : memref<256x1152xbf16, #tpu.memory_space<vmem>>, vector<256x128xbf16>,
    %c0_60 = arith.constant 0 : index
    %c0_61 = arith.constant 0 : index
    %60 = vector.load %arg8[%c0_60, %c0_61] : memref<256x1152xbf16, #tpu.memory_space<vmem>>, vector<256x1152xbf16>
    %c0_62 = arith.constant 0 : index
    %c0_63 = arith.constant 0 : index
    %61 = vector.load %arg4[%c0_62, %c0_63] : memref<1152x128xbf16, #tpu.memory_space<vmem>>, vector<1152x128xbf16>
    %cst_64 = arith.constant dense<0.000000e+00> : vector<256x128xf32>
    %62 = tpu.matmul %60, %61, %cst_64 {dimension_numbers = #tpu.dot_dimension_numbers<[1], [0], [0], [1], [0, 0, 1, 1], [], []>} : vector<256x1152xbf16>, vector<1152x128xbf16>, vector<256x128xf32> -> vector<256x128xf32>
    %c0_65 = arith.constant 0 : index
    %c0_66 = arith.constant 0 : index
    %63 = vector.load %arg5[%c0_65, %c0_66] : memref<1x128xf32, #tpu.memory_space<vmem>>, vector<1x128xf32>
    %64 = vector.broadcast %63 : vector<1x128xf32> to vector<256x128xf32>
    %65 = arith.addf %62, %64 : vector<256x128xf32>
    %cst_67 = arith.constant 3.000000e+00 : f32
    %66 = vector.broadcast %cst_67 : f32 to vector<256x128xf32>
    %67 = arith.addf %65, %66 : vector<256x128xf32>
    %cst_68 = arith.constant 0.000000e+00 : f32
    %cst_69 = arith.constant 6.000000e+00 : f32
    %68 = vector.broadcast %cst_68 : f32 to vector<256x128xf32>
    %69 = arith.maximumf %68, %67 : vector<256x128xf32>
    %70 = vector.broadcast %cst_69 : f32 to vector<256x128xf32>
    %71 = arith.minimumf %70, %69 : vector<256x128xf32>
    %72 = arith.mulf %65, %71 : vector<256x128xf32>
    %cst_70 = arith.constant 0.166666672 : f32
    %73 = vector.broadcast %cst_70 : f32 to vector<256x128xf32>
    %74 = arith.mulf %72, %73 : vector<256x128xf32>
    %75 = arith.addf %74, %2 : vector<256x128xf32>
    %76 = vector.shape_cast %75 : vector<256x128xf32> to vector<16x16x128xf32>
    %c0_71 = arith.constant 0 : index
    %c0_72 = arith.constant 0 : index
    %c0_73 = arith.constant 0 : index
    %c0_74 = arith.constant 0 : index
    %77 = vector.load %arg6[%c0_71, %c0_72, %c0_73, %c0_74] : memref<1x16x16x128xf32, #tpu.memory_space<vmem>>, vector<1x16x16x128xf32>
    %78 = vector.shape_cast %77 : vector<1x16x16x128xf32> to vector<16x16x128xf32>
    %79 = vector.shape_cast %76 : vector<16x16x128xf32> to vector<1x16x16x128xf32>
    tpu.vector_store %arg6[%c0_71, %c0_72, %c0_73, %c0_74], %79 {strides = array<i32>} : memref<1x16x16x128xf32, #tpu.memory_space<vmem>>, vector<1x16x16x128xf32>,
    return
  }
  func.func @transform_0(%arg0: i32) -> (i32, i32, i32, i32) {
    %c0_i32 = arith.constant 0 : i32
    %c0_i32_0 = arith.constant 0 : i32
    %c0_i32_1 = arith.constant 0 : i32
    %c0_i32_2 = arith.constant 0 : i32
    return %arg0, %c0_i32, %c0_i32_0, %c0_i32_1 : i32, i32, i32, i32
  }
  func.func @transform_1(%arg0: i32) -> (i32, i32) {
    %c0_i32 = arith.constant 0 : i32
    %c0_i32_0 = arith.constant 0 : i32
    %c0_i32_1 = arith.constant 0 : i32
    return %c0_i32, %c0_i32_0 : i32, i32
  }
  func.func @transform_2(%arg0: i32) -> (i32, i32) {
    %c0_i32 = arith.constant 0 : i32
    %c0_i32_0 = arith.constant 0 : i32
    %c0_i32_1 = arith.constant 0 : i32
    return %c0_i32, %c0_i32_0 : i32, i32
  }
  func.func @transform_3(%arg0: i32) -> (i32, i32) {
    %c0_i32 = arith.constant 0 : i32
    %c0_i32_0 = arith.constant 0 : i32
    %c0_i32_1 = arith.constant 0 : i32
    return %c0_i32, %c0_i32_0 : i32, i32
  }
  func.func @transform_4(%arg0: i32) -> (i32, i32) {
    %c0_i32 = arith.constant 0 : i32
    %c0_i32_0 = arith.constant 0 : i32
    %c0_i32_1 = arith.constant 0 : i32
    return %c0_i32, %c0_i32_0 : i32, i32
  }
  func.func @transform_5(%arg0: i32) -> (i32, i32, i32, i32) {
    %c0_i32 = arith.constant 0 : i32
    %c0_i32_0 = arith.constant 0 : i32
    %c0_i32_1 = arith.constant 0 : i32
    %c0_i32_2 = arith.constant 0 : i32
    return %arg0, %c0_i32, %c0_i32_0, %c0_i32_1 : i32, i32, i32, i32
  }
}

</mosaic_0001>

<bundles_post_ra>
// kernel: tpu_custom_call.1
= control target key start
LH: loop header
LB: loop body
LE: loop exit
PB: predicated region body
PF: predicated region fallthrough
CT: control target
= control target key end

     0   :  { %10 = vsyncpa [#allocation5], 0  ;;  %s7293_s0 = inlined_call_operand.hbm [shape: f32[2,16,16,128], index: 0, kind: input, shape index: {}]   ;;  %s7294_s1 = inlined_call_operand.hbm [shape: bf16[128,128], index: 1, kind: input, shape index: {}]   ;;  %s7295_s2 = inlined_call_operand.vmem [shape: f32[1,128], index: 2, kind: input, shape index: {}]   ;;  %s7296_s3 = inlined_call_operand.hbm [shape: bf16[1152,128], index: 3, kind: input, shape index: {}]   ;;  %s7297_s4 = inlined_call_operand.vmem [shape: f32[1,128], index: 4, kind: input, shape index: {}]   ;;  %s7298_s5 = inlined_call_operand.hbm [shape: f32[2,16,16,128], index: 5, kind: output, shape index: {}]  }
   0x1   :  { %12 = vsyncpa [#allocation5 + $0x1], 0 }
   0x2   :  { %13 = vsyncpa [#allocation8], 0 }
   0x3   :  { %14 = vsyncpa [#allocation6], 0 }
   0x4   :  { %16 = vsyncpa [#allocation6 + $0x1], 0  ;;  %s6247_s18 = smov 0   ;;  %s6249_s19 = smov 0  }
   0x5   :  { %s6251_s20 = smov 0   ;;  %s6253_s21 = smov 0  }
   0x6 LB: > { %s6268_s22 = sadd.s32 4294967295, %s6204_s21   ;;  %s5165_s23 = sadd.s32 4294967294, %s6204_s21   ;;  %s6204_s21 = sphi %s6253_s21, %s7318_s21   ;;  %s6200_s20 = sphi %s6251_s20, %s7317_s20   ;;  %s6196_s19 = sphi %s6249_s19, %s7316_s19   ;;  %s6192_s18 = sphi %s6247_s18, %s7315_s18  }
   0x7   : > { %p42_p0 = scmp.ne.s32.totalorder %s6196_s19, %s6192_s18  ;;  %p7299_p1 = scmp.eq.s32.totalorder %s6268_s22, 0 }
   0x8   : > { %p156_p3 = scmp.eq.s32.totalorder %s5165_s23, 1  ;;  %p5166_p5 = scmp.ge.s32.totalorder %s6204_s21, 1 }
   0x9   : > { %p6277_p4 = por %p7299_p1, %p42_p0  ;;  %p163_p7 = scmp.lt.s32.totalorder %s6204_s21, 3 }
   0xa   : > { %p6282_p6 = por %p156_p3, %p42_p0  ;;  %s6206_s27 = smov [#allocation7]  }
   0xb   : > { %s7302_s24 = scalar_select %p6277_p4, 1, 0 }
   0xc   : > { %s7303_s25 = scalar_select %p6282_p6, 1, 0 }
   0xd   : > { %p6287_p8 = pnand %p5166_p5, %p163_p7  ;;  %s175_s28 = sshll.u32 %s6206_s27, 4  ;;  %s6291_s28 = int_to_ptr.vmem [resolvable:$true] %s175_s28 }
   0xe   : > { %s6207_s30 = smov [#allocation9]   ;;  %s6048_s9 = scalar_lea.hbm %s7294_s1, 1024 }
   0xf   : > { %p5871_p9 = pneg %p6287_p8  ;;  %s191_s6 = sshll.u32 %s6207_s30, 4  ;;  %s6302_s6 = int_to_ptr.vmem [resolvable:$true] %s191_s6 }
  0x10   : > { %p6049_p12 = scmp.ne.s32.totalorder %s7294_s1, %s6048_s9  ;;  %p6055_p5 = scmp.lt.u32.totalorder %s6048_s9, %s7294_s1 }
  0x11   : > { %p6298_p11 = pnand %p5871_p9, %p7299_p1 }
  0x13   : > { %p6050_p13 = pneg %p6298_p11 }
  0x15   : > { %p6051_p0 = pnand %p6050_p13, %p6049_p12 }
  0x17   : > { %p6052_p3 = pneg %p6051_p0 }
  0x19   : > { %p6057_p7 = pnand %p6055_p5, %p6052_p3 }
  0x1b   : > { %6060 = shalt.err (!%p6057_p7)
}
  0x1c   : > { %s6061_s14 = scalar_lea.vmem %s6291_s28, 1024  ;;  %p6069_p2 = scmp.lt.s32.totalorder %s6291_s28, %s6291_s28 }
  0x1d   : > { %p6062_p9 = scmp.ne.s32.totalorder %s6291_s28, %s6061_s14  ;;  %p6070_p12 = scmp.lt.s32.totalorder %s6061_s14, %s6061_s14 }
  0x1f   : > { %p6064_p10 = pnand %p6062_p9, %p6050_p13  ;;  %p6071_p0 = por %p6070_p12, %p6069_p2 }
  0x21   : > { %p6065_p1 = pneg %p6064_p10 }
  0x23   : > { %p6072_p6 = pnand %p6071_p0, %p6065_p1 }
  0x25   : > { %6075 = shalt.err (!%p6072_p6)
}
  0x26   : > { %s6208_s15 = smov 64   ;;  %s6209_s16 = smov 4  }
  0x27   : > { %5874 = dma.hbm_to_vmem [thread:$0]  (!%p6298_p11), %s7294_s1, 1024, %s6291_s28, [#allocation8], %s6208_s15, %s6208_s15, %s6209_s16  }
  0x28   : > { %s6076_s7 = scalar_lea.hbm %s7296_s3, 9216 }
  0x29   : > { %p6077_p2 = scmp.ne.s32.totalorder %s7296_s3, %s6076_s7  ;;  %p6083_p10 = scmp.lt.u32.totalorder %s6076_s7, %s7296_s3 }
  0x2b   : > { %p6079_p1 = pnand %p6077_p2, %p6050_p13 }
  0x2d   : > { %p6080_p6 = pneg %p6079_p1 }
  0x2f   : > { %p6085_p3 = pnand %p6083_p10, %p6080_p6 }
  0x31   : > { %6088 = shalt.err (!%p6085_p3)
}
  0x32   : > { %s6089_s28 = scalar_lea.vmem %s6302_s6, 9216  ;;  %p6097_p12 = scmp.lt.s32.totalorder %s6302_s6, %s6302_s6 }
  0x33   : > { %p6090_p5 = scmp.ne.s32.totalorder %s6302_s6, %s6089_s28  ;;  %p6098_p0 = scmp.lt.s32.totalorder %s6089_s28, %s6089_s28 }
  0x35   : > { %p6092_p7 = pnand %p6090_p5, %p6050_p13  ;;  %p6099_p2 = por %p6098_p0, %p6097_p12 }
  0x37   : > { %p6093_p9 = pneg %p6092_p7 }
  0x39   : > { %p6100_p1 = pnand %p6099_p2, %p6093_p9 }
  0x3b   : > { %6103 = shalt.err (!%p6100_p1)
}
  0x3c   : > { %5877 = dma.hbm_to_vmem [thread:$0]  (!%p6298_p11), %s7296_s3, 9216, %s6302_s6, [#allocation8], %s6208_s15, %s6208_s15, %s6209_s16  }
  0x3d   : > { %s6357_s14 = sadd.s32 1, %s6204_s21   ;;  %s29_s29 = sadd.s32 1, %s6200_s20 }
  0x3e   : > { %s26_s17 = ssub.s32 %s6204_s21, %s6357_s14  ;;  %p36_p13 = scmp.ne.s32.totalorder %s6200_s20, %s6196_s19 }
  0x3f   : > { %p27_p6 = scmp.eq.s32.totalorder %s26_s17, 0  ;;  %p37_p10 = scmp.eq.s32.totalorder %s6204_s21, 0 }
  0x40   : > { %p7306_p3 = scmp.eq.s32.totalorder %s6268_s22, 1  ;;  %p5888_p7 = scmp.lt.s32.totalorder %s6204_s21, 2 }
  0x41   : > { %s6373_s27 = scalar_select %p27_p6, %s6200_s20, %s29_s29  }
  0x42   : > { %p6367_p5 = por %p7306_p3, %p36_p13  ;;  %p38_p9 = por %p37_p10, %p36_p13 }
  0x43   : > { %s208_s30 = sand.u32 1, %s6200_s20   ;;  %s5265_s6 = sshll.u32 %s6204_s21, 12 }
  0x44   : > { %s7307_s23 = scalar_select %p6367_p5, 1, 0 }
  0x45   : > { %s5170_s7 = sshll.u32 %s208_s30, 8  ;;  %s6380_s8 = scalar_lea.hbm %s7293_s0, %s5265_s6 }
  0x46   : > { %s212_s9 = scalar_lea.vmem [#allocation4], %s5170_s7  ;;  %p6384_p11 = pnand %p5888_p7, %p38_p9 }
  0x47   : > { %s219_s10 = sshll.u32 %s212_s9, 4  ;;  %s6388_s28 = scalar_lea.sflag [#allocation5], %s208_s30  ;;  %s6382_s10 = int_to_ptr.vmem [resolvable:$true] %s219_s10 }
  0x48   : > { %s6104_s12 = scalar_lea.hbm %s6380_s8, 4096  ;;  %p6106_p0 = pneg %p6384_p11 }
  0x49   : > { %p6105_p12 = scmp.ne.s32.totalorder %s6380_s8, %s6104_s12  ;;  %s6109_s17 = scalar_lea.hbm %s7293_s0, 8192 }
  0x4a   : > { %p6110_p13 = scmp.lt.u32.totalorder %s6380_s8, %s7293_s0  ;;  %p6111_p6 = scmp.lt.u32.totalorder %s6109_s17, %s6104_s12 }
  0x4b   : > { %p6107_p2 = pnand %p6106_p0, %p6105_p12  ;;  %p6113_p3 = scmp.lt.u32.totalorder %s6104_s12, %s6380_s8 }
  0x4c   : > { %p6112_p10 = por %p6111_p6, %p6110_p13 }
  0x4d   : > { %p6108_p1 = pneg %p6107_p2 }
  0x4e   : > { %p6114_p7 = por %p6113_p3, %p6112_p10 }
  0x50   : > { %p6115_p9 = pnand %p6114_p7, %p6108_p1 }
  0x52   : > { %6118 = shalt.err (!%p6115_p9)
}
  0x53   : > { %s6119_s30 = scalar_lea.vmem %s6382_s10, 4096  ;;  %s6210_s15 = smov [#allocation4]  }
  0x54   : > { %p6120_p12 = scmp.ne.s32.totalorder %s6382_s10, %s6119_s30  ;;  %s6124_s16 = sshll.u32 %s6210_s15, 4  ;;  %s6125_s16 = int_to_ptr.vmem [resolvable:$false] %s6124_s16 }
  0x55   : > { %s6126_s9 = scalar_lea.vmem %s6125_s16, 8192  ;;  %p6127_p4 = scmp.lt.s32.totalorder %s6382_s10, %s6125_s16 }
  0x56   : > { %p6122_p2 = pnand %p6120_p12, %p6106_p0  ;;  %p6128_p13 = scmp.lt.s32.totalorder %s6126_s9, %s6119_s30 }
  0x58   : > { %p6123_p5 = pneg %p6122_p2  ;;  %p6129_p6 = por %p6128_p13, %p6127_p4 }
  0x5a   : > { %p6130_p10 = pnand %p6129_p6, %p6123_p5 }
  0x5c   : > { %6133 = shalt.err (!%p6130_p10)
}
  0x5d   : > { %s6211_s12 = smov 128   ;;  %s6212_s13 = smov 8  }
  0x5e   : > { %5881 = dma.hbm_to_vmem [thread:$0]  (!%p6384_p11), %s6380_s8, 4096, %s6382_s10, %s6388_s28, %s6211_s12, %s6211_s12, %s6212_s13  }
  0x5f   : > { %231 = sbr.rel (%p6287_p8) target bundleno = 986 (0x3da), region = 40  ;;  %s6419_s29 = sand.u32 (!%p6287_p8), 1, %s6196_s19  }
  0x60   : > { %s5174_s17 = sshll.u32 (!%p6287_p8), %s6419_s29, 8  ;;  %s234_s7 = scalar_lea.sflag (!%p6287_p8), [#allocation5], %s6419_s29 }
  0x61   : > { %s6425_s6 = scalar_lea.vmem (!%p6287_p8), [#allocation4], %s5174_s17  ;;  %p7309_p4 = scmp.ne.s32.totalorder (!%p6287_p8), %s7302_s24, 0 }
  0x66   : > { %6179 = dma.done.wait (%p7309_p4), %s234_s7, 4096  }
  0x67   : > { %6181 = vsyncadd (%p7309_p4), %s234_s7, 4294963200  ;;  %p7310_p5 = scmp.eq.s32.totalorder %s6268_s22, 0 }
  0x69   : > { %6183 = dma.done.wait (%p7310_p5), [#allocation8], 10240   ;;  %p7311_p8 = pmov %p7310_p5 }
  0x6a   : > { %v5933_v0 = vld [vmem:[#allocation7] sm:$0xff]   ;;  %v5934_v1 = vld [vmem:[#allocation7 + $0x8] sm:$0xff]   ;;  %v5935_v2 = vld [vmem:[#allocation7 + $0x10] sm:$0xff]   ;;  %vm1252_vm0 = vcmask 1043456   ;;  %vm883_vm1 = vsmask.f32 4352 }
  0x6b   : > { %6185 = vsyncadd (%p7311_p8), [#allocation8], 4294957056  ;;  %5763 = vmatprep.subr.bf16.mxu0 %v5933_v0  ;;  %v5936_v3 = vld [vmem:[#allocation7 + $0x18] sm:$0xff]   ;;  %v273_v4 = vld [vmem:[%s6425_s6] sm:$0xff]  ;;  %vm1365_vm2 = vsmask.f32 3328 }
  0x6c   : > { %5764 = vmatpush3.bf16.msra.mxu0 %v5933_v0  ;;  %v274_v5 = vld [vmem:[%s6425_s6 + $0x8] sm:$0xff]  ;;  %v5937_v7 = vld [vmem:[#allocation7 + $0x20] sm:$0xff]   ;;  %v5939_v9 = vld [vmem:[#allocation7 + $0x30] sm:$0xff]   ;;  %s7154_s16 = scalar_lea.vmem [#allocation10], %s5174_s17  ;;  %s5266_s9 = sshll.u32 %s6268_s22, 12 }
  0x6d   : > { %5765 = vmatprep.subr.bf16.mxu0 %v5934_v1  ;;  %v305_v6 = vpack.c.bf16 %v274_v5, %v273_v4  ;;  %v5938_v8 = vld [vmem:[#allocation7 + $0x28] sm:$0xff]   ;;  %v5941_v10 = vld [vmem:[#allocation9 + $0x40] sm:$0xff]   ;;  %v5940_v13 = vld [vmem:[#allocation7 + $0x38] sm:$0xff]   ;;  %s5073_s12 = sshll.u32 %s7154_s16, 4  ;;  %s7243_s7 = scalar_lea.hbm %s7298_s5, %s5266_s9  ;;  %s7245_s12 = int_to_ptr.vmem [resolvable:$true] %s5073_s12 }
  0x6e   : > { %v5942_v11 = vld [vmem:[#allocation9] sm:$0xff]   ;;  %5291 = vmatprep.subr.bf16.mxu1 %v5941_v10  ;;  %v5943_v12 = vld [vmem:[#allocation9 + $0x48] sm:$0xff]   ;;  %v275_v15 = vld [vmem:[%s6425_s6 + $0x10] sm:$0xff]  ;;  %s5060_s22 = scalar_lea.sflag [#allocation6], %s6419_s29  ;;  %s6134_s24 = scalar_lea.vmem %s7245_s12, 4096 }
  0x6f   : > { %5779 = vmatprep.mubr.bf16.mxu0 %v305_v6  ;;  %5292 = vmatpush3.bf16.msra.mxu1 %v5942_v11  ;;  %v5944_v14 = vld [vmem:[#allocation9 + $0x8] sm:$0xff]   ;;  %v276_v16 = vld [vmem:[%s6425_s6 + $0x18] sm:$0xff]  ;;  %v277_v17 = vld [vmem:[%s6425_s6 + $0x20] sm:$0xff]  ;;  %v6213_v6 = vmov 0   ;;  %p6135_p11 = scmp.ne.s32.totalorder %s7245_s12, %s6134_s24  ;;  %p7312_p0 = scmp.ne.s32.totalorder %s7307_s23, 0 }
  0x70   : > { %5766 = vmatpush3.bf16.msra.mxu0 %v5934_v1  ;;  %5293 = vmatprep.subr.bf16.mxu1 %v5943_v12  ;;  %v278_v18 = vld [vmem:[%s6425_s6 + $0x28] sm:$0xff]  ;;  %v306_v19 = vpack.c.bf16 %v276_v16, %v275_v15  ;;  %v279_v21 = vld [vmem:[%s6425_s6 + $0x30] sm:$0xff]  ;;  %v280_v22 = vld [vmem:[%s6425_s6 + $0x38] sm:$0xff]  ;;  %713 = vst [vmem:[#allocation2] sm:$0xff] %v6213_v6  ;;  %s6214_s26 = smov [#allocation10]  }
  0x71   : > { %5767 = vmatprep.subr.bf16.mxu0 %v5935_v2  ;;  %v307_v20 = vpack.c.bf16 %v278_v18, %v277_v17  ;;  %v281_v23 = vld [vmem:[%s6425_s6 + $0x40] sm:$0xff]  ;;  %v282_v24 = vld [vmem:[%s6425_s6 + $0x48] sm:$0xff]  ;;  %v308_v25 = vpack.c.bf16 %v280_v22, %v279_v21  ;;  %v283_v27 = vld [vmem:[%s6425_s6 + $0x50] sm:$0xff]  ;;  %714 = vst [vmem:[#allocation2 + $0x8] sm:$0xff] %v6213_v6  ;;  %p6136_p1 = pnand %p6135_p11, %p7312_p0  ;;  %s6138_s8 = sshll.u32 %s6214_s26, 4  ;;  %s6139_s8 = int_to_ptr.vmem [resolvable:$false] %s6138_s8 }
  0x72   : > { %v309_v26 = vpack.c.bf16 %v282_v24, %v281_v23  ;;  %v284_v28 = vld [vmem:[%s6425_s6 + $0x58] sm:$0xff]  ;;  %v285_v29 = vld [vmem:[%s6425_s6 + $0x60] sm:$0xff]  ;;  %v286_v30 = vld [vmem:[%s6425_s6 + $0x68] sm:$0xff]  ;;  %716 = vst [vmem:[#allocation2 + $0x110] sm:$0xff] %v6213_v6  ;;  %s6140_s10 = scalar_lea.vmem %s6139_s8, 8192  ;;  %p6141_p7 = scmp.lt.s32.totalorder %s7245_s12, %s6139_s8 }
  0x73   : > { %5294 = vmatpush3.bf16.msra.mxu1 %v5944_v14  ;;  %v310_v31 = vpack.c.bf16 %v284_v28, %v283_v27  ;;  %v311_v32 = vpack.c.bf16 %v286_v30, %v285_v29  ;;  %v287_v33 = vld [vmem:[%s6425_s6 + $0x70] sm:$0xff]  ;;  %v288_v34 = vld [vmem:[%s6425_s6 + $0x78] sm:$0xff]  ;;  %v289_v35 = vld [vmem:[%s6425_s6 + $0x80] sm:$0xff]  ;;  %717 = vst [vmem:[#allocation2 + $0x118] sm:$0xff] %v6213_v6  ;;  %p6137_p3 = pneg %p6136_p1  ;;  %p6142_p9 = scmp.lt.s32.totalorder %s6140_s10, %s6134_s24 }
  0x74   : > { %5768 = vmatpush3.bf16.msra.mxu0 %v5935_v2  ;;  %v290_v36 = vld [vmem:[%s6425_s6 + $0x88] sm:$0xff]  ;;  %v312_v37 = vpack.c.bf16 %v288_v34, %v287_v33  ;;  %v291_v39 = vld [vmem:[%s6425_s6 + $0x90] sm:$0xff]  ;;  %v292_v40 = vld [vmem:[%s6425_s6 + $0x98] sm:$0xff]  ;;  %719 = vst [vmem:[#allocation2 + $0x10] sm:$0xf] %v6213_v6 }
  0x75   : > { %5769 = vmatprep.subr.bf16.mxu0 %v5936_v3  ;;  %v313_v38 = vpack.c.bf16 %v290_v36, %v289_v35  ;;  %v293_v41 = vld [vmem:[%s6425_s6 + $0xa0] sm:$0xff]  ;;  %v294_v42 = vld [vmem:[%s6425_s6 + $0xa8] sm:$0xff]  ;;  %v314_v43 = vpack.c.bf16 %v292_v40, %v291_v39  ;;  %v295_v45 = vld [vmem:[%s6425_s6 + $0xb0] sm:$0xff]  ;;  %720 = vst [vmem:[#allocation2 + $0x20] sm:$0xf] %v6213_v6  ;;  %p6143_p12 = por %p6142_p9, %p6141_p7 }
  0x76   : > { %v315_v44 = vpack.c.bf16 %v294_v42, %v293_v41  ;;  %v296_v46 = vld [vmem:[%s6425_s6 + $0xb8] sm:$0xff]  ;;  %v297_v47 = vld [vmem:[%s6425_s6 + $0xc0] sm:$0xff]  ;;  %v298_v48 = vld [vmem:[%s6425_s6 + $0xc8] sm:$0xff]  ;;  %721 = vst [vmem:[#allocation2 + $0x30] sm:$0xf] %v6213_v6 }
  0x77   : > { %v316_v49 = vpack.c.bf16 %v296_v46, %v295_v45  ;;  %v317_v50 = vpack.c.bf16 %v298_v48, %v297_v47  ;;  %v299_v51 = vld [vmem:[%s6425_s6 + $0xd0] sm:$0xff]  ;;  %v300_v52 = vld [vmem:[%s6425_s6 + $0xd8] sm:$0xff]  ;;  %v301_v53 = vld [vmem:[%s6425_s6 + $0xe0] sm:$0xff]  ;;  %722 = vst [vmem:[#allocation2 + $0x40] sm:$0xf] %v6213_v6  ;;  %p6144_p2 = pnand %p6143_p12, %p6137_p3 }
  0x78   : > { %5770 = vmatpush3.bf16.msra.mxu0 %v5936_v3  ;;  %v302_v54 = vld [vmem:[%s6425_s6 + $0xe8] sm:$0xff]  ;;  %v318_v55 = vpack.c.bf16 %v300_v52, %v299_v51  ;;  %v303_v57 = vld [vmem:[%s6425_s6 + $0xf0] sm:$0xff]  ;;  %v304_v58 = vld [vmem:[%s6425_s6 + $0xf8] sm:$0xff]  ;;  %723 = vst [vmem:[#allocation2 + $0x50] sm:$0xf] %v6213_v6 }
  0x79   : > { %5771 = vmatprep.subr.bf16.mxu0 %v5937_v7  ;;  %v319_v56 = vpack.c.bf16 %v302_v54, %v301_v53  ;;  %v320_v59 = vpack.c.bf16 %v304_v58, %v303_v57  ;;  %v5945_v60 = vld [vmem:[#allocation9 + $0x50] sm:$0xff]   ;;  %v5947_v62 = vld [vmem:[#allocation9 + $0x58] sm:$0xff]   ;;  %v5948_v63 = vld [vmem:[#allocation9 + $0xc0] sm:$0xff]   ;;  %724 = vst [vmem:[#allocation2 + $0x60] sm:$0xf] %v6213_v6 }
  0x7a   : > { %v5946_v61 = vld [vmem:[#allocation9 + $0x10] sm:$0xff]   ;;  %5295 = vmatprep.subr.bf16.mxu1 %v5945_v60  ;;  %v5949_v0 = vld [vmem:[#allocation9 + $0x18] sm:$0xff]   ;;  %v5950_v1 = vld [vmem:[#allocation9 + $0x80] sm:$0xff]   ;;  %725 = vst [vmem:[#allocation2 + $0x70] sm:$0xf] %v6213_v6 }
  0x7b   : > { %5296 = vmatpush3.bf16.msra.mxu1 %v5946_v61  ;;  %v5951_v2 = vld [vmem:[#allocation9 + $0x60] sm:$0xff]   ;;  %v5952_v3 = vld [vmem:[#allocation9 + $0xc8] sm:$0xff]   ;;  %726 = vst [vmem:[#allocation2 + $0x80] sm:$0xf] %v6213_v6  ;;  %727 = vst [vmem:[#allocation2 + $0x90] sm:$0xf] %v6213_v6 }
  0x7c   : > { %5772 = vmatpush3.bf16.msra.mxu0 %v5937_v7  ;;  %5297 = vmatprep.subr.bf16.mxu1 %v5947_v62  ;;  %v5953_v4 = vld [vmem:[#allocation9 + $0x20] sm:$0xff]   ;;  %v5954_v5 = vld [vmem:[#allocation9 + $0x88] sm:$0xff]   ;;  %728 = vst [vmem:[#allocation2 + $0xa0] sm:$0xf] %v6213_v6  ;;  %729 = vst [vmem:[#allocation2 + $0xb0] sm:$0xf] %v6213_v6 }
  0x7d   : > { %5773 = vmatprep.subr.bf16.mxu0 %v5938_v8  ;;  %730 = vst [vmem:[#allocation2 + $0xc0] sm:$0xf] %v6213_v6  ;;  %731 = vst [vmem:[#allocation2 + $0xd0] sm:$0xf] %v6213_v6  ;;  %v5955_v7 = vld [vmem:[#allocation9 + $0x68] sm:$0xff]   ;;  %v5958_v10 = vld [vmem:[#allocation9 + $0x90] sm:$0xff]  }
  0x7e   : > { %732 = vst [vmem:[#allocation2 + $0xe0] sm:$0xf] %v6213_v6  ;;  %733 = vst [vmem:[#allocation2 + $0xf0] sm:$0xf] %v6213_v6  ;;  %v5959_v11 = vld [vmem:[#allocation9 + $0x70] sm:$0xff]   ;;  %v5960_v12 = vld [vmem:[#allocation9 + $0xd8] sm:$0xff]  }
  0x7f   : > { %5298 = vmatpush3.bf16.msra.mxu1 %v5949_v0  ;;  %734 = vst [vmem:[#allocation2 + $0x100] sm:$0xf] %v6213_v6  ;;  %737 = vst [vmem:[#allocation2 + $0x18] sm:$0xf0] %v6213_v6  ;;  %v5962_v14 = vld [vmem:[#allocation9 + $0x98] sm:$0xff]   ;;  %v5964_v22 = vld [vmem:[#allocation9 + $0xe0] sm:$0xff]  }
  0x80   : > { %5774 = vmatpush3.bf16.msra.mxu0 %v5938_v8  ;;  %5299 = vmatprep.subr.bf16.mxu1 %v5951_v2  ;;  %738 = vst [vmem:[#allocation2 + $0x28] sm:$0xf0] %v6213_v6  ;;  %739 = vst [vmem:[#allocation2 + $0x38] sm:$0xf0] %v6213_v6  ;;  %v5956_v8 = vld [vmem:[#allocation9 + $0xd0] sm:$0xff]   ;;  %v5963_v21 = vld [vmem:[#allocation9 + $0x78] sm:$0xff]  }
  0x81   : > { %5775 = vmatprep.subr.bf16.mxu0 %v5939_v9  ;;  %740 = vst [vmem:[#allocation2 + $0x48] sm:$0xf0] %v6213_v6  ;;  %741 = vst [vmem:[#allocation2 + $0x58] sm:$0xf0] %v6213_v6  ;;  %v852_v16 = vld [vmem:[#allocation2 + $0x8] sm:$0xf] }
  0x82   : > { %742 = vst [vmem:[#allocation2 + $0x68] sm:$0xf0] %v6213_v6  ;;  %743 = vst [vmem:[#allocation2 + $0x78] sm:$0xf0] %v6213_v6  ;;  %v5965_v23 = vld [vmem:[#allocation9 + $0x38] sm:$0xff]   ;;  %v5966_v24 = vld [vmem:[#allocation9 + $0xa0] sm:$0xff]  }
  0x83   : > { %744 = vst [vmem:[#allocation2 + $0x88] sm:$0xf0] %v6213_v6  ;;  %745 = vst [vmem:[#allocation2 + $0x98] sm:$0xf0] %v6213_v6  ;;  %5300 = vmatpush3.bf16.msra.mxu1 %v5953_v4  ;;  %v1189_v28 = vld [vmem:[#allocation2 + $0x8] sm:$0xf] }
  0x84   : > { %5776 = vmatpush3.bf16.msra.mxu0 %v5939_v9  ;;  %746 = vst [vmem:[#allocation2 + $0xa8] sm:$0xf0] %v6213_v6  ;;  %747 = vst [vmem:[#allocation2 + $0xb8] sm:$0xf0] %v6213_v6  ;;  %v5957_v9 = vld [vmem:[#allocation9 + $0x28] sm:$0xff]   ;;  %5301 = vmatprep.subr.bf16.mxu1 %v5955_v7  ;;  %v5971_v39 = vld [vmem:[#allocation9 + $0xf0] sm:$0xff]  }
  0x85   : > { %5777 = vmatprep.subr.bf16.mxu0 %v5940_v13  ;;  %748 = vst [vmem:[#allocation2 + $0xc8] sm:$0xf0] %v6213_v6  ;;  %749 = vst [vmem:[#allocation2 + $0xd8] sm:$0xf0] %v6213_v6  ;;  %v5967_v35 = vld [vmem:[#allocation9 + $0xe8] sm:$0xff]   ;;  %v5972_v40 = vld [vmem:[#allocation9 + $0xb0] sm:$0xff]  }
  0x86   : > { %750 = vst [vmem:[#allocation2 + $0xe8] sm:$0xf0] %v6213_v6  ;;  %751 = vst [vmem:[#allocation2 + $0xf8] sm:$0xf0] %v6213_v6  ;;  %v5973_v41 = vld [vmem:[#allocation9 + $0xf8] sm:$0xff]   ;;  %v5975_v45 = vld [vmem:[#allocation9 + $0x148] sm:$0xff]  }
  0x87   : > { %752 = vst [vmem:[#allocation2 + $0x108] sm:$0xf0] %v6213_v6  ;;  %718 = vst [vmem:[#allocation2] sm:$0xf] %v6213_v6  ;;  %5302 = vmatpush3.bf16.msra.mxu1 %v5957_v9  ;;  %v5974_v42 = vld [vmem:[#allocation9 + $0xb8] sm:$0xff]   ;;  %v5976_v46 = vld [vmem:[#allocation9 + $0x108] sm:$0xff]  }
  0x88   : > { %5778 = vmatpush3.bf16.msra.mxu0 %v5940_v13  ;;  %736 = vst [vmem:[#allocation2 + $0x8] sm:$0xf0] %v6213_v6  ;;  %735 = vst [vmem:[#allocation2 + $0x110] sm:$0xf] %v6213_v6  ;;  %v5961_v13 = vld [vmem:[#allocation9 + $0x30] sm:$0xff]   ;;  %5303 = vmatprep.subr.bf16.mxu1 %v5959_v11  ;;  %v5981_v51 = vld [vmem:[#allocation9 + $0x1c0] sm:$0xff]  }
  0x89   : > { %5403 = vmatprep.subr.bf16.mxu0 %v5948_v63  ;;  %753 = vst [vmem:[#allocation2 + $0x118] sm:$0xf0] %v6213_v6  ;;  %v5977_v47 = vld [vmem:[#allocation9 + $0x150] sm:$0xff]   ;;  %v6472_v52 = vld [vmem:[%s7295_s2] ss:$0 sm:$0xff] }
  0x8a   : > { %v5978_v48 = vld [vmem:[#allocation9 + $0x110] sm:$0xff]   ;;  %v5983_v58 = vld [vmem:[#allocation9 + $0x160] sm:$0xff]  }
  0x8b   : > { %5780 = vmatmul.mubr.bf16.vlgmr.msra.gmra.mrb[0].mxu0 %v306_v19  ;;  %5304 = vmatpush3.bf16.msra.mxu1 %v5961_v13  ;;  %v893_v19 = vshrl.u32 %v852_v16, 16 }
  0x8c   : > { %5783 = vmatprep.mubr.bf16.mxu0 %v307_v20  ;;  %5404 = vmatpush3.bf16.msra.mxu0 %v5950_v1  ;;  %v896_v20 = vshll.u32 %v852_v16, 16  ;;  %v1333_v1 = vld [vmem:[#allocation2] sm:$0xf0] }
  0x8d   : > { %5405 = vmatprep.subr.bf16.mxu0 %v5952_v3  ;;  %5305 = vmatprep.subr.bf16.mxu1 %v5963_v21  ;;  %v895_v30 = vrot.slane %v893_v19, 3  ;;  %v1367_v9 = vshrl.u32 %v1333_v1, 16  ;;  %v1370_v13 = vshll.u32 %v1333_v1, 16 }
  0x8e   : > { %v851_v15 = vld [vmem:[#allocation2] sm:$0xf8] }
  0x8f   : > { %v885_v17 = vshrl.u32 %v851_v15, 16  ;;  %v888_v18 = vshll.u32 %v851_v15, 16  ;;  %5306 = vmatpush3.bf16.msra.mxu1 %v5965_v23  ;;  %v1334_v6 = vld [vmem:[#allocation2 + $0x8] sm:$0x1f] }
  0x90   : > { %5406 = vmatpush3.bf16.msra.mxu0 %v5954_v5  ;;  %v1378_v23 = vshll.u32 %v1334_v6, 16 }
  0x91   : > { %5407 = vmatprep.subr.bf16.mxu0 %v5956_v8  ;;  %v890_v27 = vrot.slane %v888_v18, 4  ;;  %v1375_v18 = vshrl.u32 %v1334_v6, 16 }
  0x93   : > { %5784 = vmatmul.mubr.bf16.gmra.mrb[4].mxu0 %v308_v25  ;;  %v1188_v25 = vld [vmem:[#allocation2] sm:$0xf0] }
  0x94   : > { %5787 = vmatprep.mubr.bf16.mxu0 %v309_v26  ;;  %5408 = vmatpush3.bf16.msra.mxu0 %v5958_v10  ;;  %v887_v26 = vrot.slane %v885_v17, 3  ;;  %v1253_v29 = vrot.slane %v1188_v25, 4 }
  0x95   : > { %5409 = vmatprep.subr.bf16.mxu0 %v5960_v12 }
  0x96   : > { %v891_v33 = vor.u32 %v890_v27, %v887_v26 }
  0x98   : > { %5410 = vmatpush3.bf16.msra.mxu0 %v5962_v14 }
  0x99   : > { %5411 = vmatprep.subr.bf16.mxu0 %v5964_v22 }
  0x9b   : > { %5788 = vmatmul.mubr.bf16.gmra.mrb[8].mxu0 %v310_v31  ;;  %v898_v31 = vrot.slane %v896_v20, 4 }
  0x9c   : > { %5791 = vmatprep.mubr.bf16.mxu0 %v311_v32  ;;  %5412 = vmatpush3.bf16.msra.mxu0 %v5966_v24  ;;  %v1254_v32 = vrot.slane %v1189_v28, 4  ;;  %v6481_v28 = vrot.slane %v1367_v9, 4 }
  0x9d   : > { %v899_v34 = vor.u32 %v898_v31, %v895_v30  ;;  %5413 = vmatprep.subr.bf16.mxu0 %v5967_v35 }
  0x9e   : > { %v1255_v36 = vsel %vm1252_vm0, %v1253_v29, %v1254_v32  ;;  %v6484_v32 = vrot.slane %v1370_v13, 5 }
  0x9f   : > { %4062 = vmatprep.mubr.bf16.mxu1 %v1255_v36 }
  0xa3   : > { %5792 = vmatmul.mubr.bf16.gmra.mrb[12].mxu0 %v312_v37  ;;  %v5968_v37 = vld [vmem:[#allocation9 + $0xa8] sm:$0xff]  }
  0xa4   : > { %5795 = vmatprep.mubr.bf16.mxu0 %v313_v38  ;;  %v900_v38 = vsel %vm883_vm1, %v891_v33, %v899_v34  ;;  %5414 = vmatpush3.bf16.msra.mxu0 %v5968_v37 }
  0xa5   : > { %4063 = vmatmul.mubr.bf16.vlgmr.msra.gmra.mrb[0].mxu1 %v900_v38  ;;  %5415 = vmatprep.subr.bf16.mxu0 %v5971_v39 }
  0xa8   : > { %5416 = vmatpush3.bf16.msra.mxu0 %v5972_v40 }
  0xa9   : > { %5417 = vmatprep.subr.bf16.mxu0 %v5973_v41 }
  0xab   : > { %5796 = vmatmul.mubr.bf16.gmra.mrb[16].mxu0 %v314_v43  ;;  %v5969_v43 = vld [vmem:[#allocation9 + $0x140] sm:$0xff]  }
  0xac   : > { %5799 = vmatprep.mubr.bf16.mxu0 %v315_v44  ;;  %5418 = vmatpush3.bf16.msra.mxu0 %v5974_v42  ;;  %v5970_v44 = vld [vmem:[#allocation9 + $0x100] sm:$0xff]  }
  0xad   : > { %5515 = vmatprep.subr.bf16.mxu1 %v5969_v43  ;;  %5627 = vmatprep.subr.bf16.mxu0 %v5981_v51 }
  0xae   : > { %5516 = vmatpush3.bf16.msra.mxu1 %v5970_v44  ;;  %v1377_v44 = vrot.slane %v1375_v18, 4 }
  0xaf   : > { %5517 = vmatprep.subr.bf16.mxu1 %v5975_v45 }
  0xb2   : > { %5518 = vmatpush3.bf16.msra.mxu1 %v5976_v46 }
  0xb3   : > { %5800 = vmatmul.mubr.bf16.gmra.mrb[20].mxu0 %v316_v49  ;;  %5519 = vmatprep.subr.bf16.mxu1 %v5977_v47  ;;  %v5979_v49 = vld [vmem:[#allocation9 + $0x158] sm:$0xff]  }
  0xb4   : > { %5803 = vmatprep.mubr.bf16.mxu0 %v317_v50  ;;  %v5980_v50 = vld [vmem:[#allocation9 + $0x118] sm:$0xff]  }
  0xb6   : > { %5520 = vmatpush3.bf16.msra.mxu1 %v5978_v48 }
  0xb7   : > { %5521 = vmatprep.subr.bf16.mxu1 %v5979_v49  ;;  %v1380_v49 = vrot.slane %v1378_v23, 5 }
  0xba   : > { %5522 = vmatpush3.bf16.msra.mxu1 %v5980_v50 }
  0xbb   : > { %5804 = vmatmul.mubr.bf16.gmra.mrb[24].mxu0 %v318_v55  ;;  %5523 = vmatprep.subr.bf16.mxu1 %v5983_v58 }
  0xbc   : > { %5807 = vmatprep.mubr.bf16.mxu0 %v319_v56 }
  0xc3   : > { %5808 = vmatmul.mubr.bf16.gmra.mrb[28].mxu0 %v320_v59  ;;  %v5984_v59 = vld [vmem:[#allocation9 + $0x120] sm:$0xff]  }
  0xc4   : > { %5524 = vmatpush3.bf16.msra.mxu1 %v5984_v59 }
 0x15e   : > { %v5781_v53 = vpop.f32.mrb[0].mxu0 }
 0x15f   : > { %v435_v54 = vadd.f32 %v5781_v53, %v6472_v52  ;;  %v426_v55 = vpop.f32.mrb[1].mxu0 }
 0x160   : > { %v427_v56 = vadd.f32 %v6472_v52, %v426_v55  ;;  %v5782_v57 = vpop.f32.mrb[2].mxu0 }
 0x161   : > { %v555_v60 = vadd.f32 3.0, %v435_v54  ;;  %v438_v61 = vadd.f32 %v5782_v57, %v6472_v52  ;;  %v429_v62 = vpop.f32.mrb[3].mxu0 }
 0x162   : > { %v553_v63 = vadd.f32 3.0, %v427_v56  ;;  %v430_v0 = vadd.f32 %v6472_v52, %v429_v62 }
 0x163   : > { %v587_v2 = vmax.f32 %v555_v60, 0.0  ;;  %v556_v3 = vadd.f32 3.0, %v438_v61 }
 0x164   : > { %v585_v4 = vmax.f32 %v553_v63, 0.0  ;;  %v554_v5 = vadd.f32 3.0, %v430_v0 }
 0x165   : > { %v619_v7 = vmin.f32 %v587_v2, 6.0  ;;  %v588_v8 = vmax.f32 %v556_v3, 0.0 }
 0x166   : > { %v617_v10 = vmin.f32 %v585_v4, 6.0  ;;  %v586_v11 = vmax.f32 %v554_v5, 0.0  ;;  %v5785_v12 = vpop.f32.mrb[4].mxu0 }
 0x167   : > { %v651_v14 = vmul.f32 %v619_v7, %v435_v54  ;;  %v620_v15 = vmin.f32 %v588_v8, 6.0  ;;  %v451_v16 = vadd.f32 %v5785_v12, %v6472_v52  ;;  %v442_v17 = vpop.f32.mrb[5].mxu0  ;;  %v1373_v12 = vor.u32 %v6484_v32, %v6481_v28 }
 0x168   : > { %v649_v19 = vmul.f32 %v617_v10, %v427_v56  ;;  %v618_v20 = vmin.f32 %v586_v11, 6.0  ;;  %v443_v21 = vadd.f32 %v6472_v52, %v442_v17  ;;  %v5786_v22 = vpop.f32.mrb[6].mxu0 }
 0x169   : > { %v652_v24 = vmul.f32 %v620_v15, %v438_v61  ;;  %v559_v25 = vadd.f32 3.0, %v451_v16  ;;  %v454_v26 = vadd.f32 %v5786_v22, %v6472_v52  ;;  %v445_v27 = vpop.f32.mrb[7].mxu0  ;;  %v683_v33 = vmul.f32 0.16666667, %v651_v14 }
 0x16a   : > { %v650_v29 = vmul.f32 %v618_v20, %v430_v0  ;;  %v557_v30 = vadd.f32 3.0, %v443_v21  ;;  %v446_v31 = vadd.f32 %v6472_v52, %v445_v27  ;;  %v681_v37 = vmul.f32 0.16666667, %v649_v19 }
 0x16b   : > { %v684_v34 = vmul.f32 0.16666667, %v652_v24  ;;  %v591_v35 = vmax.f32 %v559_v25, 0.0  ;;  %v560_v36 = vadd.f32 3.0, %v454_v26 }
 0x16c   : > { %v682_v38 = vmul.f32 0.16666667, %v650_v29  ;;  %v589_v39 = vmax.f32 %v557_v30, 0.0  ;;  %v558_v40 = vadd.f32 3.0, %v446_v31 }
 0x16d   : > { %v755_v41 = vpack.c.bf16 %v684_v34, %v683_v33  ;;  %v623_v42 = vmin.f32 %v591_v35, 6.0  ;;  %v592_v43 = vmax.f32 %v560_v36, 0.0 }
 0x16e   : > { %v754_v45 = vpack.c.bf16 %v682_v38, %v681_v37  ;;  %v621_v46 = vmin.f32 %v589_v39, 6.0  ;;  %v590_v47 = vmax.f32 %v558_v40, 0.0  ;;  %v5789_v48 = vpop.f32.mrb[8].mxu0 }
 0x16f   : > { %v787_v50 = vrot.slane %v755_v41, 4  ;;  %v655_v51 = vmul.f32 %v623_v42, %v451_v16  ;;  %v624_v53 = vmin.f32 %v592_v43, 6.0  ;;  %v467_v54 = vadd.f32 %v5789_v48, %v6472_v52  ;;  %v458_v55 = vpop.f32.mrb[9].mxu0 }
 0x170   : > { %v786_v56 = vrot.slane %v754_v45, 4  ;;  %v653_v57 = vmul.f32 %v621_v46, %v443_v21  ;;  %v622_v58 = vmin.f32 %v590_v47, 6.0  ;;  %v459_v59 = vadd.f32 %v6472_v52, %v458_v55  ;;  %v5790_v60 = vpop.f32.mrb[10].mxu0 }
 0x171   : > { %821 = vst [vmem:[#allocation2 + $0x28] ss:$-4 sps:$4 sm:$0xff] %v787_v50   ;;  %v687_v61 = vmul.f32 0.16666667, %v655_v51  ;;  %v656_v62 = vmul.f32 %v624_v53, %v454_v26  ;;  %v563_v63 = vadd.f32 3.0, %v467_v54  ;;  %v470_v0 = vadd.f32 %v5790_v60, %v6472_v52  ;;  %v461_v1 = vpop.f32.mrb[11].mxu0 }
 0x172   : > { %819 = vst [vmem:[#allocation2 + $0x18] ss:$-4 sps:$4 sm:$0xff] %v786_v56   ;;  %v685_v2 = vmul.f32 0.16666667, %v653_v57  ;;  %v654_v3 = vmul.f32 %v622_v58, %v446_v31  ;;  %v561_v4 = vadd.f32 3.0, %v459_v59  ;;  %v462_v5 = vadd.f32 %v6472_v52, %v461_v1 }
 0x173   : > { %v688_v6 = vmul.f32 0.16666667, %v656_v62  ;;  %v595_v7 = vmax.f32 %v563_v63, 0.0  ;;  %v564_v8 = vadd.f32 3.0, %v470_v0  ;;  %v1381_v16 = vor.u32 %v1380_v49, %v1377_v44 }
 0x174   : > { %v686_v9 = vmul.f32 0.16666667, %v654_v3  ;;  %v593_v10 = vmax.f32 %v561_v4, 0.0  ;;  %v562_v11 = vadd.f32 3.0, %v462_v5 }
 0x175   : > { %v757_v13 = vpack.c.bf16 %v688_v6, %v687_v61  ;;  %v627_v14 = vmin.f32 %v595_v7, 6.0  ;;  %v596_v15 = vmax.f32 %v564_v8, 0.0  ;;  %v6493_v32 = vsel %vm1365_vm2, %v1373_v12, %v1381_v16 }
 0x176   : > { %v756_v17 = vpack.c.bf16 %v686_v9, %v685_v2  ;;  %v625_v18 = vmin.f32 %v593_v10, 6.0  ;;  %v594_v19 = vmax.f32 %v562_v11, 0.0  ;;  %v5793_v20 = vpop.f32.mrb[12].mxu0 }
 0x177   : > { %v789_v21 = vrot.slane %v757_v13, 4  ;;  %v659_v22 = vmul.f32 %v627_v14, %v467_v54  ;;  %v628_v23 = vmin.f32 %v596_v15, 6.0  ;;  %v474_v24 = vpop.f32.mrb[13].mxu0  ;;  %v6496_v33 = vadd.f32 %v5793_v20, %v6472_v52 }
 0x178   : > { %v788_v25 = vrot.slane %v756_v17, 4  ;;  %v657_v26 = vmul.f32 %v625_v18, %v459_v59  ;;  %v626_v27 = vmin.f32 %v594_v19, 6.0  ;;  %v6499_v43 = vadd.f32 %v6472_v52, %v474_v24  ;;  %v1192_v49 = vld [vmem:[#allocation2 + $0x20] sm:$0xf0]  ;;  %v1193_v50 = vld [vmem:[#allocation2 + $0x28] sm:$0xf] }
 0x179   : > { %825 = vst [vmem:[#allocation2 + $0x48] ss:$-4 sps:$4 sm:$0xff] %v789_v21   ;;  %v691_v29 = vmul.f32 0.16666667, %v659_v22  ;;  %v660_v30 = vmul.f32 %v628_v23, %v470_v0  ;;  %v1190_v28 = vld [vmem:[#allocation2 + $0x10] sm:$0xf0] }
 0x17a   : > { %v1191_v31 = vld [vmem:[#allocation2 + $0x18] sm:$0xf]  ;;  %823 = vst [vmem:[#allocation2 + $0x38] ss:$-4 sps:$4 sm:$0xff] %v788_v25   ;;  %v689_v34 = vmul.f32 0.16666667, %v657_v26  ;;  %v658_v35 = vmul.f32 %v626_v27, %v462_v5 }
 0x17b   : > { %v1256_v36 = vrot.slane %v1190_v28, 4  ;;  %v1257_v37 = vrot.slane %v1191_v31, 4  ;;  %v853_v38 = vld [vmem:[#allocation2 + $0x10] sm:$0xf8]  ;;  %v692_v39 = vmul.f32 0.16666667, %v660_v30 }
 0x17c   : > { %v854_v40 = vld [vmem:[#allocation2 + $0x18] sm:$0xf]  ;;  %v902_v41 = vshrl.u32 %v853_v38, 16  ;;  %v905_v42 = vshll.u32 %v853_v38, 16  ;;  %v690_v44 = vmul.f32 0.16666667, %v658_v35 }
 0x17d   : > { %v1258_v45 = vsel %vm1252_vm0, %v1256_v36, %v1257_v37  ;;  %v910_v46 = vshrl.u32 %v854_v40, 16  ;;  %v913_v47 = vshll.u32 %v854_v40, 16  ;;  %v1670_v48 = vld [vmem:[#allocation2 + $0x10] sm:$0xf8]  ;;  %v759_v51 = vpack.c.bf16 %v692_v39, %v691_v29  ;;  %v1671_v55 = vld [vmem:[#allocation2 + $0x18] sm:$0xf] }
 0x17e   : > { %4070 = vmatprep.mubr.bf16.mxu1 %v1258_v45  ;;  %v904_v53 = vrot.slane %v902_v41, 3  ;;  %v907_v54 = vrot.slane %v905_v42, 4  ;;  %v1703_v56 = vshrl.u32 %v1670_v48, 16  ;;  %v5794_v57 = vpop.f32.mrb[14].mxu0  ;;  %v758_v58 = vpack.c.bf16 %v690_v44, %v689_v34  ;;  %v1672_v62 = vld [vmem:[#allocation2 + $0x20] sm:$0xf8] }
 0x17f   : > { %v912_v59 = vrot.slane %v910_v46, 3  ;;  %v915_v60 = vrot.slane %v913_v47, 4  ;;  %v1706_v61 = vshll.u32 %v1670_v48, 16  ;;  %v477_v63 = vpop.f32.mrb[15].mxu0  ;;  %v791_v0 = vrot.slane %v759_v51, 4  ;;  %v5982_v37 = vld [vmem:[#allocation9 + $0x180] sm:$0xff]  }
 0x180   : > { %v908_v1 = vor.u32 %v907_v54, %v904_v53  ;;  %v1705_v2 = vrot.slane %v1703_v56, 3  ;;  %v1711_v3 = vshrl.u32 %v1671_v55, 16  ;;  %v6502_v4 = vpop.f32.mrb[16].mxu0  ;;  %v790_v5 = vrot.slane %v758_v58, 4  ;;  %v1673_v9 = vld [vmem:[#allocation2 + $0x28] sm:$0xf] }
 0x181   : > { %v916_v6 = vor.u32 %v915_v60, %v912_v59  ;;  %v1708_v7 = vrot.slane %v1706_v61, 4  ;;  %v1714_v8 = vshll.u32 %v1671_v55, 16  ;;  %v6504_v10 = vpop.f32.mrb[17].mxu0  ;;  %829 = vst [vmem:[#allocation2 + $0x68] ss:$-4 sps:$4 sm:$0xff] %v791_v0   ;;  %v1259_v12 = vrot.slane %v1192_v49, 4 }
 0x182   : > { %v1713_v11 = vrot.slane %v1711_v3, 3  ;;  %v1260_v13 = vrot.slane %v1193_v50, 4  ;;  %v1720_v14 = vshrl.u32 %v1672_v62, 16  ;;  %827 = vst [vmem:[#allocation2 + $0x58] ss:$-4 sps:$4 sm:$0xff] %v790_v5   ;;  %v1723_v18 = vshll.u32 %v1672_v62, 16 }
 0x183   : > { %v917_v15 = vsel %vm883_vm1, %v908_v1, %v916_v6  ;;  %v1709_v16 = vor.u32 %v1708_v7, %v1705_v2  ;;  %v1716_v17 = vrot.slane %v1714_v8, 4  ;;  %v1728_v21 = vshrl.u32 %v1673_v9, 16  ;;  %v6508_v23 = vpop.f32.mrb[18].mxu0  ;;  %v855_v29 = vld [vmem:[#allocation2 + $0x20] sm:$0xf8]  ;;  %v5985_v42 = vld [vmem:[#allocation9 + $0x1c8] sm:$0xff]  }
 0x184   : > { %4071 = vmatmul.mubr.bf16.gmra.mrb[4].mxu1 %v917_v15  ;;  %v1261_v19 = vsel %vm1252_vm0, %v1259_v12, %v1260_v13  ;;  %v1722_v20 = vrot.slane %v1720_v14, 3  ;;  %v1731_v22 = vshll.u32 %v1673_v9, 16  ;;  %v1725_v25 = vrot.slane %v1723_v18, 4  ;;  %v6512_v30 = vpop.f32.mrb[19].mxu0  ;;  %v856_v36 = vld [vmem:[#allocation2 + $0x28] sm:$0xf] }
 0x185   : > { %v1717_v24 = vor.u32 %v1716_v17, %v1713_v11  ;;  %4078 = vmatprep.mubr.bf16.mxu1 %v1261_v19  ;;  %v567_v26 = vadd.f32 3.0, %v6496_v33  ;;  %v565_v27 = vadd.f32 3.0, %v6499_v43  ;;  %v1730_v28 = vrot.slane %v1728_v21, 3  ;;  %v5986_v49 = vld [vmem:[#allocation9 + $0x188] sm:$0xff]   ;;  %v1194_v55 = vld [vmem:[#allocation2 + $0x30] sm:$0xf0] }
 0x186   : > { %v1733_v31 = vrot.slane %v1731_v22, 4  ;;  %v486_v34 = vadd.f32 %v5794_v57, %v6472_v52  ;;  %v478_v35 = vadd.f32 %v6472_v52, %v477_v63  ;;  %v1726_v39 = vor.u32 %v1725_v25, %v1722_v20  ;;  %v6517_v48 = vpop.f32.mrb[20].mxu0  ;;  %v1195_v60 = vld [vmem:[#allocation2 + $0x38] sm:$0xf]  ;;  %v1335_v1 = vld [vmem:[#allocation2 + $0x10] sm:$0xf0] }
 0x187   : > { %v1718_v38 = vsel %vm883_vm1, %v1709_v16, %v1717_v24  ;;  %v599_v40 = vmax.f32 %v567_v26, 0.0  ;;  %v597_v41 = vmax.f32 %v565_v27, 0.0  ;;  %v919_v47 = vshrl.u32 %v855_v29, 16  ;;  %v6521_v61 = vpop.f32.mrb[21].mxu0  ;;  %v1336_v7 = vld [vmem:[#allocation2 + $0x18] sm:$0x1f] }
 0x188   : > { %4223 = vmatprep.mubr.bf16.mxu0 %v1718_v38  ;;  %v1734_v44 = vor.u32 %v1733_v31, %v1730_v28  ;;  %v568_v45 = vadd.f32 3.0, %v486_v34  ;;  %v566_v46 = vadd.f32 3.0, %v478_v35  ;;  %v922_v53 = vshll.u32 %v855_v29, 16  ;;  %v6525_v13 = vpop.f32.mrb[22].mxu0  ;;  %v1675_v21 = vld [vmem:[#allocation2 + $0x38] sm:$0xf] }
 0x189   : > { %4224 = vmatmul.mubr.bf16.vlgmr.msra.gmra.mrb[32].mxu0 %v6493_v32  ;;  %v631_v50 = vmin.f32 %v599_v40, 6.0  ;;  %v629_v51 = vmin.f32 %v597_v41, 6.0  ;;  %v927_v54 = vshrl.u32 %v856_v36, 16  ;;  %v921_v59 = vrot.slane %v919_v47, 3  ;;  %v6528_v22 = vpop.f32.mrb[23].mxu0 }
 0x18a   : > { %v1735_v56 = vsel %vm883_vm1, %v1726_v39, %v1734_v44  ;;  %v600_v57 = vmax.f32 %v568_v45, 0.0  ;;  %v598_v58 = vmax.f32 %v566_v46, 0.0  ;;  %5628 = vmatpush3.bf16.msra.mxu0 %v5982_v37  ;;  %v924_v32 = vrot.slane %v922_v53, 4  ;;  %v857_v40 = vld [vmem:[#allocation2 + $0x30] sm:$0xf8] }
 0x18b   : > { %4231 = vmatprep.mubr.bf16.mxu0 %v1735_v56  ;;  %v663_v62 = vmul.f32 %v631_v50, %v6496_v33  ;;  %v661_v63 = vmul.f32 %v629_v51, %v6499_v43  ;;  %v929_v0 = vrot.slane %v927_v54, 3  ;;  %5629 = vmatprep.subr.bf16.mxu0 %v5985_v42  ;;  %v930_v5 = vshll.u32 %v856_v36, 16  ;;  %v1674_v43 = vld [vmem:[#allocation2 + $0x30] sm:$0xf8]  ;;  %v858_v47 = vld [vmem:[#allocation2 + $0x38] sm:$0xf] }
 0x18c   : > { %v632_v2 = vmin.f32 %v600_v57, 6.0  ;;  %v630_v3 = vmin.f32 %v598_v58, 6.0  ;;  %v1262_v6 = vrot.slane %v1194_v55, 4  ;;  %v925_v11 = vor.u32 %v924_v32, %v921_v59  ;;  %v1197_v55 = vld [vmem:[#allocation2 + $0x48] sm:$0xf] }
 0x18d   : > { %v695_v8 = vmul.f32 0.16666667, %v663_v62  ;;  %v693_v9 = vmul.f32 0.16666667, %v661_v63  ;;  %v1263_v12 = vrot.slane %v1195_v60, 4  ;;  %v932_v33 = vrot.slane %v930_v5, 4 }
 0x18e   : > { %v664_v14 = vmul.f32 %v632_v2, %v486_v34  ;;  %v662_v15 = vmul.f32 %v630_v3, %v478_v35  ;;  %v1384_v16 = vshrl.u32 %v1335_v1, 16  ;;  %5630 = vmatpush3.bf16.msra.mxu0 %v5986_v49  ;;  %v1387_v18 = vshll.u32 %v1335_v1, 16  ;;  %v6530_v29 = vpop.f32.mrb[24].mxu0  ;;  %v1196_v49 = vld [vmem:[#allocation2 + $0x40] sm:$0xf0] }
 0x18f   : > { %v1264_v17 = vsel %vm1252_vm0, %v1262_v6, %v1263_v12  ;;  %v1392_v19 = vshrl.u32 %v1336_v7, 16  ;;  %v1395_v20 = vshll.u32 %v1336_v7, 16  ;;  %v933_v26 = vor.u32 %v932_v33, %v929_v0  ;;  %v6533_v41 = vpop.f32.mrb[25].mxu0  ;;  %v1337_v60 = vld [vmem:[#allocation2 + $0x20] sm:$0xf0] }
 0x190   : > { %v696_v24 = vmul.f32 0.16666667, %v664_v14  ;;  %v694_v25 = vmul.f32 0.16666667, %v662_v15  ;;  %v1386_v27 = vrot.slane %v1384_v16, 4  ;;  %v1389_v28 = vrot.slane %v1387_v18, 5 }
 0x191   : > { %v1394_v31 = vrot.slane %v1392_v19, 4  ;;  %v1397_v34 = vrot.slane %v1395_v20, 5  ;;  %v1737_v35 = vshrl.u32 %v1674_v43, 16  ;;  %v934_v38 = vsel %vm883_vm1, %v925_v11, %v933_v26  ;;  %v6536_v62 = vpop.f32.mrb[26].mxu0  ;;  %v1338_v2 = vld [vmem:[#allocation2 + $0x28] sm:$0x1f] }
 0x192   : > { %v761_v36 = vpack.c.bf16 %v696_v24, %v695_v8  ;;  %v760_v37 = vpack.c.bf16 %v694_v25, %v693_v9  ;;  %v1740_v39 = vshll.u32 %v1674_v43, 16  ;;  %4079 = vmatmul.mubr.bf16.gmra.mrb[8].mxu1 %v934_v38  ;;  %v1390_v42 = vor.u32 %v1389_v28, %v1386_v27  ;;  %v6538_v3 = vpop.f32.mrb[27].mxu0  ;;  %v1676_v15 = vld [vmem:[#allocation2 + $0x40] sm:$0xf8]  ;;  %v1677_v19 = vld [vmem:[#allocation2 + $0x48] sm:$0xf] }
 0x193   : > { %v1398_v44 = vor.u32 %v1397_v34, %v1394_v31  ;;  %v1739_v45 = vrot.slane %v1737_v35, 3  ;;  %v1745_v46 = vshrl.u32 %v1675_v21, 16  ;;  %4086 = vmatprep.mubr.bf16.mxu1 %v1264_v17  ;;  %v1748_v54 = vshll.u32 %v1675_v21, 16 }
 0x194   : > { %v793_v50 = vrot.slane %v761_v36, 4  ;;  %v792_v51 = vrot.slane %v760_v37, 4  ;;  %v1742_v53 = vrot.slane %v1740_v39, 4  ;;  %v936_v58 = vshrl.u32 %v857_v40, 16 }
 0x195   : > { %v1399_v56 = vsel %vm1365_vm2, %v1390_v42, %v1398_v44  ;;  %v1747_v57 = vrot.slane %v1745_v46, 3  ;;  %v939_v59 = vshll.u32 %v857_v40, 16  ;;  %v1750_v32 = vrot.slane %v1748_v54, 4 }
 0x196   : > { %833 = vst [vmem:[#allocation2 + $0x88] ss:$-4 sps:$4 sm:$0xff] %v793_v50   ;;  %831 = vst [vmem:[#allocation2 + $0x78] ss:$-4 sps:$4 sm:$0xff] %v792_v51   ;;  %4232 = vmatmul.mubr.bf16.gmra.mrb[36].mxu0 %v1399_v56  ;;  %v1743_v63 = vor.u32 %v1742_v53, %v1739_v45  ;;  %v944_v0 = vshrl.u32 %v858_v47, 16  ;;  %v947_v1 = vshll.u32 %v858_v47, 16  ;;  %v499_v44 = vadd.f32 %v6502_v4, %v6472_v52 }
 0x197   : > { %v938_v5 = vrot.slane %v936_v58, 3  ;;  %v941_v6 = vrot.slane %v939_v59, 4  ;;  %v1265_v7 = vrot.slane %v1196_v49, 4  ;;  %v1266_v8 = vrot.slane %v1197_v55, 4  ;;  %v6540_v33 = vpop.f32.mrb[28].mxu0 }
 0x198   : > { %v1751_v9 = vor.u32 %v1750_v32, %v1747_v57  ;;  %v946_v11 = vrot.slane %v944_v0, 3  ;;  %v949_v12 = vrot.slane %v947_v1, 4  ;;  %v1401_v14 = vshrl.u32 %v1337_v60, 16  ;;  %v6545_v38 = vpop.f32.mrb[29].mxu0  ;;  %v859_v45 = vld [vmem:[#allocation2 + $0x40] sm:$0xf8] }
 0x199   : > { %v942_v16 = vor.u32 %v941_v6, %v938_v5  ;;  %v1267_v43 = vsel %vm1252_vm0, %v1265_v7, %v1266_v8  ;;  %v1404_v17 = vshll.u32 %v1337_v60, 16  ;;  %v1409_v18 = vshrl.u32 %v1338_v2, 16  ;;  %v860_v56 = vld [vmem:[#allocation2 + $0x48] sm:$0xf]  ;;  %v6555_v57 = vpop.f32.mrb[30].mxu0 }
 0x19a   : > { %v1752_v20 = vsel %vm883_vm1, %v1743_v63, %v1751_v9  ;;  %v950_v21 = vor.u32 %v949_v12, %v946_v11  ;;  %v1403_v24 = vrot.slane %v1401_v14, 4  ;;  %v1412_v25 = vshll.u32 %v1338_v2, 16  ;;  %v1198_v1 = vld [vmem:[#allocation2 + $0x50] sm:$0xf0]  ;;  %v6559_v7 = vpop.f32.mrb[31].mxu0 }
 0x19b   : > { %4239 = vmatprep.mubr.bf16.mxu0 %v1752_v20  ;;  %v1406_v26 = vrot.slane %v1404_v17, 5  ;;  %v1411_v27 = vrot.slane %v1409_v18, 4  ;;  %v1754_v28 = vshrl.u32 %v1676_v15, 16  ;;  %v1757_v31 = vshll.u32 %v1676_v15, 16  ;;  %v1339_v14 = vld [vmem:[#allocation2 + $0x30] sm:$0xf0] }
 0x19c   : > { %v951_v34 = vsel %vm883_vm1, %v942_v16, %v950_v21  ;;  %v1414_v35 = vrot.slane %v1412_v25, 5  ;;  %v1762_v36 = vshrl.u32 %v1677_v19, 16  ;;  %v1765_v37 = vshll.u32 %v1677_v19, 16 }
 0x19d   : > { %4087 = vmatmul.mubr.bf16.gmra.mrb[12].mxu1 %v951_v34  ;;  %v1407_v39 = vor.u32 %v1406_v26, %v1403_v24  ;;  %v1756_v40 = vrot.slane %v1754_v28, 3  ;;  %v1759_v42 = vrot.slane %v1757_v31, 4  ;;  %v491_v50 = vadd.f32 %v6472_v52, %v6504_v10  ;;  %v1340_v24 = vld [vmem:[#allocation2 + $0x38] sm:$0x1f]  ;;  %v1678_v31 = vld [vmem:[#allocation2 + $0x50] sm:$0xf8] }
 0x19e   : > { %4094 = vmatprep.mubr.bf16.mxu1 %v1267_v43  ;;  %v1415_v46 = vor.u32 %v1414_v35, %v1411_v27  ;;  %v1764_v47 = vrot.slane %v1762_v36, 3  ;;  %v1767_v49 = vrot.slane %v1765_v37, 4  ;;  %v571_v53 = vadd.f32 3.0, %v499_v44  ;;  %v5987_v34 = vld [vmem:[#allocation9 + $0x168] sm:$0xff]  }
 0x19f   : > { %v1760_v51 = vor.u32 %v1759_v42, %v1756_v40  ;;  %v502_v54 = vadd.f32 %v6508_v23, %v6472_v52  ;;  %v494_v55 = vadd.f32 %v6472_v52, %v6512_v30  ;;  %v569_v59 = vadd.f32 3.0, %v491_v50  ;;  %v1199_v30 = vld [vmem:[#allocation2 + $0x58] sm:$0xf]  ;;  %v5988_v42 = vld [vmem:[#allocation9 + $0x128] sm:$0xff]   ;;  %5525 = vmatprep.subr.bf16.mxu1 %v5987_v34 }
 0x1a0   : > { %v1416_v4 = vsel %vm1365_vm2, %v1407_v39, %v1415_v46  ;;  %v1768_v58 = vor.u32 %v1767_v49, %v1764_v47  ;;  %v953_v60 = vshrl.u32 %v859_v45, 16  ;;  %v603_v63 = vmax.f32 %v571_v53, 0.0  ;;  %v1679_v40 = vld [vmem:[#allocation2 + $0x58] sm:$0xf]  ;;  %v861_v49 = vld [vmem:[#allocation2 + $0x50] sm:$0xf8]  ;;  %5526 = vmatpush3.bf16.msra.mxu1 %v5988_v42 }
 0x1a1   : > { %4240 = vmatmul.mubr.bf16.gmra.mrb[40].mxu0 %v1416_v4  ;;  %v572_v32 = vadd.f32 3.0, %v502_v54  ;;  %v570_v10 = vadd.f32 3.0, %v494_v55  ;;  %v956_v0 = vshll.u32 %v859_v45, 16  ;;  %v601_v23 = vmax.f32 %v569_v59, 0.0 }
 0x1a2   : > { %v1769_v2 = vsel %vm883_vm1, %v1760_v51, %v1768_v58  ;;  %v955_v5 = vrot.slane %v953_v60, 3  ;;  %v961_v6 = vshrl.u32 %v860_v56, 16  ;;  %v635_v8 = vmin.f32 %v603_v63, 6.0  ;;  %v5989_v51 = vld [vmem:[#allocation9 + $0x1d0] sm:$0xff]   ;;  %v862_v60 = vld [vmem:[#allocation2 + $0x58] sm:$0xf] }
 0x1a3   : > { %4247 = vmatprep.mubr.bf16.mxu0 %v1769_v2  ;;  %v604_v9 = vmax.f32 %v572_v32, 0.0  ;;  %v602_v11 = vmax.f32 %v570_v10, 0.0  ;;  %v958_v12 = vrot.slane %v956_v0, 4  ;;  %v633_v15 = vmin.f32 %v601_v23, 6.0  ;;  %5631 = vmatprep.subr.bf16.mxu0 %v5989_v51  ;;  %v5990_v63 = vld [vmem:[#allocation9 + $0x190] sm:$0xff]  }
 0x1a4   : > { %v963_v16 = vrot.slane %v961_v6, 3  ;;  %v964_v43 = vshll.u32 %v860_v56, 16  ;;  %v1268_v17 = vrot.slane %v1198_v1, 4  ;;  %v667_v18 = vmul.f32 %v635_v8, %v499_v44  ;;  %v1200_v2 = vld [vmem:[#allocation2 + $0x60] sm:$0xf0]  ;;  %v5992_v6 = vld [vmem:[#allocation9 + $0x130] sm:$0xff]   ;;  %5632 = vmatpush3.bf16.msra.mxu0 %v5990_v63 }
 0x1a5   : > { %v636_v19 = vmin.f32 %v604_v9, 6.0  ;;  %v634_v20 = vmin.f32 %v602_v11, 6.0  ;;  %v959_v21 = vor.u32 %v958_v12, %v955_v5  ;;  %v665_v25 = vmul.f32 %v633_v15, %v491_v50  ;;  %v1201_v23 = vld [vmem:[#allocation2 + $0x68] sm:$0xf]  ;;  %v5991_v5 = vld [vmem:[#allocation9 + $0x170] sm:$0xff]   ;;  %v5994_v15 = vld [vmem:[#allocation9 + $0x198] sm:$0xff]  }
 0x1a6   : > { %v966_v26 = vrot.slane %v964_v43, 4  ;;  %v1269_v27 = vrot.slane %v1199_v30, 4  ;;  %v1418_v28 = vshrl.u32 %v1339_v14, 16  ;;  %v699_v35 = vmul.f32 0.16666667, %v667_v18  ;;  %5527 = vmatprep.subr.bf16.mxu1 %v5991_v5 }
 0x1a7   : > { %v668_v36 = vmul.f32 %v636_v19, %v502_v54  ;;  %v666_v37 = vmul.f32 %v634_v20, %v494_v55  ;;  %v1421_v39 = vshll.u32 %v1339_v14, 16  ;;  %v697_v45 = vmul.f32 0.16666667, %v665_v25  ;;  %v1341_v12 = vld [vmem:[#allocation2 + $0x40] sm:$0xf0]  ;;  %v5993_v14 = vld [vmem:[#allocation9 + $0x1d8] sm:$0xff]   ;;  %5528 = vmatpush3.bf16.msra.mxu1 %v5992_v6 }
 0x1a8   : > { %v967_v46 = vor.u32 %v966_v26, %v963_v16  ;;  %v1270_v44 = vsel %vm1252_vm0, %v1268_v17, %v1269_v27  ;;  %v1420_v47 = vrot.slane %v1418_v28, 4  ;;  %v1426_v4 = vshrl.u32 %v1340_v24, 16  ;;  %v5995_v19 = vld [vmem:[#allocation9 + $0x178] sm:$0xff]   ;;  %v1342_v26 = vld [vmem:[#allocation2 + $0x48] sm:$0x1f]  ;;  %5633 = vmatprep.subr.bf16.mxu0 %v5993_v14 }
 0x1a9   : > { %v700_v50 = vmul.f32 0.16666667, %v668_v36  ;;  %v698_v53 = vmul.f32 0.16666667, %v666_v37  ;;  %v1423_v56 = vrot.slane %v1421_v39, 5  ;;  %v1429_v54 = vshll.u32 %v1340_v24, 16  ;;  %5529 = vmatprep.subr.bf16.mxu1 %v5995_v19  ;;  %5634 = vmatpush3.bf16.msra.mxu0 %v5994_v15 }
 0x1aa   : > { %v968_v58 = vsel %vm883_vm1, %v959_v21, %v967_v46  ;;  %v1771_v55 = vshrl.u32 %v1678_v31, 16  ;;  %v1774_v59 = vshll.u32 %v1678_v31, 16  ;;  %v1428_v1 = vrot.slane %v1426_v4, 4  ;;  %v5996_v27 = vld [vmem:[#allocation9 + $0x138] sm:$0xff]   ;;  %v5997_v36 = vld [vmem:[#allocation9 + $0x1e0] sm:$0xff]  }
 0x1ab   : > { %v763_v32 = vpack.c.bf16 %v700_v50, %v699_v35  ;;  %v762_v10 = vpack.c.bf16 %v698_v53, %v697_v45  ;;  %4095 = vmatmul.mubr.bf16.gmra.mrb[16].mxu1 %v968_v58  ;;  %v1424_v0 = vor.u32 %v1423_v56, %v1420_v47  ;;  %v1431_v30 = vrot.slane %v1429_v54, 5  ;;  %v5998_v45 = vld [vmem:[#allocation9 + $0x1a0] sm:$0xff]   ;;  %5635 = vmatprep.subr.bf16.mxu0 %v5997_v36  ;;  %v5999_v53 = vld [vmem:[#allocation9 + $0x1e8] sm:$0xff]  }
 0x1ac   : > { %4102 = vmatprep.mubr.bf16.mxu1 %v1270_v44  ;;  %v1773_v8 = vrot.slane %v1771_v55, 3  ;;  %v1776_v9 = vrot.slane %v1774_v59, 4  ;;  %v1779_v11 = vshrl.u32 %v1679_v40, 16  ;;  %v1782_v17 = vshll.u32 %v1679_v40, 16  ;;  %v6001_v46 = vld [vmem:[#allocation9 + $0x200] sm:$0xff]   ;;  %5530 = vmatpush3.bf16.msra.mxu1 %v5996_v27  ;;  %v6003_v27 = vld [vmem:[#allocation9 + $0x1b0] sm:$0xff]  }
 0x1ad   : > { %v795_v16 = vrot.slane %v763_v32, 4  ;;  %v794_v43 = vrot.slane %v762_v10, 4  ;;  %v970_v18 = vshrl.u32 %v861_v49, 16  ;;  %v1432_v20 = vor.u32 %v1431_v30, %v1428_v1  ;;  %v1680_v50 = vld [vmem:[#allocation2 + $0x60] sm:$0xf8]  ;;  %5811 = vmatprep.subr.bf16.mxu1 %v6001_v46  ;;  %5636 = vmatpush3.bf16.msra.mxu0 %v5998_v45 }
 0x1ae   : > { %v1777_v21 = vor.u32 %v1776_v9, %v1773_v8  ;;  %v1781_v24 = vrot.slane %v1779_v11, 3  ;;  %v973_v25 = vshll.u32 %v861_v49, 16  ;;  %v1784_v28 = vrot.slane %v1782_v17, 4  ;;  %v1681_v55 = vld [vmem:[#allocation2 + $0x68] sm:$0xf]  ;;  %5637 = vmatprep.subr.bf16.mxu0 %v5999_v53  ;;  %v6002_v9 = vld [vmem:[#allocation9 + $0x1f0] sm:$0xff]  }
 0x1af   : > { %837 = vst [vmem:[#allocation2 + $0xa8] ss:$-4 sps:$4 sm:$0xff] %v795_v16   ;;  %835 = vst [vmem:[#allocation2 + $0x98] ss:$-4 sps:$4 sm:$0xff] %v794_v43   ;;  %v972_v31 = vrot.slane %v970_v18, 3  ;;  %v978_v34 = vshrl.u32 %v862_v60, 16  ;;  %v1433_v37 = vsel %vm1365_vm2, %v1424_v0, %v1432_v20  ;;  %v515_v15 = vadd.f32 %v6517_v48, %v6472_v52 }
 0x1b0   : > { %v981_v35 = vshll.u32 %v862_v60, 16  ;;  %v975_v39 = vrot.slane %v973_v25, 4  ;;  %v1271_v40 = vrot.slane %v1200_v2, 4  ;;  %v1272_v42 = vrot.slane %v1201_v23, 4  ;;  %4248 = vmatmul.mubr.bf16.gmra.mrb[44].mxu0 %v1433_v37  ;;  %v6000_v23 = vld [vmem:[#allocation9 + $0x1a8] sm:$0xff]  }
 0x1b1   : > { %v1785_v44 = vor.u32 %v1784_v28, %v1781_v24  ;;  %v980_v47 = vrot.slane %v978_v34, 3  ;;  %v1435_v51 = vshrl.u32 %v1341_v12, 16  ;;  %v1438_v58 = vshll.u32 %v1341_v12, 16  ;;  %v863_v16 = vld [vmem:[#allocation2 + $0x60] sm:$0xf8]  ;;  %5638 = vmatpush3.bf16.msra.mxu0 %v6000_v23 }
 0x1b2   : > { %v983_v49 = vrot.slane %v981_v35, 4  ;;  %v976_v56 = vor.u32 %v975_v39, %v972_v31  ;;  %v1273_v4 = vsel %vm1252_vm0, %v1271_v40, %v1272_v42  ;;  %v1443_v54 = vshrl.u32 %v1342_v26, 16  ;;  %5639 = vmatprep.subr.bf16.mxu0 %v6002_v9  ;;  %v6004_v35 = vld [vmem:[#allocation9 + $0x1f8] sm:$0xff]   ;;  %v1202_v40 = vld [vmem:[#allocation2 + $0x70] sm:$0xf0] }
 0x1b3   : > { %v1786_v59 = vsel %vm883_vm1, %v1777_v21, %v1785_v44  ;;  %v1437_v63 = vrot.slane %v1435_v51, 4  ;;  %v1446_v32 = vshll.u32 %v1342_v26, 16  ;;  %v1440_v10 = vrot.slane %v1438_v58, 5  ;;  %v864_v26 = vld [vmem:[#allocation2 + $0x68] sm:$0xf] }
 0x1b4   : > { %v984_v60 = vor.u32 %v983_v49, %v980_v47  ;;  %4255 = vmatprep.mubr.bf16.mxu0 %v1786_v59  ;;  %v1445_v0 = vrot.slane %v1443_v54, 4  ;;  %v1788_v1 = vshrl.u32 %v1680_v50, 16  ;;  %v1791_v2 = vshll.u32 %v1680_v50, 16  ;;  %v1203_v46 = vld [vmem:[#allocation2 + $0x78] sm:$0xf] }
 0x1b5   : > { %v1448_v6 = vrot.slane %v1446_v32, 5  ;;  %v1796_v30 = vshrl.u32 %v1681_v55, 16  ;;  %v1799_v8 = vshll.u32 %v1681_v55, 16  ;;  %v1441_v11 = vor.u32 %v1440_v10, %v1437_v63  ;;  %5640 = vmatpush3.bf16.msra.mxu0 %v6003_v27  ;;  %v6005_v50 = vld [vmem:[#allocation9 + $0x1b8] sm:$0xff]  }
 0x1b6   : > { %v985_v5 = vsel %vm883_vm1, %v976_v56, %v984_v60  ;;  %v1790_v12 = vrot.slane %v1788_v1, 3  ;;  %v1793_v14 = vrot.slane %v1791_v2, 4  ;;  %v507_v19 = vadd.f32 %v6472_v52, %v6521_v61  ;;  %5641 = vmatprep.subr.bf16.mxu0 %v6004_v35 }
 0x1b7   : > { %4103 = vmatmul.mubr.bf16.gmra.mrb[20].mxu1 %v985_v5  ;;  %v1449_v43 = vor.u32 %v1448_v6, %v1445_v0  ;;  %v1798_v17 = vrot.slane %v1796_v30, 3  ;;  %v1801_v18 = vrot.slane %v1799_v8, 4  ;;  %v575_v21 = vadd.f32 3.0, %v515_v15  ;;  %v1344_v0 = vld [vmem:[#allocation2 + $0x58] sm:$0x1f] }
 0x1b8   : > { %4110 = vmatprep.mubr.bf16.mxu1 %v1273_v4  ;;  %v1794_v20 = vor.u32 %v1793_v14, %v1790_v12  ;;  %v518_v24 = vadd.f32 %v6525_v13, %v6472_v52  ;;  %v510_v25 = vadd.f32 %v6472_v52, %v6528_v22  ;;  %v573_v31 = vadd.f32 3.0, %v507_v19  ;;  %v1343_v13 = vld [vmem:[#allocation2 + $0x50] sm:$0xf0]  ;;  %v1683_v14 = vld [vmem:[#allocation2 + $0x78] sm:$0xf] }
 0x1b9   : > { %v1450_v48 = vsel %vm1365_vm2, %v1441_v11, %v1449_v43  ;;  %v1802_v28 = vor.u32 %v1801_v18, %v1798_v17  ;;  %v987_v34 = vshrl.u32 %v863_v16, 16  ;;  %v607_v61 = vmax.f32 %v575_v21, 0.0  ;;  %v1682_v30 = vld [vmem:[#allocation2 + $0x70] sm:$0xf8]  ;;  %5642 = vmatpush3.bf16.msra.mxu0 %v6005_v50 }
 0x1ba   : > { %4256 = vmatmul.mubr.bf16.gmra.mrb[48].mxu0 %v1450_v48  ;;  %v576_v36 = vadd.f32 3.0, %v518_v24  ;;  %v574_v37 = vadd.f32 3.0, %v510_v25  ;;  %v990_v39 = vshll.u32 %v863_v16, 16  ;;  %v605_v52 = vmax.f32 %v573_v31, 0.0 }
 0x1bb   : > { %v1803_v42 = vsel %vm883_vm1, %v1794_v20, %v1802_v28  ;;  %v989_v22 = vrot.slane %v987_v34, 3  ;;  %v995_v45 = vshrl.u32 %v864_v26, 16  ;;  %v639_v44 = vmin.f32 %v607_v61, 6.0  ;;  %v866_v28 = vld [vmem:[#allocation2 + $0x78] sm:$0xf] }
 0x1bc   : > { %4263 = vmatprep.mubr.bf16.mxu0 %v1803_v42  ;;  %v608_v47 = vmax.f32 %v576_v36, 0.0  ;;  %v606_v49 = vmax.f32 %v574_v37, 0.0  ;;  %v992_v51 = vrot.slane %v990_v39, 4  ;;  %v637_v53 = vmin.f32 %v605_v52, 6.0  ;;  %v1204_v36 = vld [vmem:[#allocation2 + $0x80] sm:$0xf0] }
 0x1bd   : > { %v997_v56 = vrot.slane %v995_v45, 3  ;;  %v998_v4 = vshll.u32 %v864_v26, 16  ;;  %v1274_v58 = vrot.slane %v1202_v40, 4  ;;  %v671_v54 = vmul.f32 %v639_v44, %v515_v15  ;;  %v1205_v42 = vld [vmem:[#allocation2 + $0x88] sm:$0xf] }
 0x1be   : > { %v640_v55 = vmin.f32 %v608_v47, 6.0  ;;  %v638_v59 = vmin.f32 %v606_v49, 6.0  ;;  %v993_v60 = vor.u32 %v992_v51, %v989_v22  ;;  %v669_v63 = vmul.f32 %v637_v53, %v507_v19  ;;  %v1345_v44 = vld [vmem:[#allocation2 + $0x60] sm:$0xf0]  ;;  %v1346_v53 = vld [vmem:[#allocation2 + $0x68] sm:$0x1f] }
 0x1bf   : > { %v1000_v32 = vrot.slane %v998_v4, 4  ;;  %v1275_v10 = vrot.slane %v1203_v46, 4  ;;  %v1452_v1 = vshrl.u32 %v1343_v13, 16  ;;  %v703_v2 = vmul.f32 0.16666667, %v671_v54 }
 0x1c0   : > { %v672_v23 = vmul.f32 %v640_v55, %v518_v24  ;;  %v670_v5 = vmul.f32 %v638_v59, %v510_v25  ;;  %v1455_v6 = vshll.u32 %v1343_v13, 16  ;;  %v701_v8 = vmul.f32 0.16666667, %v669_v63  ;;  %v865_v24 = vld [vmem:[#allocation2 + $0x70] sm:$0xf8] }
 0x1c1   : > { %v1001_v9 = vor.u32 %v1000_v32, %v997_v56  ;;  %v1276_v11 = vsel %vm1252_vm0, %v1274_v58, %v1275_v10  ;;  %v1454_v12 = vrot.slane %v1452_v1, 4  ;;  %v1460_v17 = vshrl.u32 %v1344_v0, 16  ;;  %v1684_v32 = vld [vmem:[#allocation2 + $0x80] sm:$0xf8] }
 0x1c2   : > { %v704_v15 = vmul.f32 0.16666667, %v672_v23  ;;  %v702_v16 = vmul.f32 0.16666667, %v670_v5  ;;  %v1457_v43 = vrot.slane %v1455_v6, 5  ;;  %v1463_v19 = vshll.u32 %v1344_v0, 16 }
 0x1c3   : > { %v1002_v18 = vsel %vm883_vm1, %v993_v60, %v1001_v9  ;;  %v1805_v20 = vshrl.u32 %v1682_v30, 16  ;;  %v1808_v21 = vshll.u32 %v1682_v30, 16  ;;  %v1462_v48 = vrot.slane %v1460_v17, 4  ;;  %v1685_v23 = vld [vmem:[#allocation2 + $0x88] sm:$0xf] }
 0x1c4   : > { %v765_v25 = vpack.c.bf16 %v704_v15, %v703_v2  ;;  %v764_v26 = vpack.c.bf16 %v702_v16, %v701_v8  ;;  %4111 = vmatmul.mubr.bf16.gmra.mrb[24].mxu1 %v1002_v18  ;;  %v1458_v27 = vor.u32 %v1457_v43, %v1454_v12  ;;  %v1465_v31 = vrot.slane %v1463_v19, 5 }
 0x1c5   : > { %4118 = vmatprep.mubr.bf16.mxu1 %v1276_v11  ;;  %v1807_v34 = vrot.slane %v1805_v20, 3  ;;  %v1810_v35 = vrot.slane %v1808_v21, 4  ;;  %v1813_v61 = vshrl.u32 %v1683_v14, 16  ;;  %v1816_v40 = vshll.u32 %v1683_v14, 16  ;;  %v6586_v21 = vld [vmem:[%s7295_s2] ss:$0 sm:$0xff] }
 0x1c6   : > { %v797_v37 = vrot.slane %v765_v25, 4  ;;  %v796_v39 = vrot.slane %v764_v26, 4  ;;  %v1004_v13 = vshrl.u32 %v865_v24, 16  ;;  %v1466_v52 = vor.u32 %v1465_v31, %v1462_v48  ;;  %v867_v25 = vld [vmem:[#allocation2 + $0x80] sm:$0xf8] }
 0x1c7   : > { %v1811_v22 = vor.u32 %v1810_v35, %v1807_v34  ;;  %v1815_v45 = vrot.slane %v1813_v61, 3  ;;  %v1007_v46 = vshll.u32 %v865_v24, 16  ;;  %v1818_v47 = vrot.slane %v1816_v40, 4 }
 0x1c8   : > { %841 = vst [vmem:[#allocation2 + $0xc8] ss:$-4 sps:$4 sm:$0xff] %v797_v37   ;;  %839 = vst [vmem:[#allocation2 + $0xb8] ss:$-4 sps:$4 sm:$0xff] %v796_v39   ;;  %v1006_v49 = vrot.slane %v1004_v13, 3  ;;  %v1012_v51 = vshrl.u32 %v866_v28, 16  ;;  %v1467_v56 = vsel %vm1365_vm2, %v1458_v27, %v1466_v52  ;;  %v531_v24 = vadd.f32 %v6586_v21, %v6530_v29 }
 0x1c9   : > { %v1015_v50 = vshll.u32 %v866_v28, 16  ;;  %v1009_v4 = vrot.slane %v1007_v46, 4  ;;  %v1277_v58 = vrot.slane %v1204_v36, 4  ;;  %v1278_v54 = vrot.slane %v1205_v42, 4  ;;  %4264 = vmatmul.mubr.bf16.gmra.mrb[52].mxu0 %v1467_v56  ;;  %v868_v36 = vld [vmem:[#allocation2 + $0x88] sm:$0xf] }
 0x1ca   : > { %v1819_v55 = vor.u32 %v1818_v47, %v1815_v45  ;;  %v1014_v59 = vrot.slane %v1012_v51, 3  ;;  %v1469_v63 = vshrl.u32 %v1345_v44, 16  ;;  %v1472_v1 = vshll.u32 %v1345_v44, 16  ;;  %v1347_v47 = vld [vmem:[#allocation2 + $0x70] sm:$0xf0] }
 0x1cb   : > { %v1017_v60 = vrot.slane %v1015_v50, 4  ;;  %v1010_v10 = vor.u32 %v1009_v4, %v1006_v49  ;;  %v1279_v0 = vsel %vm1252_vm0, %v1277_v58, %v1278_v54  ;;  %v1477_v2 = vshrl.u32 %v1346_v53, 16 }
 0x1cc   : > { %v1820_v5 = vsel %vm883_vm1, %v1811_v22, %v1819_v55  ;;  %v1471_v30 = vrot.slane %v1469_v63, 4  ;;  %v1480_v8 = vshll.u32 %v1346_v53, 16  ;;  %v1474_v9 = vrot.slane %v1472_v1, 5  ;;  %v1207_v53 = vld [vmem:[#allocation2 + $0x98] sm:$0xf] }
 0x1cd   : > { %v1018_v6 = vor.u32 %v1017_v60, %v1014_v59  ;;  %4271 = vmatprep.mubr.bf16.mxu0 %v1820_v5  ;;  %v1479_v11 = vrot.slane %v1477_v2, 4  ;;  %v1822_v12 = vshrl.u32 %v1684_v32, 16  ;;  %v1825_v14 = vshll.u32 %v1684_v32, 16  ;;  %v1348_v1 = vld [vmem:[#allocation2 + $0x78] sm:$0x1f] }
 0x1ce   : > { %v1482_v16 = vrot.slane %v1480_v8, 5  ;;  %v1830_v43 = vshrl.u32 %v1685_v23, 16  ;;  %v1833_v17 = vshll.u32 %v1685_v23, 16  ;;  %v1475_v18 = vor.u32 %v1474_v9, %v1471_v30  ;;  %v1686_v8 = vld [vmem:[#allocation2 + $0x90] sm:$0xf8] }
 0x1cf   : > { %v1019_v15 = vsel %vm883_vm1, %v1010_v10, %v1018_v6  ;;  %v1824_v19 = vrot.slane %v1822_v12, 3  ;;  %v1827_v20 = vrot.slane %v1825_v14, 4  ;;  %v523_v28 = vadd.f32 %v6586_v21, %v6533_v41  ;;  %v1206_v41 = vld [vmem:[#allocation2 + $0x90] sm:$0xf0] }
 0x1d0   : > { %4119 = vmatmul.mubr.bf16.gmra.mrb[28].mxu1 %v1019_v15  ;;  %v1483_v26 = vor.u32 %v1482_v16, %v1479_v11  ;;  %v1832_v27 = vrot.slane %v1830_v43, 3  ;;  %v1835_v48 = vrot.slane %v1833_v17, 4  ;;  %v579_v34 = vadd.f32 3.0, %v531_v24  ;;  %v1687_v15 = vld [vmem:[#allocation2 + $0x98] sm:$0xf] }
 0x1d1   : > { %4126 = vmatprep.mubr.bf16.mxu1 %v1279_v0  ;;  %v1828_v31 = vor.u32 %v1827_v20, %v1824_v19  ;;  %v534_v35 = vadd.f32 %v6586_v21, %v6536_v62  ;;  %v526_v61 = vadd.f32 %v6586_v21, %v6538_v3  ;;  %v577_v39 = vadd.f32 3.0, %v523_v28 }
 0x1d2   : > { %v1484_v37 = vsel %vm1365_vm2, %v1475_v18, %v1483_v26  ;;  %v1836_v29 = vor.u32 %v1835_v48, %v1832_v27  ;;  %v1021_v40 = vshrl.u32 %v867_v25, 16  ;;  %v611_v13 = vmax.f32 %v579_v34, 0.0  ;;  %v869_v26 = vld [vmem:[#allocation2 + $0x90] sm:$0xf8]  ;;  %v870_v34 = vld [vmem:[#allocation2 + $0x98] sm:$0xf] }
 0x1d3   : > { %4272 = vmatmul.mubr.bf16.gmra.mrb[56].mxu0 %v1484_v37  ;;  %v580_v42 = vadd.f32 3.0, %v534_v35  ;;  %v578_v52 = vadd.f32 3.0, %v526_v61  ;;  %v1024_v22 = vshll.u32 %v867_v25, 16  ;;  %v609_v46 = vmax.f32 %v577_v39, 0.0 }
 0x1d4   : > { %v1837_v45 = vsel %vm883_vm1, %v1828_v31, %v1836_v29  ;;  %v1023_v44 = vrot.slane %v1021_v40, 3  ;;  %v1029_v62 = vshrl.u32 %v868_v36, 16  ;;  %v643_v3 = vmin.f32 %v611_v13, 6.0  ;;  %v1208_v29 = vld [vmem:[#allocation2 + $0xa0] sm:$0xf0] }
 0x1d5   : > { %4279 = vmatprep.mubr.bf16.mxu0 %v1837_v45  ;;  %v612_v49 = vmax.f32 %v580_v42, 0.0  ;;  %v610_v51 = vmax.f32 %v578_v52, 0.0  ;;  %v1026_v50 = vrot.slane %v1024_v22, 4  ;;  %v641_v56 = vmin.f32 %v609_v46, 6.0  ;;  %v1209_v52 = vld [vmem:[#allocation2 + $0xa8] sm:$0xf] }
 0x1d6   : > { %v1031_v4 = vrot.slane %v1029_v62, 3  ;;  %v1032_v58 = vshll.u32 %v868_v36, 16  ;;  %v1280_v54 = vrot.slane %v1206_v41, 4  ;;  %v675_v55 = vmul.f32 %v643_v3, %v531_v24 }
 0x1d7   : > { %v644_v59 = vmin.f32 %v612_v49, 6.0  ;;  %v642_v60 = vmin.f32 %v610_v51, 6.0  ;;  %v1027_v63 = vor.u32 %v1026_v50, %v1023_v44  ;;  %v673_v32 = vmul.f32 %v641_v56, %v523_v28  ;;  %v1349_v44 = vld [vmem:[#allocation2 + $0x80] sm:$0xf0]  ;;  %v1350_v51 = vld [vmem:[#allocation2 + $0x88] sm:$0x1f] }
 0x1d8   : > { %v1034_v10 = vrot.slane %v1032_v58, 4  ;;  %v1281_v0 = vrot.slane %v1207_v53, 4  ;;  %v1486_v2 = vshrl.u32 %v1347_v47, 16  ;;  %v707_v23 = vmul.f32 0.16666667, %v675_v55 }
 0x1d9   : > { %v676_v5 = vmul.f32 %v644_v59, %v534_v35  ;;  %v674_v6 = vmul.f32 %v642_v60, %v526_v61  ;;  %v1489_v30 = vshll.u32 %v1347_v47, 16  ;;  %v705_v9 = vmul.f32 0.16666667, %v673_v32  ;;  %v1688_v60 = vld [vmem:[#allocation2 + $0xa0] sm:$0xf8] }
 0x1da   : > { %v1035_v11 = vor.u32 %v1034_v10, %v1031_v4  ;;  %v1282_v12 = vsel %vm1252_vm0, %v1280_v54, %v1281_v0  ;;  %v1488_v14 = vrot.slane %v1486_v2, 4  ;;  %v1494_v18 = vshrl.u32 %v1348_v1, 16 }
 0x1db   : > { %v708_v16 = vmul.f32 0.16666667, %v676_v5  ;;  %v706_v43 = vmul.f32 0.16666667, %v674_v6  ;;  %v1491_v17 = vrot.slane %v1489_v30, 5  ;;  %v1497_v20 = vshll.u32 %v1348_v1, 16 }
 0x1dc   : > { %v1036_v19 = vsel %vm883_vm1, %v1027_v63, %v1035_v11  ;;  %v1839_v24 = vshrl.u32 %v1686_v8, 16  ;;  %v1842_v25 = vshll.u32 %v1686_v8, 16  ;;  %v1496_v31 = vrot.slane %v1494_v18, 4  ;;  %v1689_v1 = vld [vmem:[#allocation2 + $0xa8] sm:$0xf] }
 0x1dd   : > { %v767_v27 = vpack.c.bf16 %v708_v16, %v707_v23  ;;  %v766_v48 = vpack.c.bf16 %v706_v43, %v705_v9  ;;  %4127 = vmatmul.mubr.bf16.gmra.mrb[32].mxu1 %v1036_v19  ;;  %v1492_v28 = vor.u32 %v1491_v17, %v1488_v14  ;;  %v1499_v35 = vrot.slane %v1497_v20, 5  ;;  %v871_v20 = vld [vmem:[#allocation2 + $0xa0] sm:$0xf8] }
 0x1de   : > { %4134 = vmatprep.mubr.bf16.mxu1 %v1282_v12  ;;  %v1841_v61 = vrot.slane %v1839_v24, 3  ;;  %v1844_v36 = vrot.slane %v1842_v25, 4  ;;  %v1847_v37 = vshrl.u32 %v1687_v15, 16  ;;  %v1850_v13 = vshll.u32 %v1687_v15, 16 }
 0x1df   : > { %v799_v39 = vrot.slane %v767_v27, 4  ;;  %v798_v40 = vrot.slane %v766_v48, 4  ;;  %v1038_v42 = vshrl.u32 %v869_v26, 16  ;;  %v1500_v22 = vor.u32 %v1499_v35, %v1496_v31  ;;  %v872_v35 = vld [vmem:[#allocation2 + $0xa8] sm:$0xf] }
 0x1e0   : > { %v1845_v41 = vor.u32 %v1844_v36, %v1841_v61  ;;  %v1849_v45 = vrot.slane %v1847_v37, 3  ;;  %v1041_v46 = vshll.u32 %v869_v26, 16  ;;  %v1852_v62 = vrot.slane %v1850_v13, 4 }
 0x1e1   : > { %845 = vst [vmem:[#allocation2 + $0xe8] ss:$-4 sps:$4 sm:$0xff] %v799_v39   ;;  %843 = vst [vmem:[#allocation2 + $0xd8] ss:$-4 sps:$4 sm:$0xff] %v798_v40   ;;  %v1040_v47 = vrot.slane %v1038_v42, 3  ;;  %v1046_v3 = vshrl.u32 %v870_v34, 16  ;;  %v1501_v50 = vsel %vm1365_vm2, %v1492_v28, %v1500_v22  ;;  %v547_v19 = vadd.f32 %v6586_v21, %v6540_v33 }
 0x1e2   : > { %v1049_v49 = vshll.u32 %v870_v34, 16  ;;  %v1043_v53 = vrot.slane %v1041_v46, 4  ;;  %v1283_v56 = vrot.slane %v1208_v29, 4  ;;  %v1284_v4 = vrot.slane %v1209_v52, 4  ;;  %4280 = vmatmul.mubr.bf16.gmra.mrb[60].mxu0 %v1501_v50 }
 0x1e3   : > { %v1853_v58 = vor.u32 %v1852_v62, %v1849_v45  ;;  %v1048_v54 = vrot.slane %v1046_v3, 3  ;;  %v1503_v59 = vshrl.u32 %v1349_v44, 16  ;;  %v1506_v10 = vshll.u32 %v1349_v44, 16  ;;  %v1211_v44 = vld [vmem:[#allocation2 + $0xb8] sm:$0xf] }
 0x1e4   : > { %v1051_v55 = vrot.slane %v1049_v49, 4  ;;  %v1044_v63 = vor.u32 %v1043_v53, %v1040_v47  ;;  %v1285_v32 = vsel %vm1252_vm0, %v1283_v56, %v1284_v4  ;;  %v1511_v0 = vshrl.u32 %v1350_v51, 16 }
 0x1e5   : > { %v1854_v2 = vsel %vm883_vm1, %v1845_v41, %v1853_v58  ;;  %v1505_v5 = vrot.slane %v1503_v59, 4  ;;  %v1514_v6 = vshll.u32 %v1350_v51, 16  ;;  %v1508_v30 = vrot.slane %v1506_v10, 5  ;;  %v1351_v41 = vld [vmem:[#allocation2 + $0x90] sm:$0xf0] }
 0x1e6   : > { %v1052_v23 = vor.u32 %v1051_v55, %v1048_v54  ;;  %4287 = vmatprep.mubr.bf16.mxu0 %v1854_v2  ;;  %v1513_v8 = vrot.slane %v1511_v0, 4  ;;  %v1856_v9 = vshrl.u32 %v1688_v60, 16  ;;  %v1859_v11 = vshll.u32 %v1688_v60, 16  ;;  %v1352_v55 = vld [vmem:[#allocation2 + $0x98] sm:$0x1f] }
 0x1e7   : > { %v1516_v14 = vrot.slane %v1514_v6, 5  ;;  %v1864_v15 = vshrl.u32 %v1689_v1, 16  ;;  %v1867_v16 = vshll.u32 %v1689_v1, 16  ;;  %v1509_v43 = vor.u32 %v1508_v30, %v1505_v5  ;;  %v1690_v0 = vld [vmem:[#allocation2 + $0xb0] sm:$0xf8] }
 0x1e8   : > { %v1053_v12 = vsel %vm883_vm1, %v1044_v63, %v1052_v23  ;;  %v1858_v17 = vrot.slane %v1856_v9, 3  ;;  %v1861_v18 = vrot.slane %v1859_v11, 4  ;;  %v539_v27 = vadd.f32 %v6586_v21, %v6545_v38  ;;  %v1210_v38 = vld [vmem:[#allocation2 + $0xb0] sm:$0xf0]  ;;  %v1691_v6 = vld [vmem:[#allocation2 + $0xb8] sm:$0xf] }
 0x1e9   : > { %4135 = vmatmul.mubr.bf16.gmra.mrb[36].mxu1 %v1053_v12  ;;  %v1517_v24 = vor.u32 %v1516_v14, %v1513_v8  ;;  %v1866_v25 = vrot.slane %v1864_v15, 3  ;;  %v1869_v26 = vrot.slane %v1867_v16, 4  ;;  %v583_v28 = vadd.f32 3.0, %v547_v19 }
 0x1ea   : > { %4142 = vmatprep.mubr.bf16.mxu1 %v1285_v32  ;;  %v1862_v48 = vor.u32 %v1861_v18, %v1858_v17  ;;  %v550_v31 = vadd.f32 %v6586_v21, %v6555_v57  ;;  %v542_v34 = vadd.f32 %v6586_v21, %v6559_v7  ;;  %v581_v36 = vadd.f32 3.0, %v539_v27 }
 0x1eb   : > { %v1518_v61 = vsel %vm1365_vm2, %v1509_v43, %v1517_v24  ;;  %v1870_v33 = vor.u32 %v1869_v26, %v1866_v25  ;;  %v1055_v37 = vshrl.u32 %v871_v20, 16  ;;  %v615_v29 = vmax.f32 %v583_v28, 0.0  ;;  %v873_v43 = vld [vmem:[#allocation2 + $0xb0] sm:$0xf8]  ;;  %v874_v24 = vld [vmem:[#allocation2 + $0xb8] sm:$0xf] }
 0x1ec   : > { %4288 = vmatmul.mubr.bf16.gmra.mrb[64].mxu0 %v1518_v61  ;;  %v584_v39 = vadd.f32 3.0, %v550_v31  ;;  %v582_v40 = vadd.f32 3.0, %v542_v34  ;;  %v1058_v13 = vshll.u32 %v871_v20, 16  ;;  %v613_v52 = vmax.f32 %v581_v36, 0.0  ;;  %v1212_v28 = vld [vmem:[#allocation2 + $0xc0] sm:$0xf0] }
 0x1ed   : > { %v1871_v42 = vsel %vm883_vm1, %v1862_v48, %v1870_v33  ;;  %v1057_v22 = vrot.slane %v1055_v37, 3  ;;  %v1063_v57 = vshrl.u32 %v872_v35, 16  ;;  %v647_v7 = vmin.f32 %v615_v29, 6.0  ;;  %v1213_v33 = vld [vmem:[#allocation2 + $0xc8] sm:$0xf] }
 0x1ee   : > { %4295 = vmatprep.mubr.bf16.mxu0 %v1871_v42  ;;  %v616_v21 = vmax.f32 %v584_v39, 0.0  ;;  %v614_v45 = vmax.f32 %v582_v40, 0.0  ;;  %v1060_v46 = vrot.slane %v1058_v13, 4  ;;  %v645_v62 = vmin.f32 %v613_v52, 6.0  ;;  %v1353_v40 = vld [vmem:[#allocation2 + $0xa0] sm:$0xf0] }
 0x1ef   : > { %v1065_v47 = vrot.slane %v1063_v57, 3  ;;  %v1066_v3 = vshll.u32 %v872_v35, 16  ;;  %v1286_v49 = vrot.slane %v1210_v38, 4  ;;  %v679_v51 = vmul.f32 %v647_v7, %v547_v19 }
 0x1f0   : > { %v648_v50 = vmin.f32 %v616_v21, 6.0  ;;  %v646_v53 = vmin.f32 %v614_v45, 6.0  ;;  %v1061_v56 = vor.u32 %v1060_v46, %v1057_v22  ;;  %v677_v4 = vmul.f32 %v645_v62, %v539_v27  ;;  %v1354_v22 = vld [vmem:[#allocation2 + $0xa8] sm:$0x1f] }
 0x1f1   : > { %v1068_v58 = vrot.slane %v1066_v3, 4  ;;  %v1287_v54 = vrot.slane %v1211_v44, 4  ;;  %v1520_v59 = vshrl.u32 %v1351_v41, 16  ;;  %v711_v60 = vmul.f32 0.16666667, %v679_v51  ;;  %v6617_v3 = vpop.f32.mrb[0].mxu1 }
 0x1f2   : > { %v680_v63 = vmul.f32 %v648_v50, %v550_v31  ;;  %v678_v32 = vmul.f32 %v646_v53, %v542_v34  ;;  %v1523_v10 = vshll.u32 %v1351_v41, 16  ;;  %v709_v1 = vmul.f32 0.16666667, %v677_v4 }
 0x1f3   : > { %v1069_v2 = vor.u32 %v1068_v58, %v1065_v47  ;;  %v1288_v23 = vsel %vm1252_vm0, %v1286_v49, %v1287_v54  ;;  %v1522_v5 = vrot.slane %v1520_v59, 4  ;;  %v1528_v11 = vshrl.u32 %v1352_v55, 16  ;;  %v1692_v47 = vld [vmem:[#allocation2 + $0xc0] sm:$0xf8] }
 0x1f4   : > { %v712_v30 = vmul.f32 0.16666667, %v680_v63  ;;  %v710_v8 = vmul.f32 0.16666667, %v678_v32  ;;  %v1525_v9 = vrot.slane %v1523_v10, 5  ;;  %v1531_v14 = vshll.u32 %v1352_v55, 16 }
 0x1f5   : > { %v1070_v12 = vsel %vm883_vm1, %v1061_v56, %v1069_v2  ;;  %v1873_v15 = vshrl.u32 %v1690_v0, 16  ;;  %v1876_v16 = vshll.u32 %v1690_v0, 16  ;;  %v1530_v20 = vrot.slane %v1528_v11, 4  ;;  %v1693_v56 = vld [vmem:[#allocation2 + $0xc8] sm:$0xf] }
 0x1f6   : > { %v769_v17 = vpack.c.bf16 %v712_v30, %v711_v60  ;;  %v768_v18 = vpack.c.bf16 %v710_v8, %v709_v1  ;;  %4143 = vmatmul.mubr.bf16.gmra.mrb[40].mxu1 %v1070_v12  ;;  %v1526_v19 = vor.u32 %v1525_v9, %v1522_v5  ;;  %v1533_v25 = vrot.slane %v1531_v14, 5  ;;  %v875_v59 = vld [vmem:[#allocation2 + $0xc0] sm:$0xf8]  ;;  %v876_v0 = vld [vmem:[#allocation2 + $0xc8] sm:$0xf]  ;;  %v6622_v30 = vpop.f32.mrb[1].mxu1 }
 0x1f7   : > { %4150 = vmatprep.mubr.bf16.mxu1 %v1288_v23  ;;  %v1875_v26 = vrot.slane %v1873_v15, 3  ;;  %v1878_v27 = vrot.slane %v1876_v16, 4  ;;  %v1881_v48 = vshrl.u32 %v1691_v6, 16  ;;  %v1884_v35 = vshll.u32 %v1691_v6, 16  ;;  %v1355_v6 = vld [vmem:[#allocation2 + $0xb0] sm:$0xf0] }
 0x1f8   : > { %v801_v31 = vrot.slane %v769_v17, 4  ;;  %v800_v34 = vrot.slane %v768_v18, 4  ;;  %v1072_v61 = vshrl.u32 %v873_v43, 16  ;;  %v1534_v36 = vor.u32 %v1533_v25, %v1530_v20  ;;  %v1214_v14 = vld [vmem:[#allocation2 + $0xd0] sm:$0xf0] }
 0x1f9   : > { %v1879_v37 = vor.u32 %v1878_v27, %v1875_v26  ;;  %v1883_v29 = vrot.slane %v1881_v48, 3  ;;  %v1075_v39 = vshll.u32 %v873_v43, 16  ;;  %v1886_v13 = vrot.slane %v1884_v35, 4  ;;  %v1215_v18 = vld [vmem:[#allocation2 + $0xd8] sm:$0xf] }
 0x1fa   : > { %849 = vst [vmem:[#allocation2 + $0x108] ss:$-4 sps:$4 sm:$0xff] %v801_v31   ;;  %847 = vst [vmem:[#allocation2 + $0xf8] ss:$-4 sps:$4 sm:$0xff] %v800_v34   ;;  %v1074_v38 = vrot.slane %v1072_v61, 3  ;;  %v1080_v42 = vshrl.u32 %v874_v24, 16  ;;  %v1535_v57 = vsel %vm1365_vm2, %v1526_v19, %v1534_v36 }
 0x1fb   : > { %v1083_v52 = vshll.u32 %v874_v24, 16  ;;  %v1077_v41 = vrot.slane %v1075_v39, 4  ;;  %v1289_v7 = vrot.slane %v1212_v28, 4  ;;  %v1290_v21 = vrot.slane %v1213_v33, 4  ;;  %4296 = vmatmul.mubr.bf16.gmra.mrb[68].mxu0 %v1535_v57  ;;  %v6624_v19 = vpop.f32.mrb[2].mxu1 }
 0x1fc   : > { %v1887_v45 = vor.u32 %v1886_v13, %v1883_v29  ;;  %v1082_v46 = vrot.slane %v1080_v42, 3  ;;  %v1537_v62 = vshrl.u32 %v1353_v40, 16  ;;  %v1540_v50 = vshll.u32 %v1353_v40, 16  ;;  %v1356_v27 = vld [vmem:[#allocation2 + $0xb8] sm:$0x1f]  ;;  %v6626_v48 = vpop.f32.mrb[3].mxu1 }
 0x1fd   : > { %v1085_v44 = vrot.slane %v1083_v52, 4  ;;  %v1078_v49 = vor.u32 %v1077_v41, %v1074_v38  ;;  %v1291_v51 = vsel %vm1252_vm0, %v1289_v7, %v1290_v21  ;;  %v1545_v53 = vshrl.u32 %v1354_v22, 16  ;;  %v1694_v29 = vld [vmem:[#allocation2 + $0xd0] sm:$0xf8]  ;;  %v1695_v42 = vld [vmem:[#allocation2 + $0xd8] sm:$0xf] }
 0x1fe   : > { %v1888_v4 = vsel %vm883_vm1, %v1879_v37, %v1887_v45  ;;  %v1539_v54 = vrot.slane %v1537_v62, 4  ;;  %v1548_v55 = vshll.u32 %v1354_v22, 16  ;;  %v1542_v60 = vrot.slane %v1540_v50, 5  ;;  %v877_v7 = vld [vmem:[#allocation2 + $0xd0] sm:$0xf8] }
 0x1ff   : > { %v1086_v58 = vor.u32 %v1085_v44, %v1082_v46  ;;  %4303 = vmatprep.mubr.bf16.mxu0 %v1888_v4  ;;  %v1547_v63 = vrot.slane %v1545_v53, 4  ;;  %v1890_v32 = vshrl.u32 %v1692_v47, 16  ;;  %v1893_v10 = vshll.u32 %v1692_v47, 16  ;;  %v878_v50 = vld [vmem:[#allocation2 + $0xd8] sm:$0xf] }
 0x200   : > { %v1550_v2 = vrot.slane %v1548_v55, 5  ;;  %v1898_v23 = vshrl.u32 %v1693_v56, 16  ;;  %v1901_v5 = vshll.u32 %v1693_v56, 16  ;;  %v1543_v8 = vor.u32 %v1542_v60, %v1539_v54  ;;  %v1357_v53 = vld [vmem:[#allocation2 + $0xc0] sm:$0xf0] }
 0x201   : > { %v1087_v1 = vsel %vm883_vm1, %v1078_v49, %v1086_v58  ;;  %v1892_v9 = vrot.slane %v1890_v32, 3  ;;  %v1895_v11 = vrot.slane %v1893_v10, 4  ;;  %v1089_v12 = vshrl.u32 %v875_v59, 16  ;;  %v1216_v55 = vld [vmem:[#allocation2 + $0xe0] sm:$0xf0] }
 0x202   : > { %4151 = vmatmul.mubr.bf16.gmra.mrb[44].mxu1 %v1087_v1  ;;  %v1551_v15 = vor.u32 %v1550_v2, %v1547_v63  ;;  %v1900_v16 = vrot.slane %v1898_v23, 3  ;;  %v1903_v43 = vrot.slane %v1901_v5, 4  ;;  %v1092_v17 = vshll.u32 %v875_v59, 16  ;;  %v1217_v10 = vld [vmem:[#allocation2 + $0xe8] sm:$0xf] }
 0x203   : > { %4158 = vmatprep.mubr.bf16.mxu1 %v1291_v51  ;;  %v1896_v20 = vor.u32 %v1895_v11, %v1892_v9  ;;  %v1091_v24 = vrot.slane %v1089_v12, 3  ;;  %v1097_v25 = vshrl.u32 %v876_v0, 16  ;;  %v1100_v26 = vshll.u32 %v876_v0, 16  ;;  %v1358_v5 = vld [vmem:[#allocation2 + $0xc8] sm:$0x1f] }
 0x204   : > { %v1552_v28 = vsel %vm1365_vm2, %v1543_v8, %v1551_v15  ;;  %v1904_v31 = vor.u32 %v1903_v43, %v1900_v16  ;;  %v1094_v34 = vrot.slane %v1092_v17, 4  ;;  %v1292_v35 = vrot.slane %v1214_v14, 4  ;;  %v1696_v43 = vld [vmem:[#allocation2 + $0xe0] sm:$0xf8] }
 0x205   : > { %4304 = vmatmul.mubr.bf16.gmra.mrb[72].mxu0 %v1552_v28  ;;  %v1099_v61 = vrot.slane %v1097_v25, 3  ;;  %v1102_v33 = vrot.slane %v1100_v26, 4  ;;  %v1293_v36 = vrot.slane %v1215_v18, 4  ;;  %v1554_v37 = vshrl.u32 %v1355_v6, 16  ;;  %v1697_v25 = vld [vmem:[#allocation2 + $0xe8] sm:$0xf] }
 0x206   : > { %v1905_v39 = vsel %vm883_vm1, %v1896_v20, %v1904_v31  ;;  %v1095_v40 = vor.u32 %v1094_v34, %v1091_v24  ;;  %v1557_v13 = vshll.u32 %v1355_v6, 16  ;;  %v1562_v38 = vshrl.u32 %v1356_v27, 16  ;;  %v879_v34 = vld [vmem:[#allocation2 + $0xe0] sm:$0xf8] }
 0x207   : > { %4311 = vmatprep.mubr.bf16.mxu0 %v1905_v39  ;;  %v1103_v52 = vor.u32 %v1102_v33, %v1099_v61  ;;  %v1294_v22 = vsel %vm1252_vm0, %v1292_v35, %v1293_v36  ;;  %v1556_v57 = vrot.slane %v1554_v37, 4  ;;  %v1565_v41 = vshll.u32 %v1356_v27, 16  ;;  %v880_v37 = vld [vmem:[#allocation2 + $0xe8] sm:$0xf] }
 0x208   : > { %v1559_v21 = vrot.slane %v1557_v13, 5  ;;  %v1564_v45 = vrot.slane %v1562_v38, 4  ;;  %v1907_v46 = vshrl.u32 %v1694_v29, 16  ;;  %v1910_v44 = vshll.u32 %v1694_v29, 16  ;;  %v1359_v38 = vld [vmem:[#allocation2 + $0xd0] sm:$0xf0] }
 0x209   : > { %v1104_v62 = vsel %vm883_vm1, %v1095_v40, %v1103_v52  ;;  %v1567_v47 = vrot.slane %v1565_v41, 5  ;;  %v1915_v49 = vshrl.u32 %v1695_v42, 16  ;;  %v1918_v51 = vshll.u32 %v1695_v42, 16  ;;  %v1218_v41 = vld [vmem:[#allocation2 + $0xf0] sm:$0xf0] }
 0x20a   : > { %4159 = vmatmul.mubr.bf16.gmra.mrb[48].mxu1 %v1104_v62  ;;  %v1560_v56 = vor.u32 %v1559_v21, %v1556_v57  ;;  %v1909_v4 = vrot.slane %v1907_v46, 3  ;;  %v1912_v58 = vrot.slane %v1910_v44, 4  ;;  %v1106_v54 = vshrl.u32 %v877_v7, 16  ;;  %v1219_v44 = vld [vmem:[#allocation2 + $0xf8] sm:$0xf] }
 0x20b   : > { %4166 = vmatprep.mubr.bf16.mxu1 %v1294_v22  ;;  %v1568_v59 = vor.u32 %v1567_v47, %v1564_v45  ;;  %v1917_v60 = vrot.slane %v1915_v49, 3  ;;  %v1920_v63 = vrot.slane %v1918_v51, 4  ;;  %v1109_v32 = vshll.u32 %v877_v7, 16 }
 0x20c   : > { %v1913_v0 = vor.u32 %v1912_v58, %v1909_v4  ;;  %v1108_v1 = vrot.slane %v1106_v54, 3  ;;  %v1114_v2 = vshrl.u32 %v878_v50, 16  ;;  %v1117_v23 = vshll.u32 %v878_v50, 16  ;;  %v1360_v50 = vld [vmem:[#allocation2 + $0xd8] sm:$0x1f] }
 0x20d   : > { %v1569_v6 = vsel %vm1365_vm2, %v1560_v56, %v1568_v59  ;;  %v1921_v8 = vor.u32 %v1920_v63, %v1917_v60  ;;  %v1111_v9 = vrot.slane %v1109_v32, 4  ;;  %v1295_v11 = vrot.slane %v1216_v55, 4  ;;  %v1698_v63 = vld [vmem:[#allocation2 + $0xf0] sm:$0xf8] }
 0x20e   : > { %4312 = vmatmul.mubr.bf16.gmra.mrb[76].mxu0 %v1569_v6  ;;  %v1116_v12 = vrot.slane %v1114_v2, 3  ;;  %v1119_v14 = vrot.slane %v1117_v23, 4  ;;  %v1296_v15 = vrot.slane %v1217_v10, 4  ;;  %v1571_v16 = vshrl.u32 %v1357_v53, 16  ;;  %v1699_v2 = vld [vmem:[#allocation2 + $0xf8] sm:$0xf] }
 0x20f   : > { %v1922_v17 = vsel %vm883_vm1, %v1913_v0, %v1921_v8  ;;  %v1112_v18 = vor.u32 %v1111_v9, %v1108_v1  ;;  %v1574_v20 = vshll.u32 %v1357_v53, 16  ;;  %v1579_v24 = vshrl.u32 %v1358_v5, 16  ;;  %v881_v9 = vld [vmem:[#allocation2 + $0xf0] sm:$0xf8] }
 0x210   : > { %4319 = vmatprep.mubr.bf16.mxu0 %v1922_v17  ;;  %v1120_v26 = vor.u32 %v1119_v14, %v1116_v12  ;;  %v1297_v27 = vsel %vm1252_vm0, %v1295_v11, %v1296_v15  ;;  %v1573_v28 = vrot.slane %v1571_v16, 4  ;;  %v1582_v31 = vshll.u32 %v1358_v5, 16 }
 0x211   : > { %v1576_v35 = vrot.slane %v1574_v20, 5  ;;  %v1581_v61 = vrot.slane %v1579_v24, 4  ;;  %v1924_v33 = vshrl.u32 %v1696_v43, 16  ;;  %v1927_v36 = vshll.u32 %v1696_v43, 16  ;;  %v882_v20 = vld [vmem:[#allocation2 + $0xf8] sm:$0xf] }
 0x212   : > { %v1121_v29 = vsel %vm883_vm1, %v1112_v18, %v1120_v26  ;;  %v1584_v39 = vrot.slane %v1582_v31, 5  ;;  %v1932_v40 = vshrl.u32 %v1697_v25, 16  ;;  %v1935_v13 = vshll.u32 %v1697_v25, 16 }
 0x213   : > { %4167 = vmatmul.mubr.bf16.gmra.mrb[52].mxu1 %v1121_v29  ;;  %v1577_v42 = vor.u32 %v1576_v35, %v1573_v28  ;;  %v1926_v52 = vrot.slane %v1924_v33, 3  ;;  %v1929_v22 = vrot.slane %v1927_v36, 4  ;;  %v1123_v57 = vshrl.u32 %v879_v34, 16  ;;  %v1361_v28 = vld [vmem:[#allocation2 + $0xe0] sm:$0xf0] }
 0x214   : > { %4174 = vmatprep.mubr.bf16.mxu1 %v1297_v27  ;;  %v1585_v7 = vor.u32 %v1584_v39, %v1581_v61  ;;  %v1934_v21 = vrot.slane %v1932_v40, 3  ;;  %v1937_v45 = vrot.slane %v1935_v13, 4  ;;  %v1126_v46 = vshll.u32 %v879_v34, 16  ;;  %v1362_v33 = vld [vmem:[#allocation2 + $0xe8] sm:$0x1f] }
 0x215   : > { %v1930_v62 = vor.u32 %v1929_v22, %v1926_v52  ;;  %v1125_v47 = vrot.slane %v1123_v57, 3  ;;  %v1131_v49 = vshrl.u32 %v880_v37, 16  ;;  %v1134_v51 = vshll.u32 %v880_v37, 16  ;;  %v2150_v52 = vld [vmem:[#allocation2 + $0x10] sm:$0xf0] }
 0x216   : > { %v1586_v53 = vsel %vm1365_vm2, %v1577_v42, %v1585_v7  ;;  %v1938_v56 = vor.u32 %v1937_v45, %v1934_v21  ;;  %v1128_v4 = vrot.slane %v1126_v46, 4  ;;  %v1298_v58 = vrot.slane %v1218_v41, 4  ;;  %v2151_v21 = vld [vmem:[#allocation2 + $0x18] sm:$0x1f] }
 0x217   : > { %4320 = vmatmul.mubr.bf16.gmra.mrb[80].mxu0 %v1586_v53  ;;  %v1133_v54 = vrot.slane %v1131_v49, 3  ;;  %v1136_v55 = vrot.slane %v1134_v51, 4  ;;  %v1299_v59 = vrot.slane %v1219_v44, 4  ;;  %v1588_v60 = vshrl.u32 %v1359_v38, 16 }
 0x218   : > { %v1939_v32 = vsel %vm883_vm1, %v1930_v62, %v1938_v56  ;;  %v1129_v10 = vor.u32 %v1128_v4, %v1125_v47  ;;  %v1591_v0 = vshll.u32 %v1359_v38, 16  ;;  %v1596_v1 = vshrl.u32 %v1360_v50, 16  ;;  %v1700_v47 = vld [vmem:[#allocation2 + $0x100] sm:$0xf8] }
 0x219   : > { %4327 = vmatprep.mubr.bf16.mxu0 %v1939_v32  ;;  %v1137_v23 = vor.u32 %v1136_v55, %v1133_v54  ;;  %v1300_v5 = vsel %vm1252_vm0, %v1298_v58, %v1299_v59  ;;  %v1590_v6 = vrot.slane %v1588_v60, 4  ;;  %v1599_v8 = vshll.u32 %v1360_v50, 16  ;;  %v1701_v55 = vld [vmem:[#allocation2 + $0x108] sm:$0xf] }
 0x21a   : > { %v1593_v11 = vrot.slane %v1591_v0, 5  ;;  %v1598_v12 = vrot.slane %v1596_v1, 4  ;;  %v1941_v14 = vshrl.u32 %v1698_v63, 16  ;;  %v1944_v15 = vshll.u32 %v1698_v63, 16  ;;  %v2007_v0 = vld [vmem:[#allocation2 + $0x18] sm:$0xf] }
 0x21b   : > { %v1138_v16 = vsel %vm883_vm1, %v1129_v10, %v1137_v23  ;;  %v1601_v43 = vrot.slane %v1599_v8, 5  ;;  %v1949_v17 = vshrl.u32 %v1699_v2, 16  ;;  %v1952_v18 = vshll.u32 %v1699_v2, 16  ;;  %v2006_v10 = vld [vmem:[#allocation2 + $0x10] sm:$0xf0] }
 0x21c   : > { %4175 = vmatmul.mubr.bf16.gmra.mrb[56].mxu1 %v1138_v16  ;;  %v1594_v24 = vor.u32 %v1593_v11, %v1590_v6  ;;  %v1943_v25 = vrot.slane %v1941_v14, 3  ;;  %v1946_v26 = vrot.slane %v1944_v15, 4  ;;  %v1140_v27 = vshrl.u32 %v881_v9, 16  ;;  %v1363_v6 = vld [vmem:[#allocation2 + $0xf0] sm:$0xf0] }
 0x21d   : > { %4182 = vmatprep.mubr.bf16.mxu1 %v1300_v5  ;;  %v1602_v31 = vor.u32 %v1601_v43, %v1598_v12  ;;  %v1951_v34 = vrot.slane %v1949_v17, 3  ;;  %v1954_v35 = vrot.slane %v1952_v18, 4  ;;  %v1143_v61 = vshll.u32 %v881_v9, 16  ;;  %v1364_v14 = vld [vmem:[#allocation2 + $0xf8] sm:$0x1f] }
 0x21e   : > { %v1947_v36 = vor.u32 %v1946_v26, %v1943_v25  ;;  %v1142_v37 = vrot.slane %v1140_v27, 3  ;;  %v1148_v29 = vshrl.u32 %v882_v20, 16  ;;  %v1151_v39 = vshll.u32 %v882_v20, 16  ;;  %v2152_v18 = vld [vmem:[#allocation2 + $0x20] sm:$0xf0] }
 0x21f   : > { %v1603_v40 = vsel %vm1365_vm2, %v1594_v24, %v1602_v31  ;;  %v1955_v13 = vor.u32 %v1954_v35, %v1951_v34  ;;  %v1145_v38 = vrot.slane %v1143_v61, 4  ;;  %v1605_v42 = vshrl.u32 %v1361_v28, 16  ;;  %v2153_v27 = vld [vmem:[#allocation2 + $0x28] sm:$0x1f]  ;;  %v2823_v61 = vld [vmem:[#allocation2 + $0x20] sm:$0xf0] }
 0x220   : > { %4328 = vmatmul.mubr.bf16.gmra.mrb[84].mxu0 %v1603_v40  ;;  %v1150_v22 = vrot.slane %v1148_v29, 3  ;;  %v1153_v57 = vrot.slane %v1151_v39, 4  ;;  %v1608_v41 = vshll.u32 %v1361_v28, 16  ;;  %v1613_v7 = vshrl.u32 %v1362_v33, 16  ;;  %v2824_v39 = vld [vmem:[#allocation2 + $0x28] sm:$0xf] }
 0x221   : > { %v1956_v45 = vsel %vm883_vm1, %v1947_v36, %v1955_v13  ;;  %v1146_v46 = vor.u32 %v1145_v38, %v1142_v37  ;;  %v1607_v44 = vrot.slane %v1605_v42, 4  ;;  %v1616_v62 = vshll.u32 %v1362_v33, 16  ;;  %v2008_v40 = vld [vmem:[#allocation2 + $0x20] sm:$0xf0]  ;;  %v6006_v13 = vld [vmem:[#allocation9 + $0x208] sm:$0xff]  }
 0x222   : > { %4335 = vmatprep.mubr.bf16.mxu0 %v1956_v45  ;;  %v1154_v49 = vor.u32 %v1153_v57, %v1150_v22  ;;  %v1610_v51 = vrot.slane %v1608_v41, 5  ;;  %v1615_v50 = vrot.slane %v1613_v7, 4  ;;  %v2183_v53 = vshrl.u32 %v2150_v52, 16  ;;  %v2009_v57 = vld [vmem:[#allocation2 + $0x28] sm:$0xf] }
 0x223   : > { %v1618_v56 = vrot.slane %v1616_v62, 5  ;;  %v2186_v4 = vshll.u32 %v2150_v52, 16  ;;  %v2191_v58 = vshrl.u32 %v2151_v21, 16  ;;  %v2194_v54 = vshll.u32 %v2151_v21, 16 }
 0x224   : > { %v1155_v59 = vsel %vm883_vm1, %v1146_v46, %v1154_v49  ;;  %v1611_v60 = vor.u32 %v1610_v51, %v1607_v44  ;;  %v2185_v63 = vrot.slane %v2183_v53, 4  ;;  %v1958_v32 = vshrl.u32 %v1700_v47, 16  ;;  %v2154_v46 = vld [vmem:[#allocation2 + $0x30] sm:$0xf0]  ;;  %v2155_v51 = vld [vmem:[#allocation2 + $0x38] sm:$0x1f] }
 0x225   : > { %4183 = vmatmul.mubr.bf16.gmra.mrb[60].mxu1 %v1155_v59  ;;  %v1619_v1 = vor.u32 %v1618_v56, %v1615_v50  ;;  %v2188_v2 = vrot.slane %v2186_v4, 5  ;;  %v2193_v23 = vrot.slane %v2191_v58, 4  ;;  %v2196_v5 = vrot.slane %v2194_v54, 5  ;;  %v6014_v50 = vld [vmem:[#allocation9 + $0x200] sm:$0xff]  }
 0x226   : > { %v1960_v8 = vrot.slane %v1958_v32, 3  ;;  %v1961_v9 = vshll.u32 %v1700_v47, 16  ;;  %v1966_v11 = vshrl.u32 %v1701_v55, 16  ;;  %v1969_v12 = vshll.u32 %v1701_v55, 16  ;;  %v2487_v54 = vld [vmem:[#allocation2 + $0x20] sm:$0xf8] }
 0x227   : > { %v1620_v15 = vsel %vm1365_vm2, %v1611_v60, %v1619_v1  ;;  %v2189_v16 = vor.u32 %v2188_v2, %v2185_v63  ;;  %v2197_v43 = vor.u32 %v2196_v5, %v2193_v23  ;;  %v2070_v17 = vrot.slane %v2006_v10, 4  ;;  %v6007_v32 = vld [vmem:[#allocation9 + $0x210] sm:$0xff]   ;;  %v2488_v23 = vld [vmem:[#allocation2 + $0x28] sm:$0xf] }
 0x228   : > { %4336 = vmatmul.mubr.bf16.gmra.mrb[88].mxu0 %v1620_v15  ;;  %v1963_v20 = vrot.slane %v1961_v9, 4  ;;  %v1968_v24 = vrot.slane %v1966_v11, 3  ;;  %v1971_v25 = vrot.slane %v1969_v12, 4  ;;  %v2071_v26 = vrot.slane %v2007_v0, 4  ;;  %v2825_v11 = vld [vmem:[#allocation2 + $0x30] sm:$0xf0] }
 0x229   : > { %v2198_v28 = vsel %vm1365_vm2, %v2189_v16, %v2197_v43  ;;  %v1622_v31 = vshrl.u32 %v1363_v6, 16  ;;  %v1625_v34 = vshll.u32 %v1363_v6, 16  ;;  %v1630_v35 = vshrl.u32 %v1364_v14, 16  ;;  %v2826_v12 = vld [vmem:[#allocation2 + $0x38] sm:$0xf] }
 0x22a   : > { %4384 = vmatprep.mubr.bf16.mxu1 %v2198_v28  ;;  %v1964_v33 = vor.u32 %v1963_v20, %v1960_v8  ;;  %v1972_v36 = vor.u32 %v1971_v25, %v1968_v24  ;;  %v2072_v37 = vsel %vm1252_vm0, %v2070_v17, %v2071_v26  ;;  %v1633_v29 = vshll.u32 %v1364_v14, 16  ;;  %v2010_v17 = vld [vmem:[#allocation2 + $0x30] sm:$0xf0]  ;;  %v2011_v26 = vld [vmem:[#allocation2 + $0x38] sm:$0xf] }
 0x22b   : > { %v1624_v38 = vrot.slane %v1622_v31, 4  ;;  %v1627_v42 = vrot.slane %v1625_v34, 5  ;;  %v1632_v52 = vrot.slane %v1630_v35, 4  ;;  %v2200_v22 = vshrl.u32 %v2152_v18, 16 }
 0x22c   : > { %v1973_v41 = vsel %vm883_vm1, %v1964_v33, %v1972_v36  ;;  %v1635_v7 = vrot.slane %v1633_v29, 5  ;;  %v2203_v21 = vshll.u32 %v2152_v18, 16  ;;  %v2208_v45 = vshrl.u32 %v2153_v27, 16 }
 0x22d   : > { %4343 = vmatprep.mubr.bf16.mxu0 %v1973_v41  ;;  %4385 = vmatmul.mubr.bf16.vlgmr.msra.gmra.mrb[64].mxu1 %v2072_v37  ;;  %v1628_v44 = vor.u32 %v1627_v42, %v1624_v38  ;;  %v2202_v62 = vrot.slane %v2200_v22, 4  ;;  %v2211_v47 = vshll.u32 %v2153_v27, 16  ;;  %v2887_v49 = vrot.slane %v2823_v61, 4  ;;  %v6008_v27 = vld [vmem:[#allocation9 + $0x218] sm:$0xff]   ;;  %v2156_v61 = vld [vmem:[#allocation2 + $0x40] sm:$0xf0] }
 0x22e   : > { %5812 = vmatpush3.bf16.msra.mxu1 %v6014_v50  ;;  %v1636_v53 = vor.u32 %v1635_v7, %v1632_v52  ;;  %v2205_v56 = vrot.slane %v2203_v21, 5  ;;  %v2210_v4 = vrot.slane %v2208_v45, 4  ;;  %v2888_v58 = vrot.slane %v2824_v39, 4  ;;  %v2157_v39 = vld [vmem:[#allocation2 + $0x48] sm:$0x1f] }
 0x22f   : > { %v2213_v55 = vrot.slane %v2211_v47, 5  ;;  %v2073_v59 = vrot.slane %v2008_v40, 4  ;;  %v2074_v60 = vrot.slane %v2009_v57, 4  ;;  %v2217_v63 = vshrl.u32 %v2154_v46, 16  ;;  %5813 = vmatprep.subr.bf16.mxu1 %v6006_v13  ;;  %v2489_v52 = vld [vmem:[#allocation2 + $0x30] sm:$0xf8] }
 0x230   : > { %v1637_v10 = vsel %vm1365_vm2, %v1628_v44, %v1636_v53  ;;  %v2206_v0 = vor.u32 %v2205_v56, %v2202_v62  ;;  %v2889_v1 = vsel %vm1252_vm0, %v2887_v49, %v2888_v58  ;;  %v2220_v2 = vshll.u32 %v2154_v46, 16  ;;  %v2490_v22 = vld [vmem:[#allocation2 + $0x38] sm:$0xf]  ;;  %v2827_v45 = vld [vmem:[#allocation2 + $0x40] sm:$0xf0] }
 0x231   : > { %4344 = vmatmul.mubr.bf16.gmra.mrb[92].mxu0 %v1637_v10  ;;  %v2214_v5 = vor.u32 %v2213_v55, %v2210_v4  ;;  %v2075_v6 = vsel %vm1252_vm0, %v2073_v59, %v2074_v60  ;;  %v2219_v8 = vrot.slane %v2217_v63, 4  ;;  %v2225_v9 = vshrl.u32 %v2155_v51, 16  ;;  %v6009_v46 = vld [vmem:[#allocation9 + $0x220] sm:$0xff]  }
 0x232   : > { %4545 = vmatprep.mubr.bf16.mxu0 %v2889_v1  ;;  %v2222_v14 = vrot.slane %v2220_v2, 5  ;;  %v2228_v15 = vshll.u32 %v2155_v51, 16  ;;  %v2520_v16 = vshrl.u32 %v2487_v54, 16  ;;  %v2523_v43 = vshll.u32 %v2487_v54, 16  ;;  %5814 = vmatpush3.bf16.msra.mxu1 %v6006_v13  ;;  %v2828_v51 = vld [vmem:[#allocation2 + $0x48] sm:$0xf] }
 0x233   : > { %v2215_v18 = vsel %vm1365_vm2, %v2206_v0, %v2214_v5  ;;  %v2227_v20 = vrot.slane %v2225_v9, 4  ;;  %v2528_v24 = vshrl.u32 %v2488_v23, 16  ;;  %v2531_v25 = vshll.u32 %v2488_v23, 16  ;;  %5815 = vmatprep.subr.bf16.mxu1 %v6007_v32  ;;  %v2012_v50 = vld [vmem:[#allocation2 + $0x40] sm:$0xf0]  ;;  %v6010_v5 = vld [vmem:[#allocation9 + $0x228] sm:$0xff]  }
 0x234   : > { %4392 = vmatprep.mubr.bf16.mxu1 %v2215_v18  ;;  %v2223_v28 = vor.u32 %v2222_v14, %v2219_v8  ;;  %v2230_v31 = vrot.slane %v2228_v15, 5  ;;  %v2522_v34 = vrot.slane %v2520_v16, 3  ;;  %v2525_v35 = vrot.slane %v2523_v43, 4  ;;  %v2013_v54 = vld [vmem:[#allocation2 + $0x48] sm:$0xf] }
 0x235   : > { %4393 = vmatmul.mubr.bf16.gmra.mrb[68].mxu1 %v2075_v6  ;;  %v2530_v33 = vrot.slane %v2528_v24, 3  ;;  %v2533_v36 = vrot.slane %v2531_v25, 4  ;;  %v2890_v37 = vrot.slane %v2825_v11, 4  ;;  %v2891_v29 = vrot.slane %v2826_v12, 4  ;;  %v2159_v23 = vld [vmem:[#allocation2 + $0x58] sm:$0x1f] }
 0x236   : > { %v2231_v40 = vor.u32 %v2230_v31, %v2227_v20  ;;  %v2526_v13 = vor.u32 %v2525_v35, %v2522_v34  ;;  %v2076_v38 = vrot.slane %v2010_v17, 4  ;;  %v2077_v42 = vrot.slane %v2011_v26, 4  ;;  %5816 = vmatpush3.bf16.msra.mxu1 %v6007_v32  ;;  %v2158_v32 = vld [vmem:[#allocation2 + $0x50] sm:$0xf0]  ;;  %v2491_v12 = vld [vmem:[#allocation2 + $0x40] sm:$0xf8] }
 0x237   : > { %v2534_v57 = vor.u32 %v2533_v36, %v2530_v33  ;;  %v2892_v41 = vsel %vm1252_vm0, %v2890_v37, %v2891_v29  ;;  %v2234_v7 = vshrl.u32 %v2156_v61, 16  ;;  %v2237_v21 = vshll.u32 %v2156_v61, 16  ;;  %5817 = vmatprep.subr.bf16.mxu1 %v6008_v27  ;;  %v2492_v17 = vld [vmem:[#allocation2 + $0x48] sm:$0xf]  ;;  %v2829_v26 = vld [vmem:[#allocation2 + $0x50] sm:$0xf0] }
 0x238   : > { %v2232_v44 = vsel %vm1365_vm2, %v2223_v28, %v2231_v40  ;;  %v2078_v62 = vsel %vm1252_vm0, %v2076_v38, %v2077_v42  ;;  %v2242_v47 = vshrl.u32 %v2157_v39, 16  ;;  %v2245_v49 = vshll.u32 %v2157_v39, 16  ;;  %v2014_v61 = vld [vmem:[#allocation2 + $0x50] sm:$0xf0]  ;;  %v2015_v40 = vld [vmem:[#allocation2 + $0x58] sm:$0xf] }
 0x239   : > { %4400 = vmatprep.mubr.bf16.mxu1 %v2232_v44  ;;  %v2535_v53 = vsel %vm883_vm1, %v2526_v13, %v2534_v57  ;;  %v2236_v56 = vrot.slane %v2234_v7, 4  ;;  %v2239_v4 = vrot.slane %v2237_v21, 5  ;;  %v2537_v58 = vshrl.u32 %v2489_v52, 16  ;;  %v6011_v33 = vld [vmem:[#allocation9 + $0x230] sm:$0xff]  }
 0x23a   : > { %4546 = vmatmul.mubr.bf16.vlgmr.msra.gmra.mrb[96].mxu0 %v2535_v53  ;;  %v2244_v55 = vrot.slane %v2242_v47, 4  ;;  %v2247_v59 = vrot.slane %v2245_v49, 5  ;;  %v2540_v60 = vshll.u32 %v2489_v52, 16  ;;  %v2545_v63 = vshrl.u32 %v2490_v22, 16  ;;  %5818 = vmatpush3.bf16.msra.mxu1 %v6008_v27  ;;  %v2830_v27 = vld [vmem:[#allocation2 + $0x58] sm:$0xf] }
 0x23b   : > { %4553 = vmatprep.mubr.bf16.mxu0 %v2892_v41  ;;  %v2240_v10 = vor.u32 %v2239_v4, %v2236_v56  ;;  %v2539_v0 = vrot.slane %v2537_v58, 3  ;;  %v2548_v1 = vshll.u32 %v2490_v22, 16  ;;  %v2893_v2 = vrot.slane %v2827_v45, 4  ;;  %5819 = vmatprep.subr.bf16.mxu1 %v6009_v46  ;;  %v2160_v22 = vld [vmem:[#allocation2 + $0x60] sm:$0xf0]  ;;  %v6012_v49 = vld [vmem:[#allocation9 + $0x238] sm:$0xff]  }
 0x23c   : > { %v2248_v6 = vor.u32 %v2247_v59, %v2244_v55  ;;  %v2542_v8 = vrot.slane %v2540_v60, 4  ;;  %v2547_v9 = vrot.slane %v2545_v63, 3  ;;  %v2894_v11 = vrot.slane %v2828_v51, 4  ;;  %v2161_v45 = vld [vmem:[#allocation2 + $0x68] sm:$0x1f] }
 0x23d   : > { %4401 = vmatmul.mubr.bf16.gmra.mrb[72].mxu1 %v2078_v62  ;;  %v2550_v14 = vrot.slane %v2548_v1, 4  ;;  %v2079_v15 = vrot.slane %v2012_v50, 4  ;;  %v2080_v16 = vrot.slane %v2013_v54, 4  ;;  %v2251_v43 = vshrl.u32 %v2158_v32, 16  ;;  %v2493_v4 = vld [vmem:[#allocation2 + $0x50] sm:$0xf8] }
 0x23e   : > { %v2249_v18 = vsel %vm1365_vm2, %v2240_v10, %v2248_v6  ;;  %v2543_v20 = vor.u32 %v2542_v8, %v2539_v0  ;;  %v2895_v24 = vsel %vm1252_vm0, %v2893_v2, %v2894_v11  ;;  %v2254_v25 = vshll.u32 %v2158_v32, 16  ;;  %5820 = vmatpush3.bf16.msra.mxu1 %v6009_v46  ;;  %v2494_v60 = vld [vmem:[#allocation2 + $0x58] sm:$0xf]  ;;  %v2831_v63 = vld [vmem:[#allocation2 + $0x60] sm:$0xf0] }
 0x23f   : > { %4408 = vmatprep.mubr.bf16.mxu1 %v2249_v18  ;;  %v2551_v28 = vor.u32 %v2550_v14, %v2547_v9  ;;  %v2081_v31 = vsel %vm1252_vm0, %v2079_v15, %v2080_v16  ;;  %v2253_v34 = vrot.slane %v2251_v43, 4  ;;  %v2259_v35 = vshrl.u32 %v2159_v23, 16  ;;  %5821 = vmatprep.subr.bf16.mxu1 %v6010_v5  ;;  %v2832_v2 = vld [vmem:[#allocation2 + $0x68] sm:$0xf]  ;;  %v2162_v43 = vld [vmem:[#allocation2 + $0x70] sm:$0xf0] }
 0x240   : > { %v2256_v36 = vrot.slane %v2254_v25, 5  ;;  %v2262_v37 = vshll.u32 %v2159_v23, 16  ;;  %v2554_v29 = vshrl.u32 %v2491_v12, 16  ;;  %v2557_v39 = vshll.u32 %v2491_v12, 16  ;;  %v2016_v23 = vld [vmem:[#allocation2 + $0x60] sm:$0xf0] }
 0x241   : > { %v2552_v13 = vsel %vm883_vm1, %v2543_v20, %v2551_v28  ;;  %v2261_v38 = vrot.slane %v2259_v35, 4  ;;  %v2562_v42 = vshrl.u32 %v2492_v17, 16  ;;  %v2565_v52 = vshll.u32 %v2492_v17, 16  ;;  %v2017_v11 = vld [vmem:[#allocation2 + $0x68] sm:$0xf] }
 0x242   : > { %4554 = vmatmul.mubr.bf16.gmra.mrb[100].mxu0 %v2552_v13  ;;  %v2257_v57 = vor.u32 %v2256_v36, %v2253_v34  ;;  %v2264_v41 = vrot.slane %v2262_v37, 5  ;;  %v2556_v7 = vrot.slane %v2554_v29, 3  ;;  %v2559_v21 = vrot.slane %v2557_v39, 4  ;;  %5822 = vmatpush3.bf16.msra.mxu1 %v6010_v5  ;;  %v2495_v36 = vld [vmem:[#allocation2 + $0x60] sm:$0xf8] }
 0x243   : > { %4561 = vmatprep.mubr.bf16.mxu0 %v2895_v24  ;;  %v2564_v46 = vrot.slane %v2562_v42, 3  ;;  %v2567_v44 = vrot.slane %v2565_v52, 4  ;;  %v2896_v62 = vrot.slane %v2829_v26, 4  ;;  %v2897_v47 = vrot.slane %v2830_v27, 4  ;;  %5823 = vmatprep.subr.bf16.mxu1 %v6011_v33  ;;  %v2496_v13 = vld [vmem:[#allocation2 + $0x68] sm:$0xf] }
 0x244   : > { %v2265_v51 = vor.u32 %v2264_v41, %v2261_v38  ;;  %v2560_v50 = vor.u32 %v2559_v21, %v2556_v7  ;;  %v2082_v53 = vrot.slane %v2014_v61, 4  ;;  %v2083_v56 = vrot.slane %v2015_v40, 4  ;;  %v2834_v41 = vld [vmem:[#allocation2 + $0x78] sm:$0xf] }
 0x245   : > { %4409 = vmatmul.mubr.bf16.gmra.mrb[76].mxu1 %v2081_v31  ;;  %v2568_v58 = vor.u32 %v2567_v44, %v2564_v46  ;;  %v2898_v54 = vsel %vm1252_vm0, %v2896_v62, %v2897_v47  ;;  %v2268_v55 = vshrl.u32 %v2160_v22, 16  ;;  %v2271_v59 = vshll.u32 %v2160_v22, 16  ;;  %v2163_v31 = vld [vmem:[#allocation2 + $0x78] sm:$0x1f]  ;;  %v2018_v44 = vld [vmem:[#allocation2 + $0x70] sm:$0xf0] }
 0x246   : > { %v2266_v32 = vsel %vm1365_vm2, %v2257_v57, %v2265_v51  ;;  %v2084_v10 = vsel %vm1252_vm0, %v2082_v53, %v2083_v56  ;;  %v2276_v0 = vshrl.u32 %v2161_v45, 16  ;;  %v2279_v1 = vshll.u32 %v2161_v45, 16  ;;  %5824 = vmatpush3.bf16.msra.mxu1 %v6011_v33  ;;  %v2833_v57 = vld [vmem:[#allocation2 + $0x70] sm:$0xf0] }
 0x247   : > { %4416 = vmatprep.mubr.bf16.mxu1 %v2266_v32  ;;  %v2569_v5 = vsel %vm883_vm1, %v2560_v50, %v2568_v58  ;;  %v2270_v6 = vrot.slane %v2268_v55, 4  ;;  %v2273_v8 = vrot.slane %v2271_v59, 5  ;;  %v2571_v9 = vshrl.u32 %v2493_v4, 16  ;;  %5825 = vmatprep.subr.bf16.mxu1 %v6012_v49  ;;  %v2019_v50 = vld [vmem:[#allocation2 + $0x78] sm:$0xf] }
 0x248   : > { %v2278_v12 = vrot.slane %v2276_v0, 4  ;;  %v2281_v14 = vrot.slane %v2279_v1, 5  ;;  %v2574_v15 = vshll.u32 %v2493_v4, 16  ;;  %v2579_v16 = vshrl.u32 %v2494_v60, 16  ;;  %v2165_v32 = vld [vmem:[#allocation2 + $0x88] sm:$0x1f] }
 0x249   : > { %v2274_v17 = vor.u32 %v2273_v8, %v2270_v6  ;;  %v2573_v18 = vrot.slane %v2571_v9, 3  ;;  %v2582_v20 = vshll.u32 %v2494_v60, 16  ;;  %v2899_v24 = vrot.slane %v2831_v63, 4 }
 0x24a   : > { %4562 = vmatmul.mubr.bf16.gmra.mrb[104].mxu0 %v2569_v5  ;;  %v2282_v25 = vor.u32 %v2281_v14, %v2278_v12  ;;  %v2576_v26 = vrot.slane %v2574_v15, 4  ;;  %v2581_v27 = vrot.slane %v2579_v16, 3  ;;  %v2900_v28 = vrot.slane %v2832_v2, 4  ;;  %5826 = vmatpush3.bf16.msra.mxu1 %v6012_v49  ;;  %v2498_v5 = vld [vmem:[#allocation2 + $0x78] sm:$0xf] }
 0x24b   : > { %4569 = vmatprep.mubr.bf16.mxu0 %v2898_v54  ;;  %v2584_v34 = vrot.slane %v2582_v20, 4  ;;  %v2085_v35 = vrot.slane %v2016_v23, 4  ;;  %v2086_v61 = vrot.slane %v2017_v11, 4  ;;  %v2285_v33 = vshrl.u32 %v2162_v43, 16  ;;  %v2164_v54 = vld [vmem:[#allocation2 + $0x80] sm:$0xf0] }
 0x24c   : > { %v2283_v37 = vsel %vm1365_vm2, %v2274_v17, %v2282_v25  ;;  %v2577_v29 = vor.u32 %v2576_v26, %v2573_v18  ;;  %v2901_v39 = vsel %vm1252_vm0, %v2899_v24, %v2900_v28  ;;  %v2288_v40 = vshll.u32 %v2162_v43, 16  ;;  %v2497_v23 = vld [vmem:[#allocation2 + $0x70] sm:$0xf8]  ;;  %v2835_v12 = vld [vmem:[#allocation2 + $0x80] sm:$0xf0] }
 0x24d   : > { %4417 = vmatmul.mubr.bf16.gmra.mrb[80].mxu1 %v2084_v10  ;;  %v2585_v38 = vor.u32 %v2584_v34, %v2581_v27  ;;  %v2087_v42 = vsel %vm1252_vm0, %v2085_v35, %v2086_v61  ;;  %v2287_v52 = vrot.slane %v2285_v33, 4  ;;  %v2293_v22 = vshrl.u32 %v2163_v31, 16  ;;  %v2836_v14 = vld [vmem:[#allocation2 + $0x88] sm:$0xf]  ;;  %v2020_v18 = vld [vmem:[#allocation2 + $0x80] sm:$0xf0] }
 0x24e   : > { %4424 = vmatprep.mubr.bf16.mxu1 %v2283_v37  ;;  %v2290_v7 = vrot.slane %v2288_v40, 5  ;;  %v2296_v21 = vshll.u32 %v2163_v31, 16  ;;  %v2588_v45 = vshrl.u32 %v2495_v36, 16  ;;  %v2591_v46 = vshll.u32 %v2495_v36, 16  ;;  %v2021_v20 = vld [vmem:[#allocation2 + $0x88] sm:$0xf] }
 0x24f   : > { %v2586_v62 = vsel %vm883_vm1, %v2577_v29, %v2585_v38  ;;  %v2295_v47 = vrot.slane %v2293_v22, 4  ;;  %v2596_v49 = vshrl.u32 %v2496_v13, 16  ;;  %v2599_v51 = vshll.u32 %v2496_v13, 16  ;;  %v2166_v28 = vld [vmem:[#allocation2 + $0x90] sm:$0xf0] }
 0x250   : > { %v2291_v53 = vor.u32 %v2290_v7, %v2287_v52  ;;  %v2298_v56 = vrot.slane %v2296_v21, 5  ;;  %v2590_v4 = vrot.slane %v2588_v45, 3  ;;  %v2593_v58 = vrot.slane %v2591_v46, 4  ;;  %v2167_v33 = vld [vmem:[#allocation2 + $0x98] sm:$0x1f] }
 0x251   : > { %v2598_v55 = vrot.slane %v2596_v49, 3  ;;  %v2601_v59 = vrot.slane %v2599_v51, 4  ;;  %v2902_v60 = vrot.slane %v2833_v57, 4  ;;  %v2903_v63 = vrot.slane %v2834_v41, 4  ;;  %v2499_v40 = vld [vmem:[#allocation2 + $0x80] sm:$0xf8] }
 0x252   : > { %4570 = vmatmul.mubr.bf16.gmra.mrb[108].mxu0 %v2586_v62  ;;  %v2299_v10 = vor.u32 %v2298_v56, %v2295_v47  ;;  %v2594_v0 = vor.u32 %v2593_v58, %v2590_v4  ;;  %v2088_v1 = vrot.slane %v2018_v44, 4  ;;  %v2089_v2 = vrot.slane %v2019_v50, 4  ;;  %v2500_v57 = vld [vmem:[#allocation2 + $0x88] sm:$0xf]  ;;  %v2837_v50 = vld [vmem:[#allocation2 + $0x90] sm:$0xf0] }
 0x253   : > { %4577 = vmatprep.mubr.bf16.mxu0 %v2901_v39  ;;  %v2602_v6 = vor.u32 %v2601_v59, %v2598_v55  ;;  %v2904_v8 = vsel %vm1252_vm0, %v2902_v60, %v2903_v63  ;;  %v2302_v9 = vshrl.u32 %v2164_v54, 16  ;;  %v2305_v11 = vshll.u32 %v2164_v54, 16  ;;  %v2022_v59 = vld [vmem:[#allocation2 + $0x90] sm:$0xf0]  ;;  %v2023_v60 = vld [vmem:[#allocation2 + $0x98] sm:$0xf] }
 0x254   : > { %v2300_v15 = vsel %vm1365_vm2, %v2291_v53, %v2299_v10  ;;  %v2090_v16 = vsel %vm1252_vm0, %v2088_v1, %v2089_v2  ;;  %v2310_v43 = vshrl.u32 %v2165_v32, 16  ;;  %v2313_v17 = vshll.u32 %v2165_v32, 16  ;;  %v2838_v53 = vld [vmem:[#allocation2 + $0x98] sm:$0xf] }
 0x255   : > { %4425 = vmatmul.mubr.bf16.gmra.mrb[84].mxu1 %v2087_v42  ;;  %v2603_v24 = vsel %vm883_vm1, %v2594_v0, %v2602_v6  ;;  %v2304_v25 = vrot.slane %v2302_v9, 4  ;;  %v2307_v26 = vrot.slane %v2305_v11, 5  ;;  %v2605_v27 = vshrl.u32 %v2497_v23, 16 }
 0x256   : > { %4432 = vmatprep.mubr.bf16.mxu1 %v2300_v15  ;;  %v2312_v31 = vrot.slane %v2310_v43, 4  ;;  %v2315_v34 = vrot.slane %v2313_v17, 5  ;;  %v2608_v35 = vshll.u32 %v2497_v23, 16  ;;  %v2613_v61 = vshrl.u32 %v2498_v5, 16  ;;  %v2169_v43 = vld [vmem:[#allocation2 + $0xa8] sm:$0x1f] }
 0x257   : > { %v2308_v36 = vor.u32 %v2307_v26, %v2304_v25  ;;  %v2607_v37 = vrot.slane %v2605_v27, 3  ;;  %v2616_v29 = vshll.u32 %v2498_v5, 16  ;;  %v2905_v39 = vrot.slane %v2835_v12, 4  ;;  %v6671_v13 = vpop.f32.mrb[4].mxu1 }
 0x258   : > { %v2316_v38 = vor.u32 %v2315_v34, %v2312_v31  ;;  %v2610_v42 = vrot.slane %v2608_v35, 4  ;;  %v2615_v52 = vrot.slane %v2613_v61, 3  ;;  %v2906_v22 = vrot.slane %v2836_v14, 4  ;;  %v6673_v41 = vpop.f32.mrb[5].mxu1  ;;  %v2501_v34 = vld [vmem:[#allocation2 + $0x90] sm:$0xf8] }
 0x259   : > { %v2618_v7 = vrot.slane %v2616_v29, 4  ;;  %v2091_v21 = vrot.slane %v2020_v18, 4  ;;  %v2092_v45 = vrot.slane %v2021_v20, 4  ;;  %v2319_v46 = vshrl.u32 %v2166_v28, 16  ;;  %v6675_v44 = vpop.f32.mrb[6].mxu1 }
 0x25a   : > { %4578 = vmatmul.mubr.bf16.gmra.mrb[112].mxu0 %v2603_v24  ;;  %v2317_v62 = vsel %vm1365_vm2, %v2308_v36, %v2316_v38  ;;  %v2611_v47 = vor.u32 %v2610_v42, %v2607_v37  ;;  %v2907_v49 = vsel %vm1252_vm0, %v2905_v39, %v2906_v22  ;;  %v2322_v51 = vshll.u32 %v2166_v28, 16  ;;  %v6679_v56 = vpop.f32.mrb[7].mxu1  ;;  %v2502_v35 = vld [vmem:[#allocation2 + $0x98] sm:$0xf]  ;;  %v2839_v29 = vld [vmem:[#allocation2 + $0xa0] sm:$0xf0] }
 0x25b   : > { %4585 = vmatprep.mubr.bf16.mxu0 %v2904_v8  ;;  %v2619_v4 = vor.u32 %v2618_v7, %v2615_v52  ;;  %v2093_v58 = vsel %vm1252_vm0, %v2091_v21, %v2092_v45  ;;  %v2321_v54 = vrot.slane %v2319_v46, 4  ;;  %v2327_v55 = vshrl.u32 %v2167_v33, 16  ;;  %v2168_v8 = vld [vmem:[#allocation2 + $0xa0] sm:$0xf0]  ;;  %v2840_v39 = vld [vmem:[#allocation2 + $0xa8] sm:$0xf] }
 0x25c   : > { %v2324_v63 = vrot.slane %v2322_v51, 5  ;;  %v2330_v32 = vshll.u32 %v2167_v33, 16  ;;  %v2622_v10 = vshrl.u32 %v2499_v40, 16  ;;  %v2625_v0 = vshll.u32 %v2499_v40, 16  ;;  %v6682_v1 = vpop.f32.mrb[32].mxu0 }
 0x25d   : > { %4433 = vmatmul.mubr.bf16.gmra.mrb[88].mxu1 %v2090_v16  ;;  %v2620_v2 = vsel %vm883_vm1, %v2611_v47, %v2619_v4  ;;  %v2329_v23 = vrot.slane %v2327_v55, 4  ;;  %v2630_v5 = vshrl.u32 %v2500_v57, 16  ;;  %v2633_v6 = vshll.u32 %v2500_v57, 16  ;;  %v6685_v9 = vpop.f32.mrb[33].mxu0  ;;  %v2024_v22 = vld [vmem:[#allocation2 + $0xa0] sm:$0xf0] }
 0x25e   : > { %4440 = vmatprep.mubr.bf16.mxu1 %v2317_v62  ;;  %v2325_v11 = vor.u32 %v2324_v63, %v2321_v54  ;;  %v2332_v12 = vrot.slane %v2330_v32, 5  ;;  %v2624_v14 = vrot.slane %v2622_v10, 3  ;;  %v2627_v15 = vrot.slane %v2625_v0, 4  ;;  %v6687_v17 = vpop.f32.mrb[34].mxu0  ;;  %v2025_v57 = vld [vmem:[#allocation2 + $0xa8] sm:$0xf] }
 0x25f   : > { %v2632_v18 = vrot.slane %v2630_v5, 3  ;;  %v2635_v20 = vrot.slane %v2633_v6, 4  ;;  %v2908_v24 = vrot.slane %v2837_v50, 4  ;;  %v2909_v16 = vrot.slane %v2838_v53, 4  ;;  %v6689_v25 = vpop.f32.mrb[35].mxu0 }
 0x260   : > { %v2333_v26 = vor.u32 %v2332_v12, %v2329_v23  ;;  %v2628_v27 = vor.u32 %v2627_v15, %v2624_v14  ;;  %v2094_v28 = vrot.slane %v2022_v59, 4  ;;  %v2095_v31 = vrot.slane %v2023_v60, 4  ;;  %v2170_v62 = vld [vmem:[#allocation2 + $0xb0] sm:$0xf0]  ;;  %v2171_v4 = vld [vmem:[#allocation2 + $0xb8] sm:$0x1f] }
 0x261   : > { %v2636_v61 = vor.u32 %v2635_v20, %v2632_v18  ;;  %v2910_v33 = vsel %vm1252_vm0, %v2908_v24, %v2909_v16  ;;  %v2336_v36 = vshrl.u32 %v2168_v8, 16  ;;  %v2339_v37 = vshll.u32 %v2168_v8, 16  ;;  %v2503_v63 = vld [vmem:[#allocation2 + $0xa0] sm:$0xf8]  ;;  %v2841_v18 = vld [vmem:[#allocation2 + $0xb0] sm:$0xf0] }
 0x262   : > { %4586 = vmatmul.mubr.bf16.gmra.mrb[116].mxu0 %v2620_v2  ;;  %v2334_v40 = vsel %vm1365_vm2, %v2325_v11, %v2333_v26  ;;  %v6694_v38 = vsel %vm1252_vm0, %v2094_v28, %v2095_v31  ;;  %v2344_v42 = vshrl.u32 %v2169_v43, 16  ;;  %v2347_v52 = vshll.u32 %v2169_v43, 16  ;;  %v2504_v2 = vld [vmem:[#allocation2 + $0xa8] sm:$0xf]  ;;  %v2842_v20 = vld [vmem:[#allocation2 + $0xb8] sm:$0xf] }
 0x263   : > { %4593 = vmatprep.mubr.bf16.mxu0 %v2907_v49  ;;  %v2637_v7 = vsel %vm883_vm1, %v2628_v27, %v2636_v61  ;;  %v2338_v21 = vrot.slane %v2336_v36, 4  ;;  %v2341_v45 = vrot.slane %v2339_v37, 5  ;;  %v2639_v46 = vshrl.u32 %v2501_v34, 16  ;;  %v2026_v31 = vld [vmem:[#allocation2 + $0xb0] sm:$0xf0] }
 0x264   : > { %v2346_v47 = vrot.slane %v2344_v42, 4  ;;  %v2349_v51 = vrot.slane %v2347_v52, 5  ;;  %v2642_v50 = vshll.u32 %v2501_v34, 16  ;;  %v2647_v53 = vshrl.u32 %v2502_v35, 16 }
 0x265   : > { %4441 = vmatmul.mubr.bf16.gmra.mrb[92].mxu1 %v2093_v58  ;;  %v2342_v54 = vor.u32 %v2341_v45, %v2338_v21  ;;  %v2641_v55 = vrot.slane %v2639_v46, 3  ;;  %v2650_v59 = vshll.u32 %v2502_v35, 16  ;;  %v2911_v60 = vrot.slane %v2839_v29, 4  ;;  %v6697_v23 = vpop.f32.mrb[8].mxu1 }
 0x266   : > { %4448 = vmatprep.mubr.bf16.mxu1 %v2334_v40  ;;  %v2350_v32 = vor.u32 %v2349_v51, %v2346_v47  ;;  %v2644_v49 = vrot.slane %v2642_v50, 4  ;;  %v2649_v10 = vrot.slane %v2647_v53, 3  ;;  %v2912_v0 = vrot.slane %v2840_v39, 4  ;;  %v6699_v12 = vpop.f32.mrb[9].mxu1 }
 0x267   : > { %v2652_v5 = vrot.slane %v2650_v59, 4  ;;  %v2097_v6 = vrot.slane %v2024_v22, 4  ;;  %v2098_v8 = vrot.slane %v2025_v57, 4  ;;  %v2353_v11 = vshrl.u32 %v2170_v62, 16  ;;  %v6705_v24 = vpop.f32.mrb[10].mxu1 }
 0x268   : > { %v2351_v58 = vsel %vm1365_vm2, %v2342_v54, %v2350_v32  ;;  %v2645_v14 = vor.u32 %v2644_v49, %v2641_v55  ;;  %v6703_v15 = vsel %vm1252_vm0, %v2911_v60, %v2912_v0  ;;  %v2356_v43 = vshll.u32 %v2170_v62, 16  ;;  %v6712_v35 = vpop.f32.mrb[11].mxu1  ;;  %v2027_v57 = vld [vmem:[#allocation2 + $0xb8] sm:$0xf]  ;;  %v2173_v54 = vld [vmem:[#allocation2 + $0xc8] sm:$0x1f] }
 0x269   : > { %v2653_v16 = vor.u32 %v2652_v5, %v2649_v10  ;;  %v6708_v26 = vsel %vm1252_vm0, %v2097_v6, %v2098_v8  ;;  %v2355_v27 = vrot.slane %v2353_v11, 4  ;;  %v2361_v28 = vshrl.u32 %v2171_v4, 16  ;;  %v6710_v34 = vpop.f32.mrb[36].mxu0  ;;  %v6725_v32 = vld [vmem:[%s7297_s4] ss:$0 sm:$0xff] }
 0x26a   : > { %4594 = vmatmul.mubr.bf16.gmra.mrb[120].mxu0 %v2637_v7  ;;  %v2358_v61 = vrot.slane %v2356_v43, 5  ;;  %v2364_v36 = vshll.u32 %v2171_v4, 16  ;;  %v2656_v37 = vshrl.u32 %v2503_v63, 16  ;;  %v2659_v29 = vshll.u32 %v2503_v63, 16  ;;  %v6714_v39 = vpop.f32.mrb[37].mxu0 }
 0x26b   : > { %4601 = vmatprep.mubr.bf16.mxu0 %v2910_v33  ;;  %v2654_v40 = vsel %vm883_vm1, %v2645_v14, %v2653_v16  ;;  %v2363_v42 = vrot.slane %v2361_v28, 4  ;;  %v2664_v52 = vshrl.u32 %v2504_v2, 16  ;;  %v2667_v22 = vshll.u32 %v2504_v2, 16  ;;  %v6717_v21 = vpop.f32.mrb[38].mxu0  ;;  %v2172_v7 = vld [vmem:[#allocation2 + $0xc0] sm:$0xf0] }
 0x26c   : > { %v2359_v45 = vor.u32 %v2358_v61, %v2355_v27  ;;  %v2366_v46 = vrot.slane %v2364_v36, 5  ;;  %v2658_v62 = vrot.slane %v2656_v37, 3  ;;  %v2661_v47 = vrot.slane %v2659_v29, 4  ;;  %v6719_v51 = vpop.f32.mrb[39].mxu0  ;;  %v2505_v49 = vld [vmem:[#allocation2 + $0xb0] sm:$0xf8] }
 0x26d   : > { %4449 = vmatmul.mubr.bf16.gmra.mrb[96].mxu1 %v6694_v38  ;;  %v2666_v50 = vrot.slane %v2664_v52, 3  ;;  %v2669_v53 = vrot.slane %v2667_v22, 4  ;;  %v2914_v33 = vrot.slane %v2841_v18, 4  ;;  %v2915_v4 = vrot.slane %v2842_v20, 4  ;;  %v2506_v5 = vld [vmem:[#allocation2 + $0xb8] sm:$0xf] }
 0x26e   : > { %4456 = vmatprep.mubr.bf16.mxu1 %v2351_v58  ;;  %v2367_v55 = vor.u32 %v2366_v46, %v2363_v42  ;;  %v2662_v59 = vor.u32 %v2661_v47, %v2658_v62  ;;  %v2100_v60 = vrot.slane %v2026_v31, 4  ;;  %v2101_v63 = vrot.slane %v2027_v57, 4  ;;  %v2843_v6 = vld [vmem:[#allocation2 + $0xc0] sm:$0xf0]  ;;  %v2844_v43 = vld [vmem:[#allocation2 + $0xc8] sm:$0xf] }
 0x26f   : > { %v2670_v10 = vor.u32 %v2669_v53, %v2666_v50  ;;  %v6728_v0 = vsel %vm1252_vm0, %v2914_v33, %v2915_v4  ;;  %v5309_v38 = vadd.f32 %v6622_v30, %v6617_v3  ;;  %v2370_v2 = vshrl.u32 %v2172_v7, 16  ;;  %v2028_v30 = vld [vmem:[#allocation2 + $0xc0] sm:$0xf0]  ;;  %v2029_v28 = vld [vmem:[#allocation2 + $0xc8] sm:$0xf] }
 0x270   : > { %v2368_v8 = vsel %vm1365_vm2, %v2359_v45, %v2367_v55  ;;  %v6734_v11 = vsel %vm1252_vm0, %v2100_v60, %v2101_v63  ;;  %v2373_v58 = vshll.u32 %v2172_v7, 16  ;;  %v2378_v14 = vshrl.u32 %v2173_v54, 16  ;;  %v6736_v18 = vpop.f32.mrb[12].mxu1  ;;  %v2174_v53 = vld [vmem:[#allocation2 + $0xd0] sm:$0xf0] }
 0x271   : > { %v2671_v20 = vsel %vm883_vm1, %v2662_v59, %v2670_v10  ;;  %v6740_v16 = vadd.f32 %v5309_v38, %v6725_v32  ;;  %v2372_v27 = vrot.slane %v2370_v2, 4  ;;  %v2381_v3 = vshll.u32 %v2173_v54, 16  ;;  %v6742_v31 = vpop.f32.mrb[13].mxu1  ;;  %v2175_v55 = vld [vmem:[#allocation2 + $0xd8] sm:$0x1f] }
 0x272   : > { %4602 = vmatmul.mubr.bf16.gmra.mrb[124].mxu0 %v2654_v40  ;;  %v2375_v61 = vrot.slane %v2373_v58, 5  ;;  %v2380_v36 = vrot.slane %v2378_v14, 4  ;;  %v2673_v37 = vshrl.u32 %v2505_v49, 16  ;;  %v2676_v29 = vshll.u32 %v2505_v49, 16  ;;  %v6744_v42 = vpop.f32.mrb[14].mxu1 }
 0x273   : > { %4609 = vmatprep.mubr.bf16.mxu0 %v6703_v15  ;;  %v2383_v52 = vrot.slane %v2381_v3, 5  ;;  %v2681_v22 = vshrl.u32 %v2506_v5, 16  ;;  %v2684_v57 = vshll.u32 %v2506_v5, 16  ;;  %v2917_v45 = vrot.slane %v2843_v6, 4  ;;  %v6747_v46 = vpop.f32.mrb[15].mxu1 }
 0x274   : > { %v2376_v62 = vor.u32 %v2375_v61, %v2372_v27  ;;  %v2675_v47 = vrot.slane %v2673_v37, 3  ;;  %v2678_v7 = vrot.slane %v2676_v29, 4  ;;  %v2918_v50 = vrot.slane %v2844_v43, 4  ;;  %v6749_v40 = vpop.f32.mrb[40].mxu0  ;;  %v2507_v38 = vld [vmem:[#allocation2 + $0xc0] sm:$0xf8] }
 0x275   : > { %4457 = vmatmul.mubr.bf16.gmra.mrb[100].mxu1 %v6708_v26  ;;  %v2384_v33 = vor.u32 %v2383_v52, %v2380_v36  ;;  %v2683_v4 = vrot.slane %v2681_v22, 3  ;;  %v2686_v54 = vrot.slane %v2684_v57, 4  ;;  %v5312_v15 = vadd.f32 %v6626_v48, %v6624_v19  ;;  %v6754_v59 = vpop.f32.mrb[41].mxu0  ;;  %v2508_v19 = vld [vmem:[#allocation2 + $0xc8] sm:$0xf] }
 0x276   : > { %4464 = vmatprep.mubr.bf16.mxu1 %v2368_v8  ;;  %v2679_v60 = vor.u32 %v2678_v7, %v2675_v47  ;;  %v6757_v63 = vsel %vm1252_vm0, %v2917_v45, %v2918_v50  ;;  %v2103_v49 = vrot.slane %v2028_v30, 4  ;;  %v2104_v10 = vrot.slane %v2029_v28, 4  ;;  %v6759_v2 = vpop.f32.mrb[42].mxu0  ;;  %v2845_v3 = vld [vmem:[#allocation2 + $0xd0] sm:$0xf0] }
 0x277   : > { %v2385_v26 = vsel %vm1365_vm2, %v2376_v62, %v2384_v33  ;;  %v2687_v5 = vor.u32 %v2686_v54, %v2683_v4  ;;  %v4068_v6 = vadd.f32 %v5312_v15, %v6725_v32  ;;  %v2387_v58 = vshrl.u32 %v2174_v53, 16  ;;  %v6763_v48 = vpop.f32.mrb[43].mxu0  ;;  %v2846_v37 = vld [vmem:[#allocation2 + $0xd8] sm:$0xf]  ;;  %v2030_v54 = vld [vmem:[#allocation2 + $0xd0] sm:$0xf0] }
 0x278   : > { %v6766_v8 = vsel %vm1252_vm0, %v2103_v49, %v2104_v10  ;;  %v2390_v14 = vshll.u32 %v2174_v53, 16  ;;  %v2395_v43 = vshrl.u32 %v2175_v55, 16  ;;  %v2398_v27 = vshll.u32 %v2175_v55, 16  ;;  %v2176_v49 = vld [vmem:[#allocation2 + $0xe0] sm:$0xf0] }
 0x279   : > { %v2688_v30 = vsel %vm883_vm1, %v2679_v60, %v2687_v5  ;;  %v2389_v28 = vrot.slane %v2387_v58, 4  ;;  %v2690_v61 = vshrl.u32 %v2507_v38, 16  ;;  %v2693_v36 = vshll.u32 %v2507_v38, 16  ;;  %v2177_v58 = vld [vmem:[#allocation2 + $0xe8] sm:$0x1f] }
 0x27a   : > { %4610 = vmatmul.mubr.bf16.gmra.mrb[128].mxu0 %v2671_v20  ;;  %v2392_v29 = vrot.slane %v2390_v14, 5  ;;  %v2397_v52 = vrot.slane %v2395_v43, 4  ;;  %v2400_v22 = vrot.slane %v2398_v27, 5  ;;  %v2698_v57 = vshrl.u32 %v2508_v19, 16 }
 0x27b   : > { %4617 = vmatprep.mubr.bf16.mxu0 %v6728_v0  ;;  %v2692_v45 = vrot.slane %v2690_v61, 3  ;;  %v2695_v62 = vrot.slane %v2693_v36, 4  ;;  %v2701_v47 = vshll.u32 %v2508_v19, 16  ;;  %v2920_v7 = vrot.slane %v2845_v3, 4  ;;  %v2031_v0 = vld [vmem:[#allocation2 + $0xd8] sm:$0xf] }
 0x27c   : > { %v2393_v50 = vor.u32 %v2392_v29, %v2389_v28  ;;  %v2401_v53 = vor.u32 %v2400_v22, %v2397_v52  ;;  %v2700_v33 = vrot.slane %v2698_v57, 3  ;;  %v2921_v4 = vrot.slane %v2846_v37, 4  ;;  %v2848_v57 = vld [vmem:[#allocation2 + $0xe8] sm:$0xf] }
 0x27d   : > { %4465 = vmatmul.mubr.bf16.gmra.mrb[104].mxu1 %v6734_v11  ;;  %v2696_v15 = vor.u32 %v2695_v62, %v2692_v45  ;;  %v2703_v55 = vrot.slane %v2701_v47, 4  ;;  %v5315_v20 = vadd.f32 %v6673_v41, %v6671_v13  ;;  %v5421_v60 = vadd.f32 %v6685_v9, %v6682_v1 }
 0x27e   : > { %4472 = vmatprep.mubr.bf16.mxu1 %v2385_v26  ;;  %v2402_v10 = vsel %vm1365_vm2, %v2393_v50, %v2401_v53  ;;  %v6777_v38 = vsel %vm1252_vm0, %v2920_v7, %v2921_v4  ;;  %v5318_v5 = vadd.f32 %v6679_v56, %v6675_v44  ;;  %v5424_v11 = vadd.f32 %v6689_v25, %v6687_v17  ;;  %v6783_v19 = vpop.f32.mrb[16].mxu1  ;;  %v2509_v26 = vld [vmem:[#allocation2 + $0xd0] sm:$0xf8]  ;;  %v2510_v17 = vld [vmem:[#allocation2 + $0xd8] sm:$0xf] }
 0x27f   : > { %v2704_v13 = vor.u32 %v2703_v55, %v2700_v33  ;;  %v4073_v41 = vadd.f32 %v5315_v20, %v6725_v32  ;;  %v6787_v1 = vadd.f32 %v5421_v60, %v6740_v16  ;;  %v2106_v9 = vrot.slane %v2030_v54, 4  ;;  %v6789_v14 = vpop.f32.mrb[17].mxu1  ;;  %v2847_v16 = vld [vmem:[#allocation2 + $0xe0] sm:$0xf0] }
 0x280   : > { %v4076_v43 = vadd.f32 %v5318_v5, %v6725_v32  ;;  %v6792_v27 = vadd.f32 %v5424_v11, %v4068_v6  ;;  %v2107_v44 = vrot.slane %v2031_v0, 4  ;;  %v2404_v56 = vshrl.u32 %v2176_v49, 16  ;;  %v6794_v25 = vpop.f32.mrb[18].mxu1  ;;  %v2032_v60 = vld [vmem:[#allocation2 + $0xe0] sm:$0xf0] }
 0x281   : > { %v2705_v3 = vsel %vm883_vm1, %v2696_v15, %v2704_v13  ;;  %v2407_v28 = vshll.u32 %v2176_v49, 16  ;;  %v2412_v61 = vshrl.u32 %v2177_v58, 16  ;;  %v2415_v36 = vshll.u32 %v2177_v58, 16  ;;  %v6797_v37 = vpop.f32.mrb[19].mxu1  ;;  %v2033_v58 = vld [vmem:[#allocation2 + $0xe8] sm:$0xf] }
 0x282   : > { %4618 = vmatmul.mubr.bf16.gmra.mrb[132].mxu0 %v2688_v30  ;;  %v6800_v29 = vsel %vm1252_vm0, %v2106_v9, %v2107_v44  ;;  %v2406_v52 = vrot.slane %v2404_v56, 4  ;;  %v2707_v6 = vshrl.u32 %v2509_v26, 16  ;;  %v2710_v22 = vshll.u32 %v2509_v26, 16  ;;  %v2178_v13 = vld [vmem:[#allocation2 + $0xf0] sm:$0xf0] }
 0x283   : > { %4625 = vmatprep.mubr.bf16.mxu0 %v6757_v63  ;;  %v2409_v45 = vrot.slane %v2407_v28, 5  ;;  %v2414_v62 = vrot.slane %v2412_v61, 4  ;;  %v2417_v47 = vrot.slane %v2415_v36, 5  ;;  %v2715_v7 = vshrl.u32 %v2510_v17, 16  ;;  %v6803_v54 = vpop.f32.mrb[44].mxu0 }
 0x284   : > { %v2709_v50 = vrot.slane %v2707_v6, 3  ;;  %v2712_v53 = vrot.slane %v2710_v22, 4  ;;  %v2718_v33 = vshll.u32 %v2510_v17, 16  ;;  %v2923_v4 = vrot.slane %v2847_v16, 4  ;;  %v6806_v0 = vpop.f32.mrb[45].mxu0 }
 0x285   : > { %4473 = vmatmul.mubr.bf16.gmra.mrb[108].mxu1 %v6766_v8  ;;  %v2410_v30 = vor.u32 %v2409_v45, %v2406_v52  ;;  %v2418_v15 = vor.u32 %v2417_v47, %v2414_v62  ;;  %v2717_v55 = vrot.slane %v2715_v7, 3  ;;  %v2924_v20 = vrot.slane %v2848_v57, 4  ;;  %v6812_v9 = vpop.f32.mrb[46].mxu0  ;;  %v2179_v56 = vld [vmem:[#allocation2 + $0xf8] sm:$0x1f] }
 0x286   : > { %4480 = vmatprep.mubr.bf16.mxu1 %v2402_v10  ;;  %v2713_v63 = vor.u32 %v2712_v53, %v2709_v50  ;;  %v2720_v49 = vrot.slane %v2718_v33, 4  ;;  %v5321_v5 = vadd.f32 %v6699_v12, %v6697_v23  ;;  %v5427_v11 = vadd.f32 %v6714_v39, %v6710_v34  ;;  %v6822_v23 = vpop.f32.mrb[47].mxu0  ;;  %v2511_v28 = vld [vmem:[#allocation2 + $0xe0] sm:$0xf8]  ;;  %v2849_v57 = vld [vmem:[#allocation2 + $0xf0] sm:$0xf0] }
 0x287   : > { %v2419_v8 = vsel %vm1365_vm2, %v2410_v30, %v2418_v15  ;;  %v6816_v26 = vsel %vm1252_vm0, %v2923_v4, %v2924_v20  ;;  %v5324_v10 = vadd.f32 %v6712_v35, %v6705_v24  ;;  %v5430_v44 = vadd.f32 %v6719_v51, %v6717_v21  ;;  %v2512_v24 = vld [vmem:[#allocation2 + $0xe8] sm:$0xf]  ;;  %v2850_v7 = vld [vmem:[#allocation2 + $0xf8] sm:$0xf] }
 0x288   : > { %v2721_v12 = vor.u32 %v2720_v49, %v2717_v55  ;;  %v4081_v34 = vadd.f32 %v5321_v5, %v6725_v32  ;;  %v6825_v39 = vadd.f32 %v5427_v11, %v4073_v41  ;;  %v2109_v17 = vrot.slane %v2032_v60, 4 }
 0x289   : > { %v4084_v61 = vadd.f32 %v5324_v10, %v6725_v32  ;;  %v6828_v36 = vadd.f32 %v5430_v44, %v4076_v43  ;;  %v2110_v16 = vrot.slane %v2033_v58, 4  ;;  %v2421_v52 = vshrl.u32 %v2178_v13, 16  ;;  %v2034_v58 = vld [vmem:[#allocation2 + $0xf0] sm:$0xf0] }
 0x28a   : > { %v6830_v35 = vpop.f32.mrb[20].mxu1  ;;  %4626 = vmatmul.mubr.bf16.gmra.mrb[136].mxu0 %v2705_v3  ;;  %v2722_v21 = vsel %vm883_vm1, %v2713_v63, %v2721_v12  ;;  %v2424_v51 = vshll.u32 %v2178_v13, 16  ;;  %v2429_v6 = vshrl.u32 %v2179_v56, 16  ;;  %v2432_v22 = vshll.u32 %v2179_v56, 16  ;;  %v2035_v12 = vld [vmem:[#allocation2 + $0xf8] sm:$0xf] }
 0x28b   : > { %v6833_v41 = vpop.f32.mrb[21].mxu1  ;;  %4633 = vmatprep.mubr.bf16.mxu0 %v6777_v38  ;;  %v2111_v45 = vsel %vm1252_vm0, %v2109_v17, %v2110_v16  ;;  %v2423_v43 = vrot.slane %v2421_v52, 4  ;;  %v2724_v62 = vshrl.u32 %v2511_v28, 16  ;;  %v2727_v47 = vshll.u32 %v2511_v28, 16  ;;  %v2180_v17 = vld [vmem:[#allocation2 + $0x100] sm:$0xf0] }
 0x28c   : > { %v6837_v50 = vpop.f32.mrb[22].mxu1  ;;  %v2426_v53 = vrot.slane %v2424_v51, 5  ;;  %v2431_v3 = vrot.slane %v2429_v6, 4  ;;  %v2434_v33 = vrot.slane %v2432_v22, 5  ;;  %v2732_v4 = vshrl.u32 %v2512_v24, 16 }
 0x28d   : > { %v6839_v30 = vpop.f32.mrb[23].mxu1  ;;  %4481 = vmatmul.mubr.bf16.gmra.mrb[112].mxu1 %v6800_v29  ;;  %v2726_v15 = vrot.slane %v2724_v62, 3  ;;  %v2729_v55 = vrot.slane %v2727_v47, 4  ;;  %v2735_v20 = vshll.u32 %v2512_v24, 16  ;;  %v2926_v38 = vrot.slane %v2849_v57, 4  ;;  %v6842_v60 = vpop.f32.mrb[48].mxu0 }
 0x28e   : > { %4488 = vmatprep.mubr.bf16.mxu1 %v2419_v8  ;;  %v2427_v63 = vor.u32 %v2426_v53, %v2423_v43  ;;  %v2435_v49 = vor.u32 %v2434_v33, %v2431_v3  ;;  %v2734_v5 = vrot.slane %v2732_v4, 3  ;;  %v2927_v11 = vrot.slane %v2850_v7, 4  ;;  %v6844_v13 = vpop.f32.mrb[49].mxu0  ;;  %v2181_v51 = vld [vmem:[#allocation2 + $0x108] sm:$0x1f] }
 0x28f   : > { %v2730_v10 = vor.u32 %v2729_v55, %v2726_v15  ;;  %v2737_v44 = vrot.slane %v2735_v20, 4  ;;  %v5327_v56 = vadd.f32 %v6742_v31, %v6736_v18  ;;  %v5433_v29 = vadd.f32 %v6754_v59, %v6749_v40  ;;  %v6850_v28 = vpop.f32.mrb[50].mxu0  ;;  %v2513_v22 = vld [vmem:[#allocation2 + $0xf0] sm:$0xf8]  ;;  %v2851_v53 = vld [vmem:[#allocation2 + $0x100] sm:$0xf0] }
 0x290   : > { %v2436_v8 = vsel %vm1365_vm2, %v2427_v63, %v2435_v49  ;;  %v2928_v16 = vsel %vm1252_vm0, %v2926_v38, %v2927_v11  ;;  %v5330_v52 = vadd.f32 %v6747_v46, %v6744_v42  ;;  %v5436_v24 = vadd.f32 %v6763_v48, %v6759_v2  ;;  %v6858_v6 = vpop.f32.mrb[51].mxu0  ;;  %v2514_v46 = vld [vmem:[#allocation2 + $0xf8] sm:$0xf]  ;;  %v2852_v4 = vld [vmem:[#allocation2 + $0x108] sm:$0xf] }
 0x291   : > { %v2738_v18 = vor.u32 %v2737_v44, %v2734_v5  ;;  %v4089_v31 = vadd.f32 %v5327_v56, %v6725_v32  ;;  %v6861_v40 = vadd.f32 %v5433_v29, %v4081_v34  ;;  %v2112_v59 = vrot.slane %v2034_v58, 4  ;;  %v2036_v44 = vld [vmem:[#allocation2 + $0x100] sm:$0xf0] }
 0x292   : > { %4634 = vmatmul.mubr.bf16.gmra.mrb[140].mxu0 %v2722_v21  ;;  %v4092_v57 = vadd.f32 %v5330_v52, %v6725_v32  ;;  %v6864_v43 = vadd.f32 %v5436_v24, %v4084_v61  ;;  %v2113_v62 = vrot.slane %v2035_v12, 4  ;;  %v2438_v42 = vshrl.u32 %v2180_v17, 16  ;;  %v2515_v52 = vld [vmem:[#allocation2 + $0x100] sm:$0xf8] }
 0x293   : > { %4641 = vmatprep.mubr.bf16.mxu0 %v6816_v26  ;;  %v2739_v2 = vsel %vm883_vm1, %v2730_v10, %v2738_v18  ;;  %v2441_v48 = vshll.u32 %v2180_v17, 16  ;;  %v2446_v47 = vshrl.u32 %v2181_v51, 16  ;;  %v2449_v7 = vshll.u32 %v2181_v51, 16 }
 0x294   : > { %v2114_v34 = vsel %vm1252_vm0, %v2112_v59, %v2113_v62  ;;  %v2440_v3 = vrot.slane %v2438_v42, 4  ;;  %v2741_v33 = vshrl.u32 %v2513_v22, 16  ;;  %v2744_v21 = vshll.u32 %v2513_v22, 16  ;;  %v2516_v62 = vld [vmem:[#allocation2 + $0x108] sm:$0xf] }
 0x295   : > { %4489 = vmatmul.mubr.bf16.gmra.mrb[116].mxu1 %v2111_v45  ;;  %v2443_v61 = vrot.slane %v2441_v48, 5  ;;  %v2448_v15 = vrot.slane %v2446_v47, 4  ;;  %v2451_v55 = vrot.slane %v2449_v7, 5  ;;  %v2749_v20 = vshrl.u32 %v2514_v46, 16 }
 0x296   : > { %4496 = vmatprep.mubr.bf16.mxu1 %v2436_v8  ;;  %v2743_v38 = vrot.slane %v2741_v33, 3  ;;  %v2746_v26 = vrot.slane %v2744_v21, 4  ;;  %v2752_v63 = vshll.u32 %v2514_v46, 16  ;;  %v2929_v49 = vrot.slane %v2851_v53, 4  ;;  %v2037_v8 = vld [vmem:[#allocation2 + $0x108] sm:$0xf] }
 0x297   : > { %v2444_v5 = vor.u32 %v2443_v61, %v2440_v3  ;;  %v2452_v11 = vor.u32 %v2451_v55, %v2448_v15  ;;  %v2751_v58 = vrot.slane %v2749_v20, 3  ;;  %v2930_v10 = vrot.slane %v2852_v4, 4  ;;  %v6869_v56 = vpop.f32.mrb[24].mxu1  ;;  %v2967_v46 = vld [vmem:[#allocation2 + $0x20] sm:$0xf0] }
 0x298   : > { %v2747_v29 = vor.u32 %v2746_v26, %v2743_v38  ;;  %v2754_v12 = vrot.slane %v2752_v63, 4  ;;  %v5333_v45 = vadd.f32 %v6789_v14, %v6783_v19  ;;  %v5439_v17 = vadd.f32 %v6806_v0, %v6803_v54  ;;  %v6875_v24 = vpop.f32.mrb[25].mxu1 }
 0x299   : > { %v2453_v51 = vsel %vm1365_vm2, %v2444_v5, %v2452_v11  ;;  %v2931_v18 = vsel %vm1252_vm0, %v2929_v49, %v2930_v10  ;;  %v5336_v59 = vadd.f32 %v6797_v37, %v6794_v25  ;;  %v5442_v22 = vadd.f32 %v6822_v23, %v6812_v9  ;;  %v6883_v42 = vpop.f32.mrb[26].mxu1  ;;  %v2968_v23 = vld [vmem:[#allocation2 + $0x28] sm:$0x1f]  ;;  %v2853_v49 = vld [vmem:[#allocation2 + $0x110] sm:$0xf0] }
 0x29a   : > { %4642 = vmatmul.mubr.bf16.gmra.mrb[144].mxu0 %v2739_v2  ;;  %v2755_v19 = vor.u32 %v2754_v12, %v2751_v58  ;;  %v4097_v14 = vadd.f32 %v5333_v45, %v6725_v32  ;;  %v6886_v54 = vadd.f32 %v5439_v17, %v4089_v31  ;;  %v2115_v0 = vrot.slane %v2036_v44, 4  ;;  %v6888_v48 = vpop.f32.mrb[27].mxu1  ;;  %v2969_v12 = vld [vmem:[#allocation2 + $0x30] sm:$0xf0] }
 0x29b   : > { %4649 = vmatprep.mubr.bf16.mxu0 %v2928_v16  ;;  %v4100_v47 = vadd.f32 %v5336_v59, %v6725_v32  ;;  %v6891_v25 = vadd.f32 %v5442_v22, %v4092_v57  ;;  %v2116_v37 = vrot.slane %v2037_v8, 4  ;;  %v2758_v9 = vshrl.u32 %v2515_v52, 16  ;;  %v2517_v22 = vld [vmem:[#allocation2 + $0x110] sm:$0xf8] }
 0x29c   : > { %v2756_v7 = vsel %vm883_vm1, %v2747_v29, %v2755_v19  ;;  %v2761_v2 = vshll.u32 %v2515_v52, 16  ;;  %v2766_v53 = vshrl.u32 %v2516_v62, 16  ;;  %v2769_v3 = vshll.u32 %v2516_v62, 16  ;;  %v6895_v61 = vpop.f32.mrb[52].mxu0  ;;  %v2854_v29 = vld [vmem:[#allocation2 + $0x118] sm:$0xf] }
 0x29d   : > { %4497 = vmatmul.mubr.bf16.gmra.mrb[120].mxu1 %v2114_v34  ;;  %v2117_v31 = vsel %vm1252_vm0, %v2115_v0, %v2116_v37  ;;  %v2760_v33 = vrot.slane %v2758_v9, 3  ;;  %v3000_v21 = vshrl.u32 %v2967_v46, 16  ;;  %v3003_v4 = vshll.u32 %v2967_v46, 16  ;;  %v6897_v20 = vpop.f32.mrb[53].mxu0 }
 0x29e   : > { %4504 = vmatprep.mubr.bf16.mxu1 %v2453_v51  ;;  %v2763_v16 = vrot.slane %v2761_v2, 4  ;;  %v2768_v57 = vrot.slane %v2766_v53, 3  ;;  %v2771_v15 = vrot.slane %v2769_v3, 4  ;;  %v3008_v55 = vshrl.u32 %v2968_v23, 16  ;;  %v6901_v5 = vpop.f32.mrb[54].mxu0 }
 0x29f   : > { %v3002_v38 = vrot.slane %v3000_v21, 4  ;;  %v3005_v26 = vrot.slane %v3003_v4, 5  ;;  %v3011_v63 = vshll.u32 %v2968_v23, 16  ;;  %v5339_v34 = vadd.f32 %v6833_v41, %v6830_v35  ;;  %v6905_v45 = vpop.f32.mrb[55].mxu0  ;;  %v2970_v41 = vld [vmem:[#allocation2 + $0x38] sm:$0x1f] }
 0x2a0   : > { %v2764_v11 = vor.u32 %v2763_v16, %v2760_v33  ;;  %v2772_v58 = vor.u32 %v2771_v15, %v2768_v57  ;;  %v3010_v10 = vrot.slane %v3008_v55, 4  ;;  %v5445_v44 = vadd.f32 %v6844_v13, %v6842_v60  ;;  %v2972_v33 = vld [vmem:[#allocation2 + $0x48] sm:$0x1f] }
 0x2a1   : > { %v3006_v17 = vor.u32 %v3005_v26, %v3002_v38  ;;  %v3013_v8 = vrot.slane %v3011_v63, 5  ;;  %v6908_v52 = vadd.f32 %v5339_v34, %v6725_v32  ;;  %v5342_v35 = vadd.f32 %v6839_v30, %v6837_v50  ;;  %v2518_v30 = vld [vmem:[#allocation2 + $0x118] sm:$0xf] }
 0x2a2   : > { %4650 = vmatmul.mubr.bf16.gmra.mrb[148].mxu0 %v2756_v7  ;;  %v2773_v51 = vsel %vm883_vm1, %v2764_v11, %v2772_v58  ;;  %v6913_v59 = vadd.f32 %v5445_v44, %v4097_v14  ;;  %v5448_v60 = vadd.f32 %v6858_v6, %v6850_v28  ;;  %v2932_v13 = vrot.slane %v2853_v49, 4  ;;  %v2971_v28 = vld [vmem:[#allocation2 + $0x40] sm:$0xf0] }
 0x2a3   : > { %v6917_v62 = vpop.f32.mrb[28].mxu1  ;;  %4657 = vmatprep.mubr.bf16.mxu0 %v2931_v18  ;;  %v3014_v19 = vor.u32 %v3013_v8, %v3010_v10  ;;  %v6920_v0 = vadd.f32 %v5342_v35, %v6725_v32  ;;  %v2933_v46 = vrot.slane %v2854_v29, 4  ;;  %v3017_v50 = vshrl.u32 %v2969_v12, 16 }
 0x2a4   : > { %v6922_v37 = vpop.f32.mrb[29].mxu1  ;;  %v6924_v9 = vadd.f32 %v5448_v60, %v4100_v47  ;;  %v3020_v14 = vshll.u32 %v2969_v12, 16  ;;  %v3025_v23 = vshrl.u32 %v2970_v41, 16  ;;  %v3028_v7 = vshll.u32 %v2970_v41, 16 }
 0x2a5   : > { %v6926_v6 = vpop.f32.mrb[30].mxu1  ;;  %4505 = vmatmul.mubr.bf16.gmra.mrb[124].mxu1 %v2117_v31  ;;  %v3015_v18 = vsel %vm1365_vm2, %v3006_v17, %v3014_v19  ;;  %v2934_v2 = vsel %vm1252_vm0, %v2932_v13, %v2933_v46  ;;  %v3019_v53 = vrot.slane %v3017_v50, 4  ;;  %v2775_v3 = vshrl.u32 %v2517_v22, 16 }
 0x2a6   : > { %v6930_v21 = vpop.f32.mrb[31].mxu1  ;;  %5827 = vmatprep.mubr.bf16.mxu1 %v3015_v18  ;;  %v3022_v4 = vrot.slane %v3020_v14, 5  ;;  %v3027_v47 = vrot.slane %v3025_v23, 4  ;;  %v3030_v16 = vrot.slane %v3028_v7, 5  ;;  %v2778_v57 = vshll.u32 %v2517_v22, 16  ;;  %v6932_v15 = vpop.f32.mrb[56].mxu0 }
 0x2a7   : > { %v2777_v55 = vrot.slane %v2775_v3, 3  ;;  %v2783_v38 = vshrl.u32 %v2518_v30, 16  ;;  %v2786_v26 = vshll.u32 %v2518_v30, 16  ;;  %v3034_v31 = vshrl.u32 %v2971_v28, 16  ;;  %v5456_v63 = vpop.f32.mrb[57].mxu0 }
 0x2a8   : > { %v3023_v34 = vor.u32 %v3022_v4, %v3019_v53  ;;  %v3031_v49 = vor.u32 %v3030_v16, %v3027_v47  ;;  %v2780_v11 = vrot.slane %v2778_v57, 4  ;;  %v3037_v58 = vshll.u32 %v2971_v28, 16  ;;  %v5458_v10 = vpop.f32.mrb[58].mxu0  ;;  %v2973_v22 = vld [vmem:[#allocation2 + $0x50] sm:$0xf0] }
 0x2a9   : > { %v2785_v44 = vrot.slane %v2783_v38, 3  ;;  %v2788_v29 = vrot.slane %v2786_v26, 4  ;;  %v3036_v12 = vrot.slane %v3034_v31, 4  ;;  %v3042_v17 = vshrl.u32 %v2972_v33, 16  ;;  %v5459_v8 = vpop.f32.mrb[59].mxu0 }
 0x2aa   : > { %4658 = vmatmul.mubr.bf16.gmra.mrb[152].mxu0 %v2773_v51  ;;  %v3032_v35 = vsel %vm1365_vm2, %v3023_v34, %v3031_v49  ;;  %v2781_v41 = vor.u32 %v2780_v11, %v2777_v55  ;;  %v3039_v60 = vrot.slane %v3037_v58, 5  ;;  %v3045_v13 = vshll.u32 %v2972_v33, 16  ;;  %v2974_v28 = vld [vmem:[#allocation2 + $0x58] sm:$0x1f]  ;;  %v2975_v18 = vld [vmem:[#allocation2 + $0x60] sm:$0xf0] }
 0x2ab   : > { %4665 = vmatprep.mubr.bf16.mxu0 %v2934_v2  ;;  %v2789_v19 = vor.u32 %v2788_v29, %v2785_v44  ;;  %v3044_v46 = vrot.slane %v3042_v17, 4  ;;  %v5345_v50 = vadd.f32 %v6875_v24, %v6869_v56  ;;  %v5451_v30 = vadd.f32 %v6897_v20, %v6895_v61  ;;  %v2976_v24 = vld [vmem:[#allocation2 + $0x68] sm:$0x1f] }
 0x2ac   : > { %v3040_v14 = vor.u32 %v3039_v60, %v3036_v12  ;;  %v3047_v23 = vrot.slane %v3045_v13, 5  ;;  %v5348_v51 = vadd.f32 %v6888_v48, %v6883_v42  ;;  %v5454_v7 = vadd.f32 %v6905_v45, %v6901_v5  ;;  %v2978_v60 = vld [vmem:[#allocation2 + $0x78] sm:$0x1f] }
 0x2ad   : > { %5828 = vmatmul.mubr.bf16.vlgmr.msra.gmra.mrb[128].mxu1 %v3032_v35  ;;  %v2790_v2 = vsel %vm883_vm1, %v2781_v41, %v2789_v19  ;;  %v6945_v53 = vadd.f32 %v5451_v30, %v6908_v52  ;;  %v3051_v56 = vshrl.u32 %v2973_v22, 16  ;;  %v4113_v61 = vadd.f32 %v5345_v50, %v6725_v32  ;;  %v2977_v52 = vld [vmem:[#allocation2 + $0x70] sm:$0xf0]  ;;  %v2979_v30 = vld [vmem:[#allocation2 + $0x80] sm:$0xf0] }
 0x2ae   : > { %v3048_v3 = vor.u32 %v3047_v23, %v3044_v46  ;;  %v6949_v20 = vadd.f32 %v5454_v7, %v6920_v0  ;;  %v3054_v42 = vshll.u32 %v2973_v22, 16  ;;  %v3059_v33 = vshrl.u32 %v2974_v28, 16  ;;  %v2980_v7 = vld [vmem:[#allocation2 + $0x88] sm:$0x1f] }
 0x2af   : > { %v3053_v48 = vrot.slane %v3051_v56, 4  ;;  %v3062_v5 = vshll.u32 %v2974_v28, 16  ;;  %v3068_v45 = vshrl.u32 %v2975_v18, 16  ;;  %v3071_v16 = vshll.u32 %v2975_v18, 16 }
 0x2b0   : > { %v3049_v4 = vsel %vm1365_vm2, %v3040_v14, %v3048_v3  ;;  %v3056_v47 = vrot.slane %v3054_v42, 5  ;;  %v3076_v57 = vshrl.u32 %v2976_v24, 16  ;;  %v5355_v55 = vpop.f32.mrb[32].mxu1  ;;  %v3061_v38 = vrot.slane %v3059_v33, 4 }
 0x2b1   : > { %5831 = vmatprep.mubr.bf16.mxu1 %v3049_v4  ;;  %v3064_v26 = vrot.slane %v3062_v5, 5  ;;  %v3070_v31 = vrot.slane %v3068_v45, 4  ;;  %v3079_v34 = vshll.u32 %v2976_v24, 16  ;;  %v5356_v49 = vpop.f32.mrb[33].mxu1  ;;  %v3073_v11 = vrot.slane %v3071_v16, 5 }
 0x2b2   : > { %4666 = vmatmul.mubr.bf16.gmra.mrb[156].mxu0 %v2790_v2  ;;  %v3057_v0 = vor.u32 %v3056_v47, %v3053_v48  ;;  %v3078_v58 = vrot.slane %v3076_v57, 4  ;;  %v5351_v44 = vadd.f32 %v6922_v37, %v6917_v62  ;;  %v5358_v29 = vpop.f32.mrb[34].mxu1  ;;  %v5457_v35 = vadd.f32 %v5456_v63, %v6932_v15  ;;  %v2981_v47 = vld [vmem:[#allocation2 + $0x90] sm:$0xf0] }
 0x2b3   : > { %v3065_v12 = vor.u32 %v3064_v26, %v3061_v38  ;;  %v3081_v17 = vrot.slane %v3079_v34, 5  ;;  %v5354_v41 = vadd.f32 %v6930_v21, %v6926_v6  ;;  %v5359_v13 = vpop.f32.mrb[35].mxu1  ;;  %v4116_v22 = vadd.f32 %v5348_v51, %v6725_v32  ;;  %v2982_v26 = vld [vmem:[#allocation2 + $0x98] sm:$0x1f] }
 0x2b4   : > { %v3074_v19 = vor.u32 %v3073_v11, %v3070_v31  ;;  %v5460_v46 = vadd.f32 %v5459_v8, %v5458_v10  ;;  %v3085_v50 = vshrl.u32 %v2977_v52, 16  ;;  %v4121_v62 = vadd.f32 %v5351_v44, %v6725_v32 }
 0x2b5   : > { %v3066_v14 = vsel %vm1365_vm2, %v3057_v0, %v3065_v12  ;;  %v3082_v23 = vor.u32 %v3081_v17, %v3078_v58  ;;  %v6960_v37 = vadd.f32 %v5457_v35, %v4113_v61  ;;  %v3088_v21 = vshll.u32 %v2977_v52, 16  ;;  %v5461_v28 = vpop.f32.mrb[60].mxu0 }
 0x2b6   : > { %5832 = vmatmul.mubr.bf16.gmra.mrb[132].mxu1 %v3066_v14  ;;  %v6962_v15 = vadd.f32 %v5460_v46, %v4116_v22  ;;  %v3087_v6 = vrot.slane %v3085_v50, 4  ;;  %v3093_v63 = vshrl.u32 %v2978_v60, 16  ;;  %v3096_v10 = vshll.u32 %v2978_v60, 16  ;;  %v5462_v2 = vpop.f32.mrb[61].mxu0  ;;  %v2983_v60 = vld [vmem:[#allocation2 + $0xa0] sm:$0xf0] }
 0x2b7   : > { %v3083_v51 = vsel %vm1365_vm2, %v3074_v19, %v3082_v23  ;;  %v3102_v8 = vshrl.u32 %v2979_v30, 16  ;;  %v3105_v18 = vshll.u32 %v2979_v30, 16  ;;  %v3090_v56 = vrot.slane %v3088_v21, 5  ;;  %v5464_v42 = vpop.f32.mrb[62].mxu0  ;;  %v2984_v50 = vld [vmem:[#allocation2 + $0xa8] sm:$0x1f] }
 0x2b8   : > { %5835 = vmatprep.mubr.bf16.mxu1 %v3083_v51  ;;  %v3095_v24 = vrot.slane %v3093_v63, 4  ;;  %v3110_v3 = vshrl.u32 %v2980_v7, 16  ;;  %v3113_v61 = vshll.u32 %v2980_v7, 16  ;;  %v3098_v48 = vrot.slane %v3096_v10, 5  ;;  %v5465_v4 = vpop.f32.mrb[63].mxu0 }
 0x2b9   : > { %v3104_v33 = vrot.slane %v3102_v8, 4  ;;  %v3107_v5 = vrot.slane %v3105_v18, 5  ;;  %v5357_v45 = vadd.f32 %v5356_v49, %v5355_v55  ;;  %v3091_v16 = vor.u32 %v3090_v56, %v3087_v6 }
 0x2ba   : > { %v3112_v57 = vrot.slane %v3110_v3, 4  ;;  %v3115_v52 = vrot.slane %v3113_v61, 5  ;;  %v5463_v38 = vadd.f32 %v5462_v2, %v5461_v28  ;;  %v4124_v31 = vadd.f32 %v5354_v41, %v6725_v32 }
 0x2bb   : > { %v3099_v34 = vor.u32 %v3098_v48, %v3095_v24  ;;  %v3108_v0 = vor.u32 %v3107_v5, %v3104_v33  ;;  %v5360_v11 = vadd.f32 %v5359_v13, %v5358_v29  ;;  %v5466_v17 = vadd.f32 %v5465_v4, %v5464_v42  ;;  %v2985_v42 = vld [vmem:[#allocation2 + $0xb0] sm:$0xf0] }
 0x2bc   : > { %v5361_v58 = vpop.f32.mrb[36].mxu1  ;;  %v3116_v44 = vor.u32 %v3115_v52, %v3112_v57  ;;  %v6966_v12 = vadd.f32 %v5463_v38, %v4121_v62  ;;  %v3119_v35 = vshrl.u32 %v2981_v47, 16  ;;  %v4129_v22 = vadd.f32 %v5357_v45, %v6725_v32 }
 0x2bd   : > { %v5362_v55 = vpop.f32.mrb[37].mxu1  ;;  %v3100_v49 = vsel %vm1365_vm2, %v3091_v16, %v3099_v34  ;;  %v3122_v19 = vshll.u32 %v2981_v47, 16  ;;  %v3127_v46 = vshrl.u32 %v2982_v26, 16  ;;  %v6971_v29 = vadd.f32 %v5466_v17, %v4124_v31  ;;  %v2986_v47 = vld [vmem:[#allocation2 + $0xb8] sm:$0x1f] }
 0x2be   : > { %v5364_v30 = vpop.f32.mrb[38].mxu1  ;;  %5836 = vmatmul.mubr.bf16.gmra.mrb[136].mxu1 %v3100_v49  ;;  %v3117_v41 = vsel %vm1365_vm2, %v3108_v0, %v3116_v44  ;;  %v3121_v13 = vrot.slane %v3119_v35, 4  ;;  %v3130_v14 = vshll.u32 %v2982_v26, 16  ;;  %v3136_v6 = vshrl.u32 %v2983_v60, 16  ;;  %v2987_v26 = vld [vmem:[#allocation2 + $0xc0] sm:$0xf0] }
 0x2bf   : > { %v5365_v23 = vpop.f32.mrb[39].mxu1  ;;  %5839 = vmatprep.mubr.bf16.mxu1 %v3117_v41  ;;  %v3124_v62 = vrot.slane %v3122_v19, 5  ;;  %v3129_v7 = vrot.slane %v3127_v46, 4  ;;  %v3139_v21 = vshll.u32 %v2983_v60, 16  ;;  %v5467_v63 = vpop.f32.mrb[64].mxu0  ;;  %v3144_v51 = vshrl.u32 %v2984_v50, 16 }
 0x2c0   : > { %v3132_v28 = vrot.slane %v3130_v14, 5  ;;  %v3147_v10 = vshll.u32 %v2984_v50, 16  ;;  %v6973_v8 = vadd.f32 %v5362_v55, %v5361_v58  ;;  %v5468_v18 = vpop.f32.mrb[65].mxu0  ;;  %v3138_v56 = vrot.slane %v3136_v6, 4  ;;  %v2988_v58 = vld [vmem:[#allocation2 + $0xc8] sm:$0x1f] }
 0x2c1   : > { %v3125_v2 = vor.u32 %v3124_v62, %v3121_v13  ;;  %v3141_v24 = vrot.slane %v3139_v21, 5  ;;  %v5469_v3 = vadd.f32 %v5468_v18, %v5467_v63  ;;  %v5470_v61 = vpop.f32.mrb[66].mxu0  ;;  %v4132_v48 = vadd.f32 %v5360_v11, %v6725_v32  ;;  %v2989_v35 = vld [vmem:[#allocation2 + $0xd0] sm:$0xf0]  ;;  %v2990_v41 = vld [vmem:[#allocation2 + $0xd8] sm:$0x1f] }
 0x2c2   : > { %v3133_v33 = vor.u32 %v3132_v28, %v3129_v7  ;;  %v3146_v5 = vrot.slane %v3144_v51, 4  ;;  %v3149_v45 = vrot.slane %v3147_v10, 5  ;;  %v5471_v4 = vpop.f32.mrb[67].mxu0  ;;  %v6978_v52 = vadd.f32 %v5365_v23, %v5364_v30  ;;  %v2991_v51 = vld [vmem:[#allocation2 + $0xe0] sm:$0xf0] }
 0x2c3   : > { %v3142_v16 = vor.u32 %v3141_v24, %v3138_v56  ;;  %v6976_v57 = vadd.f32 %v5469_v3, %v4129_v22  ;;  %v5472_v38 = vadd.f32 %v5471_v4, %v5470_v61  ;;  %v3153_v34 = vshrl.u32 %v2985_v42, 16 }
 0x2c4   : > { %v3150_v31 = vor.u32 %v3149_v45, %v3146_v5  ;;  %v3156_v0 = vshll.u32 %v2985_v42, 16  ;;  %v3134_v44 = vsel %vm1365_vm2, %v3125_v2, %v3133_v33  ;;  %v3161_v32 = vshrl.u32 %v2986_v47, 16  ;;  %v2992_v33 = vld [vmem:[#allocation2 + $0xe8] sm:$0x1f] }
 0x2c5   : > { %v6981_v17 = vadd.f32 %v5472_v38, %v4132_v48  ;;  %v3164_v11 = vshll.u32 %v2986_v47, 16  ;;  %v3155_v55 = vrot.slane %v3153_v34, 4  ;;  %v3170_v22 = vshrl.u32 %v2987_v26, 16 }
 0x2c6   : > { %5840 = vmatmul.mubr.bf16.gmra.mrb[140].mxu1 %v3134_v44  ;;  %v3151_v60 = vsel %vm1365_vm2, %v3142_v16, %v3150_v31  ;;  %v3158_v49 = vrot.slane %v3156_v0, 5  ;;  %v3163_v19 = vrot.slane %v3161_v32, 4  ;;  %v3173_v50 = vshll.u32 %v2987_v26, 16  ;;  %v2993_v0 = vld [vmem:[#allocation2 + $0xf0] sm:$0xf0] }
 0x2c7   : > { %5843 = vmatprep.mubr.bf16.mxu1 %v3151_v60  ;;  %v3166_v46 = vrot.slane %v3164_v11, 5  ;;  %v3178_v30 = vshrl.u32 %v2988_v58, 16  ;;  %v3172_v14 = vrot.slane %v3170_v22, 4  ;;  %v3181_v23 = vshll.u32 %v2988_v58, 16  ;;  %v2994_v58 = vld [vmem:[#allocation2 + $0xf8] sm:$0x1f] }
 0x2c8   : > { %v3159_v13 = vor.u32 %v3158_v49, %v3155_v55  ;;  %v3187_v62 = vshrl.u32 %v2989_v35, 16  ;;  %v3175_v6 = vrot.slane %v3173_v50, 5  ;;  %v3190_v28 = vshll.u32 %v2989_v35, 16  ;;  %v2995_v22 = vld [vmem:[#allocation2 + $0x100] sm:$0xf0] }
 0x2c9   : > { %v3167_v7 = vor.u32 %v3166_v46, %v3163_v19  ;;  %v3180_v21 = vrot.slane %v3178_v30, 4  ;;  %v5367_v63 = vpop.f32.mrb[40].mxu1  ;;  %v3183_v10 = vrot.slane %v3181_v23, 5  ;;  %v3195_v56 = vshrl.u32 %v2990_v41, 16 }
 0x2ca   : > { %v5368_v18 = vpop.f32.mrb[41].mxu1  ;;  %v3189_v2 = vrot.slane %v3187_v62, 4  ;;  %v3198_v24 = vshll.u32 %v2990_v41, 16  ;;  %v3176_v3 = vor.u32 %v3175_v6, %v3172_v14  ;;  %v3192_v48 = vrot.slane %v3190_v28, 5 }
 0x2cb   : > { %v6984_v61 = vadd.f32 %v5368_v18, %v5367_v63  ;;  %v5370_v42 = vpop.f32.mrb[42].mxu1  ;;  %v3184_v5 = vor.u32 %v3183_v10, %v3180_v21  ;;  %v3197_v4 = vrot.slane %v3195_v56, 4  ;;  %v3204_v16 = vshrl.u32 %v2991_v51, 16  ;;  %v2996_v21 = vld [vmem:[#allocation2 + $0x108] sm:$0x1f] }
 0x2cc   : > { %v5371_v45 = vpop.f32.mrb[43].mxu1  ;;  %v3200_v47 = vrot.slane %v3198_v24, 5  ;;  %v3168_v38 = vsel %vm1365_vm2, %v3159_v13, %v3167_v7  ;;  %v3193_v31 = vor.u32 %v3192_v48, %v3189_v2  ;;  %v3207_v34 = vshll.u32 %v2991_v51, 16  ;;  %v6993_v13 = vld [vmem:[%s7297_s4] ss:$0 sm:$0xff] }
 0x2cd   : > { %v6987_v26 = vadd.f32 %v5371_v45, %v5370_v42  ;;  %v3185_v44 = vsel %vm1365_vm2, %v3176_v3, %v3184_v5  ;;  %v3206_v11 = vrot.slane %v3204_v16, 4  ;;  %v3212_v35 = vshrl.u32 %v2992_v33, 16  ;;  %v2997_v42 = vld [vmem:[#allocation2 + $0x110] sm:$0xf0] }
 0x2ce   : > { %5844 = vmatmul.mubr.bf16.gmra.mrb[144].mxu1 %v3168_v38  ;;  %v3201_v32 = vor.u32 %v3200_v47, %v3197_v4  ;;  %v5473_v60 = vpop.f32.mrb[68].mxu0  ;;  %v3209_v55 = vrot.slane %v3207_v34, 5  ;;  %v3215_v49 = vshll.u32 %v2992_v33, 16  ;;  %v3221_v50 = vshrl.u32 %v2993_v0, 16 }
 0x2cf   : > { %5847 = vmatprep.mubr.bf16.mxu1 %v3185_v44  ;;  %v5474_v19 = vpop.f32.mrb[69].mxu0  ;;  %v3214_v46 = vrot.slane %v3212_v35, 4  ;;  %v3224_v30 = vshll.u32 %v2993_v0, 16  ;;  %v3229_v41 = vshrl.u32 %v2994_v58, 16  ;;  %v4137_v14 = vadd.f32 %v6993_v13, %v6973_v8  ;;  %v2998_v8 = vld [vmem:[#allocation2 + $0x118] sm:$0x1f] }
 0x2d0   : > { %v4140_v23 = vadd.f32 %v6993_v13, %v6978_v52  ;;  %v5475_v62 = vadd.f32 %v5474_v19, %v5473_v60  ;;  %v5476_v7 = vpop.f32.mrb[70].mxu0  ;;  %v3217_v6 = vrot.slane %v3215_v49, 5  ;;  %v3202_v28 = vsel %vm1365_vm2, %v3193_v31, %v3201_v32 }
 0x2d1   : > { %v5477_v63 = vpop.f32.mrb[71].mxu0  ;;  %v3210_v51 = vor.u32 %v3209_v55, %v3206_v11  ;;  %v3232_v10 = vshll.u32 %v2994_v58, 16  ;;  %v3238_v18 = vshrl.u32 %v2995_v22, 16  ;;  %v3241_v3 = vshll.u32 %v2995_v22, 16 }
 0x2d2   : > { %v7000_v2 = vadd.f32 %v5475_v62, %v4137_v14  ;;  %v5478_v56 = vadd.f32 %v5477_v63, %v5476_v7  ;;  %v3218_v24 = vor.u32 %v3217_v6, %v3214_v46  ;;  %v3223_v33 = vrot.slane %v3221_v50, 4 }
 0x2d3   : > { %v3226_v52 = vrot.slane %v3224_v30, 5  ;;  %v3231_v5 = vrot.slane %v3229_v41, 4  ;;  %v3246_v45 = vshrl.u32 %v2996_v21, 16  ;;  %v3234_v16 = vrot.slane %v3232_v10, 5 }
 0x2d4   : > { %v7002_v4 = vadd.f32 %v5478_v56, %v4140_v23  ;;  %v3240_v38 = vrot.slane %v3238_v18, 4  ;;  %v3249_v31 = vshll.u32 %v2996_v21, 16  ;;  %v3219_v34 = vsel %vm1365_vm2, %v3210_v51, %v3218_v24 }
 0x2d5   : > { %v5373_v48 = vpop.f32.mrb[44].mxu1  ;;  %v3243_v44 = vrot.slane %v3241_v3, 5  ;;  %v3248_v32 = vrot.slane %v3246_v45, 4  ;;  %v3255_v60 = vshrl.u32 %v2997_v42, 16  ;;  %v3258_v55 = vshll.u32 %v2997_v42, 16 }
 0x2d6   : > { %v5374_v47 = vpop.f32.mrb[45].mxu1  ;;  %5848 = vmatmul.mubr.bf16.gmra.mrb[148].mxu1 %v3202_v28  ;;  %v3251_v35 = vrot.slane %v3249_v31, 5  ;;  %v3263_v49 = vshrl.u32 %v2998_v8, 16  ;;  %v3227_v50 = vor.u32 %v3226_v52, %v3223_v33  ;;  %v3235_v30 = vor.u32 %v3234_v16, %v3231_v5 }
 0x2d7   : > { %v5375_v0 = vadd.f32 %v5374_v47, %v5373_v48  ;;  %v5376_v58 = vpop.f32.mrb[46].mxu1  ;;  %5851 = vmatprep.mubr.bf16.mxu1 %v3219_v34  ;;  %v3266_v41 = vshll.u32 %v2998_v8, 16  ;;  %v4145_v14 = vadd.f32 %v6993_v13, %v6984_v61  ;;  %v3244_v7 = vor.u32 %v3243_v44, %v3240_v38 }
 0x2d8   : > { %v5377_v11 = vpop.f32.mrb[47].mxu1  ;;  %v5479_v22 = vpop.f32.mrb[72].mxu0  ;;  %v3252_v6 = vor.u32 %v3251_v35, %v3248_v32  ;;  %v3257_v63 = vrot.slane %v3255_v60, 4  ;;  %v3260_v28 = vrot.slane %v3258_v55, 5  ;;  %v3265_v51 = vrot.slane %v3263_v49, 4 }
 0x2d9   : > { %v5378_v19 = vadd.f32 %v5377_v11, %v5376_v58  ;;  %v5480_v46 = vpop.f32.mrb[73].mxu0  ;;  %v3268_v10 = vrot.slane %v3266_v41, 5  ;;  %v4148_v18 = vadd.f32 %v6993_v13, %v6987_v26  ;;  %v3236_v3 = vsel %vm1365_vm2, %v3227_v50, %v3235_v30 }
 0x2da   : > { %v5481_v23 = vadd.f32 %v5480_v46, %v5479_v22  ;;  %v5482_v62 = vpop.f32.mrb[74].mxu0  ;;  %v3253_v61 = vsel %vm1365_vm2, %v3244_v7, %v3252_v6  ;;  %v3261_v5 = vor.u32 %v3260_v28, %v3257_v63  ;;  %v4153_v31 = vadd.f32 %v6993_v13, %v5375_v0 }
 0x2db   : > { %v5483_v21 = vpop.f32.mrb[75].mxu0  ;;  %v3269_v45 = vor.u32 %v3268_v10, %v3265_v51  ;;  %v4156_v11 = vadd.f32 %v6993_v13, %v5378_v19 }
 0x2dc   : > { %v7009_v56 = vadd.f32 %v5481_v23, %v4145_v14  ;;  %v5484_v24 = vadd.f32 %v5483_v21, %v5482_v62 }
 0x2dd   : > { %v5379_v42 = vpop.f32.mrb[48].mxu1  ;;  %v3270_v44 = vsel %vm1365_vm2, %v3261_v5, %v3269_v45 }
 0x2de   : > { %v7012_v8 = vadd.f32 %v5484_v24, %v4148_v18  ;;  %5852 = vmatmul.mubr.bf16.gmra.mrb[152].mxu1 %v3236_v3  ;;  %v5380_v48 = vpop.f32.mrb[49].mxu1 }
 0x2df   : > { %5855 = vmatprep.mubr.bf16.mxu1 %v3253_v61  ;;  %v5381_v33 = vadd.f32 %v5380_v48, %v5379_v42  ;;  %v5382_v52 = vpop.f32.mrb[50].mxu1 }
 0x2e0   : > { %v5383_v47 = vpop.f32.mrb[51].mxu1 }
 0x2e1   : > { %v5485_v16 = vpop.f32.mrb[76].mxu0  ;;  %v5384_v26 = vadd.f32 %v5383_v47, %v5382_v52  ;;  %v4161_v23 = vadd.f32 %v6993_v13, %v5381_v33 }
 0x2e2   : > { %v5486_v38 = vpop.f32.mrb[77].mxu0 }
 0x2e3   : > { %v5487_v34 = vadd.f32 %v5486_v38, %v5485_v16  ;;  %v5488_v58 = vpop.f32.mrb[78].mxu0  ;;  %v4164_v19 = vadd.f32 %v6993_v13, %v5384_v26 }
 0x2e4   : > { %v5489_v32 = vpop.f32.mrb[79].mxu0 }
 0x2e5   : > { %v7018_v35 = vadd.f32 %v5487_v34, %v4153_v31  ;;  %v5490_v60 = vadd.f32 %v5489_v32, %v5488_v58 }
 0x2e6   : > { %5856 = vmatmul.mubr.bf16.gmra.mrb[156].mxu1 %v3270_v44  ;;  %v5385_v55 = vpop.f32.mrb[52].mxu1 }
 0x2e7   : > { %v7020_v49 = vadd.f32 %v5490_v60, %v4156_v11  ;;  %v5386_v22 = vpop.f32.mrb[53].mxu1 }
 0x2e8   : > { %v5387_v46 = vadd.f32 %v5386_v22, %v5385_v55  ;;  %v5388_v50 = vpop.f32.mrb[54].mxu1 }
 0x2e9   : > { %v5389_v30 = vpop.f32.mrb[55].mxu1 }
 0x2ea   : > { %v5491_v41 = vpop.f32.mrb[80].mxu0  ;;  %v5390_v0 = vadd.f32 %v5389_v30, %v5388_v50  ;;  %v4169_v33 = vadd.f32 %v6993_v13, %v5387_v46 }
 0x2eb   : > { %v5492_v14 = vpop.f32.mrb[81].mxu0 }
 0x2ec   : > { %v5493_v62 = vadd.f32 %v5492_v14, %v5491_v41  ;;  %v5494_v7 = vpop.f32.mrb[82].mxu0  ;;  %v4172_v47 = vadd.f32 %v6993_v13, %v5390_v0 }
 0x2ed   : > { %v5495_v6 = vpop.f32.mrb[83].mxu0 }
 0x2ee   : > { %v7024_v21 = vadd.f32 %v5493_v62, %v4161_v23  ;;  %v5496_v63 = vadd.f32 %v5495_v6, %v5494_v7 }
 0x2ef   : > { %v5391_v28 = vpop.f32.mrb[56].mxu1 }
 0x2f0   : > { %v7026_v51 = vadd.f32 %v5496_v63, %v4164_v19  ;;  %v5392_v10 = vpop.f32.mrb[57].mxu1 }
 0x2f1   : > { %v5393_v18 = vadd.f32 %v5392_v10, %v5391_v28  ;;  %v5394_v24 = vpop.f32.mrb[58].mxu1 }
 0x2f2   : > { %v5395_v3 = vpop.f32.mrb[59].mxu1 }
 0x2f3   : > { %v5497_v42 = vpop.f32.mrb[84].mxu0  ;;  %v5396_v61 = vadd.f32 %v5395_v3, %v5394_v24  ;;  %v4177_v22 = vadd.f32 %v6993_v13, %v5393_v18 }
 0x2f4   : > { %v5498_v48 = vpop.f32.mrb[85].mxu0 }
 0x2f5   : > { %v5499_v52 = vadd.f32 %v5498_v48, %v5497_v42  ;;  %v5500_v5 = vpop.f32.mrb[86].mxu0  ;;  %v4180_v41 = vadd.f32 %v6993_v13, %v5396_v61 }
 0x2f6   : > { %v5501_v45 = vpop.f32.mrb[87].mxu0 }
 0x2f7   : > { %v7030_v16 = vadd.f32 %v5499_v52, %v4169_v33  ;;  %v5502_v26 = vadd.f32 %v5501_v45, %v5500_v5 }
 0x2f8   : > { %v5397_v38 = vpop.f32.mrb[60].mxu1 }
 0x2f9   : > { %v7032_v31 = vadd.f32 %v5502_v26, %v4172_v47  ;;  %v5398_v34 = vpop.f32.mrb[61].mxu1 }
 0x2fa   : > { %v5399_v58 = vadd.f32 %v5398_v34, %v5397_v38  ;;  %v5400_v44 = vpop.f32.mrb[62].mxu1 }
 0x2fb   : > { %v5503_v32 = vpop.f32.mrb[88].mxu0  ;;  %v5401_v11 = vpop.f32.mrb[63].mxu1 }
 0x2fc   : > { %v5504_v60 = vpop.f32.mrb[89].mxu0  ;;  %v5402_v55 = vadd.f32 %v5401_v11, %v5400_v44  ;;  %v4185_v3 = vadd.f32 %v6993_v13, %v5399_v58 }
 0x2fd   : > { %v5505_v46 = vadd.f32 %v5504_v60, %v5503_v32  ;;  %v5506_v50 = vpop.f32.mrb[90].mxu0 }
 0x2fe   : > { %v5507_v30 = vpop.f32.mrb[91].mxu0  ;;  %v4188_v52 = vadd.f32 %v6993_v13, %v5402_v55 }
 0x2ff   : > { %v7036_v0 = vadd.f32 %v5505_v46, %v4177_v22  ;;  %v5508_v14 = vadd.f32 %v5507_v30, %v5506_v50 }
 0x300   : > { %v5531_v23 = vpop.f32.mrb[64].mxu1 }
 0x301   : > { %v7038_v62 = vadd.f32 %v5508_v14, %v4180_v41  ;;  %v5532_v7 = vpop.f32.mrb[65].mxu1 }
 0x302   : > { %v5533_v6 = vadd.f32 %v5532_v7, %v5531_v23  ;;  %v5534_v19 = vpop.f32.mrb[66].mxu1 }
 0x303   : > { %v5535_v63 = vpop.f32.mrb[67].mxu1 }
 0x304   : > { %v5509_v28 = vpop.f32.mrb[92].mxu0  ;;  %v4387_v10 = vadd.f32 %v5533_v6, %v6787_v1  ;;  %v5536_v24 = vadd.f32 %v5535_v63, %v5534_v19 }
 0x305   : > { %v5510_v18 = vpop.f32.mrb[93].mxu0 }
 0x306   : > { %v5511_v42 = vadd.f32 %v5510_v18, %v5509_v28  ;;  %v5512_v48 = vpop.f32.mrb[94].mxu0  ;;  %v4390_v61 = vadd.f32 %v5536_v24, %v6792_v27 }
 0x307   : > { %v5513_v33 = vpop.f32.mrb[95].mxu0 }
 0x308   : > { %v7044_v5 = vadd.f32 %v5511_v42, %v4185_v3  ;;  %v5514_v45 = vadd.f32 %v5513_v33, %v5512_v48  ;;  %v5537_v47 = vpop.f32.mrb[68].mxu1 }
 0x309   : > { %v5538_v26 = vpop.f32.mrb[69].mxu1 }
 0x30a   : > { %v7046_v38 = vadd.f32 %v5514_v45, %v4188_v52  ;;  %v5539_v34 = vadd.f32 %v5538_v26, %v5537_v47  ;;  %v5540_v1 = vpop.f32.mrb[70].mxu1 }
 0x30b   : > { %v5541_v44 = vpop.f32.mrb[71].mxu1 }
 0x30c   : > { %v4395_v32 = vadd.f32 %v5539_v34, %v6825_v39  ;;  %v5542_v58 = vadd.f32 %v5541_v44, %v5540_v1 }
 0x30d   : > { %v5643_v11 = vpop.f32.mrb[96].mxu0 }
 0x30e   : > { %v5644_v60 = vpop.f32.mrb[97].mxu0  ;;  %v4398_v27 = vadd.f32 %v5542_v58, %v6828_v36 }
 0x30f   : > { %v5645_v22 = vadd.f32 %v5644_v60, %v5643_v11  ;;  %v5646_v46 = vpop.f32.mrb[98].mxu0 }
 0x310   : > { %v5647_v13 = vpop.f32.mrb[99].mxu0  ;;  %v5543_v55 = vpop.f32.mrb[72].mxu1 }
 0x311   : > { %v5648_v50 = vadd.f32 %v5647_v13, %v5646_v46  ;;  %v5544_v30 = vpop.f32.mrb[73].mxu1  ;;  %v7050_v41 = vadd.f32 %v5645_v22, %v4387_v10 }
 0x312   : > { %v5545_v14 = vadd.f32 %v5544_v30, %v5543_v55  ;;  %v5546_v23 = vpop.f32.mrb[74].mxu1 }
 0x313   : > { %v5547_v7 = vpop.f32.mrb[75].mxu1  ;;  %v7052_v6 = vadd.f32 %v5648_v50, %v4390_v61 }
 0x314   : > { %v4403_v39 = vadd.f32 %v5545_v14, %v6861_v40  ;;  %v5548_v19 = vadd.f32 %v5547_v7, %v5546_v23 }
 0x315   : > { %v5649_v63 = vpop.f32.mrb[100].mxu0 }
 0x316   : > { %v5650_v28 = vpop.f32.mrb[101].mxu0  ;;  %v4406_v36 = vadd.f32 %v5548_v19, %v6864_v43 }
 0x317   : > { %v5651_v24 = vadd.f32 %v5650_v28, %v5649_v63  ;;  %v5652_v18 = vpop.f32.mrb[102].mxu0 }
 0x318   : > { %v5653_v3 = vpop.f32.mrb[103].mxu0  ;;  %v5549_v42 = vpop.f32.mrb[76].mxu1 }
 0x319   : > { %v5654_v48 = vadd.f32 %v5653_v3, %v5652_v18  ;;  %v5550_v33 = vpop.f32.mrb[77].mxu1  ;;  %v7056_v10 = vadd.f32 %v5651_v24, %v4395_v32 }
 0x31a   : > { %v5551_v52 = vadd.f32 %v5550_v33, %v5549_v42  ;;  %v5552_v45 = vpop.f32.mrb[78].mxu1 }
 0x31b   : > { %v5553_v47 = vpop.f32.mrb[79].mxu1  ;;  %v7058_v61 = vadd.f32 %v5654_v48, %v4398_v27 }
 0x31c   : > { %v4411_v40 = vadd.f32 %v5551_v52, %v6886_v54  ;;  %v5554_v26 = vadd.f32 %v5553_v47, %v5552_v45 }
 0x31d   : > { %v5655_v34 = vpop.f32.mrb[104].mxu0 }
 0x31e   : > { %v5656_v1 = vpop.f32.mrb[105].mxu0  ;;  %v4414_v43 = vadd.f32 %v5554_v26, %v6891_v25 }
 0x31f   : > { %v5657_v44 = vadd.f32 %v5656_v1, %v5655_v34  ;;  %v5658_v58 = vpop.f32.mrb[106].mxu0 }
 0x320   : > { %v5659_v11 = vpop.f32.mrb[107].mxu0  ;;  %v5555_v60 = vpop.f32.mrb[80].mxu1 }
 0x321   : > { %v5660_v22 = vadd.f32 %v5659_v11, %v5658_v58  ;;  %v5556_v46 = vpop.f32.mrb[81].mxu1  ;;  %v7062_v32 = vadd.f32 %v5657_v44, %v4403_v39 }
 0x322   : > { %v5557_v13 = vadd.f32 %v5556_v46, %v5555_v60  ;;  %v5558_v55 = vpop.f32.mrb[82].mxu1 }
 0x323   : > { %v5559_v50 = vpop.f32.mrb[83].mxu1  ;;  %v7064_v27 = vadd.f32 %v5660_v22, %v4406_v36 }
 0x324   : > { %v4419_v54 = vadd.f32 %v5557_v13, %v6913_v59  ;;  %v5560_v30 = vadd.f32 %v5559_v50, %v5558_v55 }
 0x325   : > { %v5661_v14 = vpop.f32.mrb[108].mxu0 }
 0x326   : > { %v5662_v23 = vpop.f32.mrb[109].mxu0  ;;  %v4422_v25 = vadd.f32 %v5560_v30, %v6924_v9 }
 0x327   : > { %v5663_v7 = vadd.f32 %v5662_v23, %v5661_v14  ;;  %v5664_v19 = vpop.f32.mrb[110].mxu0 }
 0x328   : > { %v5665_v63 = vpop.f32.mrb[111].mxu0  ;;  %v5561_v28 = vpop.f32.mrb[84].mxu1 }
 0x329   : > { %v5666_v24 = vadd.f32 %v5665_v63, %v5664_v19  ;;  %v5562_v18 = vpop.f32.mrb[85].mxu1  ;;  %v7068_v39 = vadd.f32 %v5663_v7, %v4411_v40 }
 0x32a   : > { %v5563_v3 = vadd.f32 %v5562_v18, %v5561_v28  ;;  %v5564_v42 = vpop.f32.mrb[86].mxu1 }
 0x32b   : > { %v5565_v48 = vpop.f32.mrb[87].mxu1  ;;  %v7070_v36 = vadd.f32 %v5666_v24, %v4414_v43 }
 0x32c   : > { %v4427_v59 = vadd.f32 %v5563_v3, %v6945_v53  ;;  %v5566_v33 = vadd.f32 %v5565_v48, %v5564_v42 }
 0x32d   : > { %v5667_v52 = vpop.f32.mrb[112].mxu0 }
 0x32e   : > { %v5668_v45 = vpop.f32.mrb[113].mxu0  ;;  %v4430_v9 = vadd.f32 %v5566_v33, %v6949_v20 }
 0x32f   : > { %v5669_v47 = vadd.f32 %v5668_v45, %v5667_v52  ;;  %v5670_v26 = vpop.f32.mrb[114].mxu0 }
 0x330   : > { %v5671_v34 = vpop.f32.mrb[115].mxu0  ;;  %v5567_v1 = vpop.f32.mrb[88].mxu1 }
 0x331   : > { %v5672_v44 = vadd.f32 %v5671_v34, %v5670_v26  ;;  %v5568_v58 = vpop.f32.mrb[89].mxu1  ;;  %v7074_v40 = vadd.f32 %v5669_v47, %v4419_v54 }
 0x332   : > { %v5569_v11 = vadd.f32 %v5568_v58, %v5567_v1  ;;  %v5570_v60 = vpop.f32.mrb[90].mxu1 }
 0x333   : > { %v5571_v22 = vpop.f32.mrb[91].mxu1  ;;  %v7076_v43 = vadd.f32 %v5672_v44, %v4422_v25 }
 0x334   : > { %v4435_v53 = vadd.f32 %v5569_v11, %v6960_v37  ;;  %v5572_v46 = vadd.f32 %v5571_v22, %v5570_v60 }
 0x335   : > { %v5673_v13 = vpop.f32.mrb[116].mxu0 }
 0x336   : > { %v5674_v55 = vpop.f32.mrb[117].mxu0  ;;  %v4438_v20 = vadd.f32 %v5572_v46, %v6962_v15 }
 0x337   : > { %v5675_v50 = vadd.f32 %v5674_v55, %v5673_v13  ;;  %v5676_v30 = vpop.f32.mrb[118].mxu0 }
 0x338   : > { %v5677_v14 = vpop.f32.mrb[119].mxu0  ;;  %v5573_v23 = vpop.f32.mrb[92].mxu1 }
 0x339   : > { %v5678_v7 = vadd.f32 %v5677_v14, %v5676_v30  ;;  %v5574_v19 = vpop.f32.mrb[93].mxu1  ;;  %v7080_v54 = vadd.f32 %v5675_v50, %v4427_v59 }
 0x33a   : > { %v5575_v63 = vadd.f32 %v5574_v19, %v5573_v23  ;;  %v5576_v28 = vpop.f32.mrb[94].mxu1 }
 0x33b   : > { %v5577_v24 = vpop.f32.mrb[95].mxu1  ;;  %v7082_v25 = vadd.f32 %v5678_v7, %v4430_v9 }
 0x33c   : > { %v4443_v37 = vadd.f32 %v5575_v63, %v6966_v12  ;;  %v5578_v18 = vadd.f32 %v5577_v24, %v5576_v28 }
 0x33d   : > { %v5679_v3 = vpop.f32.mrb[120].mxu0 }
 0x33e   : > { %v5680_v42 = vpop.f32.mrb[121].mxu0  ;;  %v4446_v15 = vadd.f32 %v5578_v18, %v6971_v29 }
 0x33f   : > { %v5681_v48 = vadd.f32 %v5680_v42, %v5679_v3  ;;  %v5682_v33 = vpop.f32.mrb[122].mxu0 }
 0x340   : > { %v5683_v52 = vpop.f32.mrb[123].mxu0  ;;  %v5579_v45 = vpop.f32.mrb[96].mxu1 }
 0x341   : > { %v5684_v47 = vadd.f32 %v5683_v52, %v5682_v33  ;;  %v5580_v26 = vpop.f32.mrb[97].mxu1  ;;  %v7086_v59 = vadd.f32 %v5681_v48, %v4435_v53 }
 0x342   : > { %v5581_v34 = vadd.f32 %v5580_v26, %v5579_v45  ;;  %v5582_v1 = vpop.f32.mrb[98].mxu1 }
 0x343   : > { %v5583_v44 = vpop.f32.mrb[99].mxu1  ;;  %v7088_v9 = vadd.f32 %v5684_v47, %v4438_v20 }
 0x344   : > { %v4451_v12 = vadd.f32 %v5581_v34, %v6976_v57  ;;  %v5584_v58 = vadd.f32 %v5583_v44, %v5582_v1 }
 0x345   : > { %v5685_v11 = vpop.f32.mrb[124].mxu0 }
 0x346   : > { %v5686_v60 = vpop.f32.mrb[125].mxu0  ;;  %v4454_v29 = vadd.f32 %v5584_v58, %v6981_v17 }
 0x347   : > { %v5687_v22 = vadd.f32 %v5686_v60, %v5685_v11  ;;  %v5688_v46 = vpop.f32.mrb[126].mxu0 }
 0x348   : > { %v5689_v13 = vpop.f32.mrb[127].mxu0  ;;  %v5585_v55 = vpop.f32.mrb[100].mxu1 }
 0x349   : > { %v5690_v50 = vadd.f32 %v5689_v13, %v5688_v46  ;;  %v5586_v30 = vpop.f32.mrb[101].mxu1  ;;  %v7092_v53 = vadd.f32 %v5687_v22, %v4443_v37 }
 0x34a   : > { %v5587_v14 = vadd.f32 %v5586_v30, %v5585_v55  ;;  %v5588_v23 = vpop.f32.mrb[102].mxu1 }
 0x34b   : > { %v5589_v7 = vpop.f32.mrb[103].mxu1  ;;  %v7094_v20 = vadd.f32 %v5690_v50, %v4446_v15 }
 0x34c   : > { %v4459_v57 = vadd.f32 %v5587_v14, %v7000_v2  ;;  %v5590_v19 = vadd.f32 %v5589_v7, %v5588_v23 }
 0x34d   : > { %v5691_v63 = vpop.f32.mrb[128].mxu0 }
 0x34e   : > { %v5692_v28 = vpop.f32.mrb[129].mxu0  ;;  %v4462_v17 = vadd.f32 %v5590_v19, %v7002_v4 }
 0x34f   : > { %v5693_v24 = vadd.f32 %v5692_v28, %v5691_v63  ;;  %v5694_v18 = vpop.f32.mrb[130].mxu0 }
 0x350   : > { %v5695_v3 = vpop.f32.mrb[131].mxu0  ;;  %v5591_v42 = vpop.f32.mrb[104].mxu1 }
 0x351   : > { %v5696_v48 = vadd.f32 %v5695_v3, %v5694_v18  ;;  %v5592_v33 = vpop.f32.mrb[105].mxu1  ;;  %v7098_v37 = vadd.f32 %v5693_v24, %v4451_v12 }
 0x352   : > { %v5593_v52 = vadd.f32 %v5592_v33, %v5591_v42  ;;  %v5594_v45 = vpop.f32.mrb[106].mxu1 }
 0x353   : > { %v5595_v47 = vpop.f32.mrb[107].mxu1  ;;  %v7100_v15 = vadd.f32 %v5696_v48, %v4454_v29 }
 0x354   : > { %v4467_v2 = vadd.f32 %v5593_v52, %v7009_v56  ;;  %v5596_v26 = vadd.f32 %v5595_v47, %v5594_v45 }
 0x355   : > { %v5697_v34 = vpop.f32.mrb[132].mxu0 }
 0x356   : > { %v5698_v1 = vpop.f32.mrb[133].mxu0  ;;  %v4470_v4 = vadd.f32 %v5596_v26, %v7012_v8 }
 0x357   : > { %v5699_v44 = vadd.f32 %v5698_v1, %v5697_v34  ;;  %v5700_v58 = vpop.f32.mrb[134].mxu0 }
 0x358   : > { %v5701_v11 = vpop.f32.mrb[135].mxu0  ;;  %v5597_v60 = vpop.f32.mrb[108].mxu1 }
 0x359   : > { %v5702_v22 = vadd.f32 %v5701_v11, %v5700_v58  ;;  %v5598_v46 = vpop.f32.mrb[109].mxu1  ;;  %v7104_v12 = vadd.f32 %v5699_v44, %v4459_v57 }
 0x35a   : > { %v5599_v13 = vadd.f32 %v5598_v46, %v5597_v60  ;;  %v5600_v55 = vpop.f32.mrb[110].mxu1 }
 0x35b   : > { %v5601_v50 = vpop.f32.mrb[111].mxu1  ;;  %v7106_v29 = vadd.f32 %v5702_v22, %v4462_v17 }
 0x35c   : > { %v4475_v56 = vadd.f32 %v5599_v13, %v7018_v35  ;;  %v5602_v30 = vadd.f32 %v5601_v50, %v5600_v55 }
 0x35d   : > { %v5703_v14 = vpop.f32.mrb[136].mxu0 }
 0x35e   : > { %v5704_v23 = vpop.f32.mrb[137].mxu0  ;;  %v4478_v8 = vadd.f32 %v5602_v30, %v7020_v49 }
 0x35f   : > { %v5705_v7 = vadd.f32 %v5704_v23, %v5703_v14  ;;  %v5706_v19 = vpop.f32.mrb[138].mxu0 }
 0x360   : > { %v5707_v63 = vpop.f32.mrb[139].mxu0  ;;  %v5603_v28 = vpop.f32.mrb[112].mxu1 }
 0x361   : > { %v5708_v24 = vadd.f32 %v5707_v63, %v5706_v19  ;;  %v5604_v18 = vpop.f32.mrb[113].mxu1  ;;  %v7110_v57 = vadd.f32 %v5705_v7, %v4467_v2 }
 0x362   : > { %v5605_v3 = vadd.f32 %v5604_v18, %v5603_v28  ;;  %v5606_v42 = vpop.f32.mrb[114].mxu1 }
 0x363   : > { %v5607_v48 = vpop.f32.mrb[115].mxu1  ;;  %v7112_v17 = vadd.f32 %v5708_v24, %v4470_v4 }
 0x364   : > { %v4483_v35 = vadd.f32 %v5605_v3, %v7024_v21  ;;  %v5608_v33 = vadd.f32 %v5607_v48, %v5606_v42 }
 0x365   : > { %v5709_v52 = vpop.f32.mrb[140].mxu0 }
 0x366   : > { %v5710_v45 = vpop.f32.mrb[141].mxu0  ;;  %v4486_v49 = vadd.f32 %v5608_v33, %v7026_v51 }
 0x367   : > { %v5711_v47 = vadd.f32 %v5710_v45, %v5709_v52  ;;  %v5712_v26 = vpop.f32.mrb[142].mxu0 }
 0x368   : > { %v5713_v34 = vpop.f32.mrb[143].mxu0  ;;  %v5609_v1 = vpop.f32.mrb[116].mxu1 }
 0x369   : > { %v5714_v44 = vadd.f32 %v5713_v34, %v5712_v26  ;;  %v5610_v58 = vpop.f32.mrb[117].mxu1  ;;  %v7116_v2 = vadd.f32 %v5711_v47, %v4475_v56 }
 0x36a   : > { %v5611_v11 = vadd.f32 %v5610_v58, %v5609_v1  ;;  %v5612_v60 = vpop.f32.mrb[118].mxu1 }
 0x36b   : > { %v5613_v22 = vpop.f32.mrb[119].mxu1  ;;  %v7118_v4 = vadd.f32 %v5714_v44, %v4478_v8 }
 0x36c   : > { %v4491_v21 = vadd.f32 %v5611_v11, %v7030_v16  ;;  %v5614_v46 = vadd.f32 %v5613_v22, %v5612_v60 }
 0x36d   : > { %v5715_v13 = vpop.f32.mrb[144].mxu0 }
 0x36e   : > { %v5716_v55 = vpop.f32.mrb[145].mxu0  ;;  %v4494_v51 = vadd.f32 %v5614_v46, %v7032_v31 }
 0x36f   : > { %v5717_v50 = vadd.f32 %v5716_v55, %v5715_v13  ;;  %v5718_v30 = vpop.f32.mrb[146].mxu0 }
 0x370   : > { %v5719_v14 = vpop.f32.mrb[147].mxu0  ;;  %v5615_v23 = vpop.f32.mrb[120].mxu1 }
 0x371   : > { %v5720_v7 = vadd.f32 %v5719_v14, %v5718_v30  ;;  %v5616_v19 = vpop.f32.mrb[121].mxu1  ;;  %v7122_v56 = vadd.f32 %v5717_v50, %v4483_v35 }
 0x372   : > { %v5617_v63 = vadd.f32 %v5616_v19, %v5615_v23  ;;  %v5618_v28 = vpop.f32.mrb[122].mxu1 }
 0x373   : > { %v5619_v24 = vpop.f32.mrb[123].mxu1  ;;  %v7124_v8 = vadd.f32 %v5720_v7, %v4486_v49 }
 0x374   : > { %v4499_v16 = vadd.f32 %v5617_v63, %v7036_v0  ;;  %v5620_v18 = vadd.f32 %v5619_v24, %v5618_v28 }
 0x375   : > { %v5721_v3 = vpop.f32.mrb[148].mxu0 }
 0x376   : > { %v5722_v42 = vpop.f32.mrb[149].mxu0  ;;  %v4502_v31 = vadd.f32 %v5620_v18, %v7038_v62 }
 0x377   : > { %v5723_v48 = vadd.f32 %v5722_v42, %v5721_v3  ;;  %v5724_v33 = vpop.f32.mrb[150].mxu0 }
 0x378   : > { %v5725_v52 = vpop.f32.mrb[151].mxu0  ;;  %v5621_v45 = vpop.f32.mrb[124].mxu1 }
 0x379   : > { %v5726_v47 = vadd.f32 %v5725_v52, %v5724_v33  ;;  %v5622_v26 = vpop.f32.mrb[125].mxu1  ;;  %v7128_v35 = vadd.f32 %v5723_v48, %v4491_v21 }
 0x37a   : > { %v5623_v34 = vadd.f32 %v5622_v26, %v5621_v45  ;;  %v5624_v1 = vpop.f32.mrb[126].mxu1 }
 0x37b   : > { %v5625_v44 = vpop.f32.mrb[127].mxu1  ;;  %v7130_v49 = vadd.f32 %v5726_v47, %v4494_v51 }
 0x37c   : > { %v4507_v0 = vadd.f32 %v5623_v34, %v7044_v5  ;;  %v5626_v58 = vadd.f32 %v5625_v44, %v5624_v1 }
 0x37d   : > { %v5727_v11 = vpop.f32.mrb[152].mxu0 }
 0x37e   : > { %v5728_v60 = vpop.f32.mrb[153].mxu0  ;;  %v4510_v62 = vadd.f32 %v5626_v58, %v7046_v38 }
 0x37f   : > { %v5729_v22 = vadd.f32 %v5728_v60, %v5727_v11  ;;  %v5730_v46 = vpop.f32.mrb[154].mxu0 }
 0x380   : > { %v5731_v13 = vpop.f32.mrb[155].mxu0  ;;  %v5829_v55 = vpop.f32.mrb[128].mxu1 }
 0x381   : > { %v5732_v50 = vadd.f32 %v5731_v13, %v5730_v46  ;;  %v4717_v21 = vadd.f32 %v5829_v55, %v7056_v10  ;;  %v4708_v30 = vpop.f32.mrb[129].mxu1  ;;  %v7135_v14 = vadd.f32 %v5729_v22, %v4499_v16 }
 0x382   : > { %v4709_v51 = vadd.f32 %v4708_v30, %v7050_v41  ;;  %v5830_v23 = vpop.f32.mrb[130].mxu1 }
 0x383   : > { %v4837_v7 = vadd.f32 3.0, %v4717_v21  ;;  %v4720_v5 = vadd.f32 %v5830_v23, %v7058_v61  ;;  %v4711_v19 = vpop.f32.mrb[131].mxu1  ;;  %v7139_v63 = vadd.f32 %v5732_v50, %v4502_v31 }
 0x384   : > { %v4835_v38 = vadd.f32 3.0, %v4709_v51  ;;  %v4712_v28 = vadd.f32 %v4711_v19, %v7052_v6 }
 0x385   : > { %v4869_v24 = vmax.f32 %v4837_v7, 0.0  ;;  %v5733_v18 = vpop.f32.mrb[156].mxu0  ;;  %v4838_v3 = vadd.f32 3.0, %v4720_v5  ;;  %v6016_v7 = vld [vmem:[%s6425_s6 + $0x10] sm:$0xff] }
 0x386   : > { %v4867_v42 = vmax.f32 %v4835_v38, 0.0  ;;  %v5734_v10 = vpop.f32.mrb[157].mxu0  ;;  %v4836_v48 = vadd.f32 3.0, %v4712_v28 }
 0x387   : > { %v4901_v16 = vmin.f32 %v4869_v24, 6.0  ;;  %v5735_v33 = vadd.f32 %v5734_v10, %v5733_v18  ;;  %v4870_v52 = vmax.f32 %v4838_v3, 0.0  ;;  %v5736_v41 = vpop.f32.mrb[158].mxu0  ;;  %v6017_v24 = vld [vmem:[%s6425_s6] sm:$0xff] }
 0x388   : > { %v4899_v45 = vmin.f32 %v4867_v42, 6.0  ;;  %v4868_v47 = vmax.f32 %v4836_v48, 0.0  ;;  %v5737_v26 = vpop.f32.mrb[159].mxu0  ;;  %v6019_v48 = vld [vmem:[%s6425_s6 + $0x8] sm:$0xff] }
 0x389   : > { %v4933_v61 = vmul.f32 %v4901_v16, %v4717_v21  ;;  %v4902_v34 = vmin.f32 %v4870_v52, 6.0  ;;  %v5738_v31 = vadd.f32 %v5737_v26, %v5736_v41  ;;  %v5833_v1 = vpop.f32.mrb[132].mxu1  ;;  %v7142_v44 = vadd.f32 %v5735_v33, %v4507_v0 }
 0x38a   : > { %v4931_v6 = vmul.f32 %v4899_v45, %v4709_v51  ;;  %v4900_v58 = vmin.f32 %v4868_v47, 6.0  ;;  %v4733_v11 = vadd.f32 %v5833_v1, %v7068_v39  ;;  %v4724_v60 = vpop.f32.mrb[133].mxu1 }
 0x38b   : > { %v4965_v22 = vmul.f32 0.16666667, %v4933_v61  ;;  %v4934_v46 = vmul.f32 %v4902_v34, %v4720_v5  ;;  %v4725_v13 = vadd.f32 %v4724_v60, %v7062_v32  ;;  %v5834_v55 = vpop.f32.mrb[134].mxu1  ;;  %v7146_v50 = vadd.f32 %v5738_v31, %v4510_v62 }
 0x38c   : > { %v4963_v21 = vmul.f32 0.16666667, %v4931_v6  ;;  %v4932_v30 = vmul.f32 %v4900_v58, %v4712_v28  ;;  %v4841_v23 = vadd.f32 3.0, %v4733_v11  ;;  %v4736_v0 = vadd.f32 %v5834_v55, %v7070_v36  ;;  %v4727_v51 = vpop.f32.mrb[135].mxu1  ;;  %v6018_v36 = vld [vmem:[%s6425_s6 + $0x18] sm:$0xff] }
 0x38d   : > { %v4997_v19 = vadd.f32 %v6016_v7, %v4965_v22  ;;  %v4966_v39 = vmul.f32 0.16666667, %v4934_v46  ;;  %v4839_v38 = vadd.f32 3.0, %v4725_v13  ;;  %v4728_v5 = vadd.f32 %v4727_v51, %v7064_v27 }
 0x38e   : > { %v4995_v32 = vadd.f32 %v6017_v24, %v4963_v21  ;;  %v4964_v18 = vmul.f32 0.16666667, %v4932_v30  ;;  %v4873_v62 = vmax.f32 %v4841_v23, 0.0  ;;  %v4842_v3 = vadd.f32 3.0, %v4736_v0 }
 0x38f   : > { %5029 = vst [vmem:[%s7154_s16 + $0x10] sm:$0xff] %v4997_v19  ;;  %v4998_v28 = vadd.f32 %v6018_v36, %v4966_v39  ;;  %v4871_v42 = vmax.f32 %v4839_v38, 0.0  ;;  %v4840_v10 = vadd.f32 3.0, %v4728_v5  ;;  %v6021_v39 = vld [vmem:[%s6425_s6 + $0x20] sm:$0xff] }
 0x390   : > { %5027 = vst [vmem:[%s7154_s16] sm:$0xff] %v4995_v32  ;;  %v4996_v27 = vadd.f32 %v6019_v48, %v4964_v18  ;;  %v4905_v16 = vmin.f32 %v4873_v62, 6.0  ;;  %v4874_v33 = vmax.f32 %v4842_v3, 0.0  ;;  %v6022_v32 = vld [vmem:[%s6425_s6 + $0x38] sm:$0xff] }
 0x391   : > { %5030 = vst [vmem:[%s7154_s16 + $0x18] sm:$0xff] %v4998_v28  ;;  %v4903_v52 = vmin.f32 %v4871_v42, 6.0  ;;  %v4872_v41 = vmax.f32 %v4840_v10, 0.0  ;;  %v5837_v45 = vpop.f32.mrb[136].mxu1 }
 0x392   : > { %5028 = vst [vmem:[%s7154_s16 + $0x8] sm:$0xff] %v4996_v27  ;;  %v4937_v47 = vmul.f32 %v4905_v16, %v4733_v11  ;;  %v4906_v26 = vmin.f32 %v4874_v33, 6.0  ;;  %v4749_v61 = vadd.f32 %v5837_v45, %v7080_v54  ;;  %v4740_v34 = vpop.f32.mrb[137].mxu1 }
 0x393   : > { %v4935_v31 = vmul.f32 %v4903_v52, %v4725_v13  ;;  %v4904_v1 = vmin.f32 %v4872_v41, 6.0  ;;  %v4741_v6 = vadd.f32 %v4740_v34, %v7074_v40  ;;  %v5838_v58 = vpop.f32.mrb[138].mxu1  ;;  %v6020_v13 = vld [vmem:[%s6425_s6 + $0x30] sm:$0xff] }
 0x394   : > { %v4969_v60 = vmul.f32 0.16666667, %v4937_v47  ;;  %v4938_v22 = vmul.f32 %v4906_v26, %v4736_v0  ;;  %v4845_v46 = vadd.f32 3.0, %v4749_v61  ;;  %v4752_v55 = vadd.f32 %v5838_v58, %v7082_v25  ;;  %v4743_v21 = vpop.f32.mrb[139].mxu1 }
 0x395   : > { %v4967_v11 = vmul.f32 0.16666667, %v4935_v31  ;;  %v4936_v30 = vmul.f32 %v4904_v1, %v4728_v5  ;;  %v4843_v23 = vadd.f32 3.0, %v4741_v6  ;;  %v4744_v54 = vadd.f32 %v4743_v21, %v7076_v43  ;;  %v6023_v43 = vld [vmem:[%s6425_s6 + $0x28] sm:$0xff] }
 0x396   : > { %v5001_v51 = vadd.f32 %v6020_v13, %v4969_v60  ;;  %v4970_v40 = vmul.f32 0.16666667, %v4938_v22  ;;  %v4877_v7 = vmax.f32 %v4845_v46, 0.0  ;;  %v4846_v19 = vadd.f32 3.0, %v4752_v55  ;;  %v6026_v13 = vld [vmem:[%s6425_s6 + $0x58] sm:$0xff] }
 0x397   : > { %v4999_v0 = vadd.f32 %v6021_v39, %v4967_v11  ;;  %v4968_v38 = vmul.f32 0.16666667, %v4936_v30  ;;  %v4875_v25 = vmax.f32 %v4843_v23, 0.0  ;;  %v4844_v24 = vadd.f32 3.0, %v4744_v54  ;;  %v6025_v11 = vld [vmem:[%s6425_s6 + $0x40] sm:$0xff] }
 0x398   : > { %5033 = vst [vmem:[%s7154_s16 + $0x30] sm:$0xff] %v5001_v51  ;;  %v5002_v5 = vadd.f32 %v6022_v32, %v4970_v40  ;;  %v4909_v18 = vmin.f32 %v4877_v7, 6.0  ;;  %v4878_v62 = vmax.f32 %v4846_v19, 0.0 }
 0x399   : > { %5031 = vst [vmem:[%s7154_s16 + $0x20] sm:$0xff] %v4999_v0  ;;  %v5000_v3 = vadd.f32 %v6023_v43, %v4968_v38  ;;  %v4907_v36 = vmin.f32 %v4875_v25, 6.0  ;;  %v4876_v28 = vmax.f32 %v4844_v24, 0.0  ;;  %v5841_v42 = vpop.f32.mrb[140].mxu1 }
 0x39a   : > { %5034 = vst [vmem:[%s7154_s16 + $0x38] sm:$0xff] %v5002_v5  ;;  %v4941_v10 = vmul.f32 %v4909_v18, %v4749_v61  ;;  %v4910_v48 = vmin.f32 %v4878_v62, 6.0  ;;  %v4765_v27 = vadd.f32 %v5841_v42, %v7092_v53  ;;  %v4756_v16 = vpop.f32.mrb[141].mxu1 }
 0x39b   : > { %5032 = vst [vmem:[%s7154_s16 + $0x28] sm:$0xff] %v5000_v3  ;;  %v4939_v33 = vmul.f32 %v4907_v36, %v4741_v6  ;;  %v4908_v52 = vmin.f32 %v4876_v28, 6.0  ;;  %v4757_v41 = vadd.f32 %v4756_v16, %v7086_v59  ;;  %v5842_v45 = vpop.f32.mrb[142].mxu1  ;;  %v6024_v6 = vld [vmem:[%s6425_s6 + $0x50] sm:$0xff] }
 0x39c   : > { %v4973_v47 = vmul.f32 0.16666667, %v4941_v10  ;;  %v4942_v26 = vmul.f32 %v4910_v48, %v4752_v55  ;;  %v4849_v34 = vadd.f32 3.0, %v4765_v27  ;;  %v4768_v31 = vadd.f32 %v5842_v45, %v7094_v20  ;;  %v4759_v1 = vpop.f32.mrb[143].mxu1 }
 0x39d   : > { %v4971_v61 = vmul.f32 0.16666667, %v4939_v33  ;;  %v4940_v58 = vmul.f32 %v4908_v52, %v4744_v54  ;;  %v4847_v53 = vadd.f32 3.0, %v4757_v41  ;;  %v4760_v60 = vadd.f32 %v4759_v1, %v7088_v9  ;;  %v6027_v9 = vld [vmem:[%s6425_s6 + $0x48] sm:$0xff]  ;;  %v6028_v33 = vld [vmem:[%s6425_s6 + $0x70] sm:$0xff]  ;;  %v6030_v1 = vld [vmem:[%s6425_s6 + $0x78] sm:$0xff] }
 0x39e   : > { %v5005_v22 = vadd.f32 %v6024_v6, %v4973_v47  ;;  %v4974_v59 = vmul.f32 0.16666667, %v4942_v26  ;;  %v4881_v46 = vmax.f32 %v4849_v34, 0.0  ;;  %v4850_v21 = vadd.f32 3.0, %v4768_v31  ;;  %v6029_v47 = vld [vmem:[%s6425_s6 + $0x60] sm:$0xff] }
 0x39f   : > { %v5003_v55 = vadd.f32 %v6025_v11, %v4971_v61  ;;  %v4972_v30 = vmul.f32 0.16666667, %v4940_v58  ;;  %v4879_v20 = vmax.f32 %v4847_v53, 0.0  ;;  %v4848_v23 = vadd.f32 3.0, %v4760_v60 }
 0x3a0   : > { %5037 = vst [vmem:[%s7154_s16 + $0x50] sm:$0xff] %v5005_v22  ;;  %v5006_v54 = vadd.f32 %v6026_v13, %v4974_v59  ;;  %v4913_v51 = vmin.f32 %v4881_v46, 6.0  ;;  %v4882_v40 = vmax.f32 %v4850_v21, 0.0 }
 0x3a1   : > { %5035 = vst [vmem:[%s7154_s16 + $0x40] sm:$0xff] %v5003_v55  ;;  %v5004_v7 = vadd.f32 %v6027_v9, %v4972_v30  ;;  %v4911_v19 = vmin.f32 %v4879_v20, 6.0  ;;  %v4880_v39 = vmax.f32 %v4848_v23, 0.0  ;;  %v5845_v0 = vpop.f32.mrb[144].mxu1 }
 0x3a2   : > { %5038 = vst [vmem:[%s7154_s16 + $0x58] sm:$0xff] %v5006_v54  ;;  %v4945_v38 = vmul.f32 %v4913_v51, %v4765_v27  ;;  %v4914_v25 = vmin.f32 %v4882_v40, 6.0  ;;  %v4781_v24 = vadd.f32 %v5845_v0, %v7104_v12  ;;  %v4772_v32 = vpop.f32.mrb[145].mxu1 }
 0x3a3   : > { %5036 = vst [vmem:[%s7154_s16 + $0x48] sm:$0xff] %v5004_v7  ;;  %v4943_v5 = vmul.f32 %v4911_v19, %v4757_v41  ;;  %v4912_v18 = vmin.f32 %v4880_v39, 6.0  ;;  %v4773_v62 = vadd.f32 %v4772_v32, %v7098_v37  ;;  %v5846_v43 = vpop.f32.mrb[146].mxu1 }
 0x3a4   : > { %v4977_v3 = vmul.f32 0.16666667, %v4945_v38  ;;  %v4946_v36 = vmul.f32 %v4914_v25, %v4768_v31  ;;  %v4853_v28 = vadd.f32 3.0, %v4781_v24  ;;  %v4784_v42 = vadd.f32 %v5846_v43, %v7106_v29  ;;  %v4775_v10 = vpop.f32.mrb[147].mxu1  ;;  %v6032_v38 = vld [vmem:[%s6425_s6 + $0x90] sm:$0xff] }
 0x3a5   : > { %v4975_v48 = vmul.f32 0.16666667, %v4943_v5  ;;  %v4944_v27 = vmul.f32 %v4912_v18, %v4760_v60  ;;  %v4851_v12 = vadd.f32 3.0, %v4773_v62  ;;  %v4776_v16 = vadd.f32 %v4775_v10, %v7100_v15  ;;  %v6031_v15 = vld [vmem:[%s6425_s6 + $0x68] sm:$0xff]  ;;  %v6033_v5 = vld [vmem:[%s6425_s6 + $0x80] sm:$0xff] }
 0x3a6   : > { %v5009_v52 = vadd.f32 %v6028_v33, %v4977_v3  ;;  %v4978_v37 = vmul.f32 0.16666667, %v4946_v36  ;;  %v4885_v41 = vmax.f32 %v4853_v28, 0.0  ;;  %v4854_v45 = vadd.f32 3.0, %v4784_v42  ;;  %v6034_v3 = vld [vmem:[%s6425_s6 + $0x98] sm:$0xff] }
 0x3a7   : > { %v5007_v26 = vadd.f32 %v6029_v47, %v4975_v48  ;;  %v4976_v34 = vmul.f32 0.16666667, %v4944_v27  ;;  %v4883_v29 = vmax.f32 %v4851_v12, 0.0  ;;  %v4852_v31 = vadd.f32 3.0, %v4776_v16 }
 0x3a8   : > { %5041 = vst [vmem:[%s7154_s16 + $0x70] sm:$0xff] %v5009_v52  ;;  %v5010_v61 = vadd.f32 %v6030_v1, %v4978_v37  ;;  %v4917_v58 = vmin.f32 %v4885_v41, 6.0  ;;  %v4886_v53 = vmax.f32 %v4854_v45, 0.0 }
 0x3a9   : > { %5039 = vst [vmem:[%s7154_s16 + $0x60] sm:$0xff] %v5007_v26  ;;  %v5008_v60 = vadd.f32 %v6031_v15, %v4976_v34  ;;  %v4915_v6 = vmin.f32 %v4883_v29, 6.0  ;;  %v4884_v22 = vmax.f32 %v4852_v31, 0.0  ;;  %v5849_v59 = vpop.f32.mrb[148].mxu1 }
 0x3aa   : > { %5042 = vst [vmem:[%s7154_s16 + $0x78] sm:$0xff] %v5010_v61  ;;  %v4949_v46 = vmul.f32 %v4917_v58, %v4781_v24  ;;  %v4918_v21 = vmin.f32 %v4886_v53, 6.0  ;;  %v4797_v11 = vadd.f32 %v5849_v59, %v7116_v2  ;;  %v4788_v55 = vpop.f32.mrb[149].mxu1 }
 0x3ab   : > { %5040 = vst [vmem:[%s7154_s16 + $0x68] sm:$0xff] %v5008_v60  ;;  %v4947_v30 = vmul.f32 %v4915_v6, %v4773_v62  ;;  %v4916_v20 = vmin.f32 %v4884_v22, 6.0  ;;  %v4789_v23 = vadd.f32 %v4788_v55, %v7110_v57  ;;  %v5850_v13 = vpop.f32.mrb[150].mxu1  ;;  %v6036_v60 = vld [vmem:[%s6425_s6 + $0xb0] sm:$0xff] }
 0x3ac   : > { %v4981_v54 = vmul.f32 0.16666667, %v4949_v46  ;;  %v4950_v51 = vmul.f32 %v4918_v21, %v4784_v42  ;;  %v4857_v40 = vadd.f32 3.0, %v4797_v11  ;;  %v4800_v9 = vadd.f32 %v5850_v13, %v7118_v4  ;;  %v4791_v7 = vpop.f32.mrb[151].mxu1  ;;  %v6037_v46 = vld [vmem:[%s6425_s6 + $0xa0] sm:$0xff] }
 0x3ad   : > { %v4979_v19 = vmul.f32 0.16666667, %v4947_v30  ;;  %v4948_v39 = vmul.f32 %v4916_v20, %v4776_v16  ;;  %v4855_v2 = vadd.f32 3.0, %v4789_v23  ;;  %v4792_v0 = vadd.f32 %v4791_v7, %v7112_v17  ;;  %v6035_v17 = vld [vmem:[%s6425_s6 + $0x88] sm:$0xff]  ;;  %v6038_v30 = vld [vmem:[%s6425_s6 + $0xb8] sm:$0xff] }
 0x3ae   : > { %v5013_v25 = vadd.f32 %v6032_v38, %v4981_v54  ;;  %v4982_v57 = vmul.f32 0.16666667, %v4950_v51  ;;  %v4889_v24 = vmax.f32 %v4857_v40, 0.0  ;;  %v4858_v32 = vadd.f32 3.0, %v4800_v9 }
 0x3af   : > { %v5011_v18 = vadd.f32 %v6033_v5, %v4979_v19  ;;  %v4980_v62 = vmul.f32 0.16666667, %v4948_v39  ;;  %v4887_v4 = vmax.f32 %v4855_v2, 0.0  ;;  %v4856_v43 = vadd.f32 3.0, %v4792_v0 }
 0x3b0   : > { %5045 = vst [vmem:[%s7154_s16 + $0x90] sm:$0xff] %v5013_v25  ;;  %v5014_v36 = vadd.f32 %v6034_v3, %v4982_v57  ;;  %v4921_v28 = vmin.f32 %v4889_v24, 6.0  ;;  %v4890_v42 = vmax.f32 %v4858_v32, 0.0 }
 0x3b1   : > { %5043 = vst [vmem:[%s7154_s16 + $0x80] sm:$0xff] %v5011_v18  ;;  %v5012_v10 = vadd.f32 %v6035_v17, %v4980_v62  ;;  %v4919_v48 = vmin.f32 %v4887_v4, 6.0  ;;  %v4888_v27 = vmax.f32 %v4856_v43, 0.0  ;;  %v5853_v12 = vpop.f32.mrb[152].mxu1 }
 0x3b2   : > { %5046 = vst [vmem:[%s7154_s16 + $0x98] sm:$0xff] %v5014_v36  ;;  %v4953_v16 = vmul.f32 %v4921_v28, %v4797_v11  ;;  %v4922_v33 = vmin.f32 %v4890_v42, 6.0  ;;  %v4813_v52 = vadd.f32 %v5853_v12, %v7128_v35  ;;  %v4804_v37 = vpop.f32.mrb[153].mxu1  ;;  %v6040_v36 = vld [vmem:[%s6425_s6 + $0xd0] sm:$0xff] }
 0x3b3   : > { %5044 = vst [vmem:[%s7154_s16 + $0x88] sm:$0xff] %v5012_v10  ;;  %v4951_v41 = vmul.f32 %v4919_v48, %v4789_v23  ;;  %v4920_v45 = vmin.f32 %v4888_v27, 6.0  ;;  %v4805_v47 = vadd.f32 %v4804_v37, %v7122_v56  ;;  %v5854_v26 = vpop.f32.mrb[154].mxu1  ;;  %v6041_v10 = vld [vmem:[%s6425_s6 + $0xc0] sm:$0xff] }
 0x3b4   : > { %v4985_v34 = vmul.f32 0.16666667, %v4953_v16  ;;  %v4954_v29 = vmul.f32 %v4922_v33, %v4800_v9  ;;  %v4861_v31 = vadd.f32 3.0, %v4813_v52  ;;  %v4816_v1 = vadd.f32 %v5854_v26, %v7130_v49  ;;  %v4807_v61 = vpop.f32.mrb[155].mxu1  ;;  %v6042_v16 = vld [vmem:[%s6425_s6 + $0xd8] sm:$0xff] }
 0x3b5   : > { %v4983_v58 = vmul.f32 0.16666667, %v4951_v41  ;;  %v4952_v53 = vmul.f32 %v4920_v45, %v4792_v0  ;;  %v4859_v35 = vadd.f32 3.0, %v4805_v47  ;;  %v4808_v15 = vadd.f32 %v4807_v61, %v7124_v8  ;;  %v6039_v8 = vld [vmem:[%s6425_s6 + $0xa8] sm:$0xff] }
 0x3b6   : > { %v5017_v6 = vadd.f32 %v6036_v60, %v4985_v34  ;;  %v4986_v56 = vmul.f32 0.16666667, %v4954_v29  ;;  %v4893_v22 = vmax.f32 %v4861_v31, 0.0  ;;  %v4862_v59 = vadd.f32 3.0, %v4816_v1 }
 0x3b7   : > { %v5015_v21 = vadd.f32 %v6037_v46, %v4983_v58  ;;  %v4984_v11 = vmul.f32 0.16666667, %v4952_v53  ;;  %v4891_v49 = vmax.f32 %v4859_v35, 0.0  ;;  %v4860_v55 = vadd.f32 3.0, %v4808_v15  ;;  %v6044_v35 = vld [vmem:[%s6425_s6 + $0xf0] sm:$0xff] }
 0x3b8   : > { %5049 = vst [vmem:[%s7154_s16 + $0xb0] sm:$0xff] %v5017_v6  ;;  %v5018_v20 = vadd.f32 %v6038_v30, %v4986_v56  ;;  %v4925_v23 = vmin.f32 %v4893_v22, 6.0  ;;  %v4894_v13 = vmax.f32 %v4862_v59, 0.0  ;;  %v6045_v6 = vld [vmem:[%s6425_s6 + $0xe0] sm:$0xff]  ;;  %v6046_v59 = vld [vmem:[%s6425_s6 + $0xf8] sm:$0xff] }
 0x3b9   : > { %5047 = vst [vmem:[%s7154_s16 + $0xa0] sm:$0xff] %v5015_v21  ;;  %v5016_v54 = vadd.f32 %v6039_v8, %v4984_v11  ;;  %v4923_v51 = vmin.f32 %v4891_v49, 6.0  ;;  %v4892_v40 = vmax.f32 %v4860_v55, 0.0  ;;  %v5857_v9 = vpop.f32.mrb[156].mxu1  ;;  %v6047_v21 = vld [vmem:[%s6425_s6 + $0xe8] sm:$0xff] }
 0x3ba   : > { %5050 = vst [vmem:[%s7154_s16 + $0xb8] sm:$0xff] %v5018_v20  ;;  %v4957_v7 = vmul.f32 %v4925_v23, %v4813_v52  ;;  %v4926_v19 = vmin.f32 %v4894_v13, 6.0  ;;  %v4829_v39 = vadd.f32 %v5857_v9, %v7142_v44  ;;  %v4820_v2 = vpop.f32.mrb[157].mxu1 }
 0x3bb   : > { %5048 = vst [vmem:[%s7154_s16 + $0xa8] sm:$0xff] %v5016_v54  ;;  %v4955_v0 = vmul.f32 %v4923_v51, %v4805_v47  ;;  %v4924_v38 = vmin.f32 %v4892_v40, 6.0  ;;  %v4821_v25 = vadd.f32 %v4820_v2, %v7135_v14  ;;  %v5858_v57 = vpop.f32.mrb[158].mxu1 }
 0x3bc   : > { %v4989_v24 = vmul.f32 0.16666667, %v4957_v7  ;;  %v4958_v32 = vmul.f32 %v4926_v19, %v4816_v1  ;;  %v4865_v5 = vadd.f32 3.0, %v4829_v39  ;;  %v4832_v18 = vadd.f32 %v5858_v57, %v7146_v50  ;;  %v4823_v62 = vpop.f32.mrb[159].mxu1 }
 0x3bd   : > { %v4987_v4 = vmul.f32 0.16666667, %v4955_v0  ;;  %v4956_v43 = vmul.f32 %v4924_v38, %v4808_v15  ;;  %v4863_v44 = vadd.f32 3.0, %v4821_v25  ;;  %v4824_v3 = vadd.f32 %v4823_v62, %v7139_v63  ;;  %v6043_v63 = vld [vmem:[%s6425_s6 + $0xc8] sm:$0xff] }
 0x3be   : > { %v5021_v28 = vadd.f32 %v6040_v36, %v4989_v24  ;;  %v4990_v14 = vmul.f32 0.16666667, %v4958_v32  ;;  %v4897_v42 = vmax.f32 %v4865_v5, 0.0  ;;  %v4866_v17 = vadd.f32 3.0, %v4832_v18 }
 0x3bf   : > { %v5019_v48 = vadd.f32 %v6041_v10, %v4987_v4  ;;  %v4988_v27 = vmul.f32 0.16666667, %v4956_v43  ;;  %v4895_v50 = vmax.f32 %v4863_v44, 0.0  ;;  %v4864_v12 = vadd.f32 3.0, %v4824_v3 }
 0x3c0   : > { %5053 = vst [vmem:[%s7154_s16 + $0xd0] sm:$0xff] %v5021_v28  ;;  %v5022_v33 = vadd.f32 %v6042_v16, %v4990_v14  ;;  %v4929_v52 = vmin.f32 %v4897_v42, 6.0  ;;  %v4898_v37 = vmax.f32 %v4866_v17, 0.0 }
 0x3c1   : > { %5051 = vst [vmem:[%s7154_s16 + $0xc0] sm:$0xff] %v5019_v48  ;;  %v5020_v41 = vadd.f32 %v6043_v63, %v4988_v27  ;;  %v4927_v45 = vmin.f32 %v4895_v50, 6.0  ;;  %v4896_v47 = vmax.f32 %v4864_v12, 0.0 }
 0x3c2   : > { %5054 = vst [vmem:[%s7154_s16 + $0xd8] sm:$0xff] %v5022_v33  ;;  %v4961_v26 = vmul.f32 %v4929_v52, %v4829_v39  ;;  %v4930_v34 = vmin.f32 %v4898_v37, 6.0 }
 0x3c3   : > { %5052 = vst [vmem:[%s7154_s16 + $0xc8] sm:$0xff] %v5020_v41  ;;  %v4959_v29 = vmul.f32 %v4927_v45, %v4821_v25  ;;  %v4928_v31 = vmin.f32 %v4896_v47, 6.0 }
 0x3c4   : > { %v4993_v1 = vmul.f32 0.16666667, %v4961_v26  ;;  %v4962_v61 = vmul.f32 %v4930_v34, %v4832_v18 }
 0x3c5   : > { %v4991_v58 = vmul.f32 0.16666667, %v4959_v29  ;;  %v4960_v53 = vmul.f32 %v4928_v31, %v4824_v3 }
 0x3c6   : > { %v5025_v15 = vadd.f32 %v6044_v35, %v4993_v1  ;;  %v4994_v60 = vmul.f32 0.16666667, %v4962_v61 }
 0x3c7   : > { %v5023_v56 = vadd.f32 %v6045_v6, %v4991_v58  ;;  %v4992_v22 = vmul.f32 0.16666667, %v4960_v53 }
 0x3c8   : > { %5057 = vst [vmem:[%s7154_s16 + $0xf0] sm:$0xff] %v5025_v15  ;;  %v5026_v46 = vadd.f32 %v6046_v59, %v4994_v60 }
 0x3c9   : > { %5055 = vst [vmem:[%s7154_s16 + $0xe0] sm:$0xff] %v5023_v56  ;;  %v5024_v11 = vadd.f32 %v6047_v21, %v4992_v22 }
 0x3ca   : > { %5058 = vst [vmem:[%s7154_s16 + $0xf8] sm:$0xff] %v5026_v46 }
 0x3cb   : > { %5056 = vst [vmem:[%s7154_s16 + $0xe8] sm:$0xff] %v5024_v11 }
 0x3cc   : > { %6147 = shalt.err (!%p6144_p2)
}
 0x3cd   : > { %s6148_s6 = scalar_lea.hbm %s7243_s7, 4096  ;;  %s6152_s30 = scalar_lea.hbm %s7298_s5, 8192 }
 0x3ce   : > { %p6149_p13 = scmp.ne.s32.totalorder %s7243_s7, %s6148_s6  ;;  %p6153_p4 = scmp.lt.u32.totalorder %s7243_s7, %s7298_s5 }
 0x3cf   : > { %p6154_p5 = scmp.lt.u32.totalorder %s6152_s30, %s6148_s6  ;;  %p6156_p11 = scmp.lt.u32.totalorder %s6148_s6, %s7243_s7 }
 0x3d0   : > { %p6150_p6 = pnand %p6149_p13, %p7312_p0 }
 0x3d1   : > { %p6155_p8 = por %p6154_p5, %p6153_p4 }
 0x3d2   : > { %p6151_p10 = pneg %p6150_p6 }
 0x3d3   : > { %p6157_p1 = por %p6156_p11, %p6155_p8 }
 0x3d5   : > { %p6158_p3 = pnand %p6157_p1, %p6151_p10 }
 0x3d7   : > { %6161 = shalt.err (!%p6158_p3)
}
 0x3d8   : > { %s6215_s9 = smov 128   ;;  %s6216_s13 = smov 8  }
 0x3d9   : > { %5869 = dma.vmem_to_hbm [thread:$0]  (%p7312_p0), %s7245_s12, 4096, %s7243_s7, %s5060_s22, %s6215_s9, %s6215_s9, %s6216_s13  }
 0x3da PF: > { %s5088_s17 = sand.u32 1, %s6192_s18   ;;  %p7313_p7 = scmp.ne.s32.totalorder %s7303_s25, 0 }
 0x3db   : > { %p7314_p9 = scmp.ge.s32.totalorder %s6204_s21, 2  ;;  %s5089_s24 = scalar_lea.sflag [#allocation6], %s5088_s17 }
 0x3dd   : > { %p5883_p12 = pnand %p7314_p9, %p7313_p7 }
 0x3df   : > { %6187 = dma.done.wait (!%p5883_p12), %s5089_s24, 4096  }
 0x3e0   : > { %6189 = vsyncadd (!%p5883_p12), %s5089_s24, 4294963200  ;;  %p19_p2 = scmp.ge.s32.totalorder %s6357_s14, 4   ;;  %s7315_s18 = smov %s6196_s19 }
 0x3e1   : > { %s7316_s19 = smov %s6200_s20  ;;  %s7317_s20 = smov %s6373_s27 }
 0x3e2   : > { %s7318_s21 = smov %s6357_s14  ;;  %21 = sbr.rel (!%p19_p2) target bundleno = 6 (0x6), region = 96 }
 0x3e9   :  { %5094 = vsyncpa [#allocation5], 1 }
 0x3ea   :  { %5096 = vsyncpa [#allocation5 + $0x1], 1 }
 0x3eb   :  { %5097 = vsyncpa [#allocation8], 1 }
 0x3ec   :  { %5098 = vsyncpa [#allocation6], 1 }
 0x3ed   :  { %5100 = vsyncpa [#allocation6 + $0x1], 1 }

</bundles_post_ra>
